<compile_context>
chip_gen: v7x
topology: tpu7x:2x2x1
jax: 0.10.0
libtpu: 0.0.40
codegen_flags: <defaults>
</compile_context>

<pallas_src>
import math

import numpy as np
import jax
import jax.numpy as jnp
from jax import lax
from jax.experimental import pallas as pl
from jax.experimental.pallas import tpu as pltpu

MIN_LOG_STD, MAX_LOG_STD = -20.0, 2.0
HALF_LOG_2PI = 0.5 * math.log(2.0 * math.pi)


def _posterior_lstm_kernel(
    x_ref, t_ref, x0_ref, eps_ref,
    w0_ref, b0_ref, wih_ref, whh_ref, bl_ref,
    wf_ref, bf_ref, ww_ref, bw_ref,
    ws_ref, logp_ref,
):
    B, T, _ = x_ref.shape
    H = whh_ref.shape[0]
    dim = eps_ref.shape[-1]
    f32 = jnp.float32

    # ---------------- one-time prologue (was wrapper-side XLA before) -------
    # initial_layer(x0) -> (c0, h0)
    x0 = x0_ref[...][:, 0, :]                                     # (B, obs)
    init = jnp.dot(x0, w0_ref[...], preferred_element_type=f32) + b0_ref[...]
    c = init[:, :H]                                               # (B, H)
    h = init[:, H:]                                               # (B, H)

    # Fused gate weight: rows = [x | w | h], cols = 4H (one MXU push per step).
    W_big = jnp.concatenate([wih_ref[...], whh_ref[...]], axis=0)  # (obs+dim+H, 4H)
    b_big = bl_ref[...]                                            # (1, 4H)

    # Pre-scale the g-gate (cell-candidate) columns by 2 so that one full-vreg
    # sigmoid covers all four gates:  tanh(z) = 2*sigmoid(2z) - 1.
    col = lax.broadcasted_iota(jnp.int32, (1, 4 * H), 1)
    g_scale = jnp.where((col >= 2 * H) & (col < 3 * H), 2.0, 1.0).astype(f32)
    W_big = W_big * g_scale
    b_big = b_big * g_scale

    W_f = wf_ref[...]
    b_f = bf_ref[...]
    W_w = ww_ref[...]
    b_w = bw_ref[...]

    x_all = x_ref[...]                                            # (B, T, obs)
    t_all = t_ref[...]                                            # (B, T, 1)
    eps_all = eps_ref[...]                                        # (B, T, dim)

    w = jnp.zeros((B, dim), f32)
    lp = jnp.zeros((B, 1), f32)
    ws_chunks = []

    # T is small & static: fully unrolled loop -> all slices are static
    # lane/sublane selects.  (Use lax.fori_loop / a time-chunked grid if T grows.)
    for i in range(T):
        x_i = x_all[:, i, :]                                      # (B, obs)
        t_i = t_all[:, i, :]                                      # (B, 1)
        eps_i = eps_all[:, i, :]                                  # (B, dim)

        # ---- single fused gate matmul on the serial critical path ----
        lhs = jnp.concatenate([x_i, w, h], axis=-1)               # (B, obs+dim+H)
        gates = jnp.dot(lhs, W_big, preferred_element_type=f32) + b_big
        s = jax.nn.sigmoid(gates)                                 # ONE EUP pass
        i_g = s[:, 0 * H:1 * H]
        f_g = s[:, 1 * H:2 * H]
        g_g = 2.0 * s[:, 2 * H:3 * H] - 1.0                       # == tanh(z_g)
        o_g = s[:, 3 * H:4 * H]

        c = f_g * c + i_g * g_g
        h_pre = o_g * jnp.tanh(c)

        # Time-modulated residual flow (stand-in for LSTMResNet/LSTMCoupling).
        h = h_pre + t_i * jnp.tanh(
            jnp.dot(h_pre, W_f, preferred_element_type=f32) + b_f)

        # w_layer -> mu, log_std; reparameterized sample.
        mls = jnp.dot(h, W_w, preferred_element_type=f32) + b_w
        mu = mls[:, :dim]
        log_std = jnp.clip(mls[:, dim:], MIN_LOG_STD, MAX_LOG_STD)
        w = mu + jnp.exp(log_std) * eps_i

        # log N(w | mu, std): z == eps exactly (w = mu + std*eps) — no divide.
        lp = lp + jnp.sum(-log_std - HALF_LOG_2PI - 0.5 * eps_i * eps_i,
                          axis=-1, keepdims=True)
        ws_chunks.append(w)

    # Lane-dense single writeback: (B, T*dim).
    ws_ref[...] = jnp.concatenate(ws_chunks, axis=-1).astype(ws_ref.dtype)
    logp_ref[...] = lp


def posterior_lstm_forward(params, x, t, x0, eps):
    """x: (B,T,obs_dim), t: (B,T,1), x0: (B,1,obs_dim), eps: (B,T,dim)."""
    B, T, obs_dim = x.shape
    dim = eps.shape[-1]
    f32 = jnp.float32

    def full(shape):
        nd = len(shape)
        return pl.BlockSpec(shape, lambda i, _nd=nd: (0,) * _nd)

    in_arrays = [
        x.astype(f32), t.astype(f32), x0.astype(f32), eps.astype(f32),
        params["W0"].astype(f32), params["b0"].astype(f32),
        params["W_ih"].astype(f32), params["W_hh"].astype(f32),
        params["b_lstm"].astype(f32),
        params["W_f"].astype(f32), params["b_f"].astype(f32),
        params["W_w"].astype(f32), params["b_w"].astype(f32),
    ]
    in_specs = [full(a.shape) for a in in_arrays]
    out_specs = [full((B, T * dim)), full((B, 1))]

    grid_spec = pltpu.PrefetchScalarGridSpec(
        num_scalar_prefetch=0,
        grid=(1,),               # single grid step; recurrence is an inner loop
        in_specs=in_specs,
        out_specs=out_specs,
    )

    ws_flat, log_p = pl.pallas_call(
        _posterior_lstm_kernel,
        grid_spec=grid_spec,
        out_shape=(
            jax.ShapeDtypeStruct((B, T * dim), x.dtype),
            jax.ShapeDtypeStruct((B, 1), jnp.float32),
        ),
        compiler_params=pltpu.CompilerParams(
            dimension_semantics=("arbitrary",),
        ),
    )(*in_arrays)

    # Only remaining wrapper-side op.
    return ws_flat.reshape(B, T, dim), log_p


def reference_forward(params, x, t, x0, eps):
    """Pure-JAX reference mirroring the module / kernel math."""
    B, T, obs_dim = x.shape
    dim = eps.shape[-1]
    H = params["W_hh"].shape[0]

    init = x0[:, 0, :] @ params["W0"] + params["b0"][0]
    c, h = init[:, :H], init[:, H:]
    w = jnp.zeros((B, dim), jnp.float32)
    log_p = jnp.zeros((B, 1), jnp.float32)
    ws = []
    for i in range(T):
        inp = jnp.concatenate([x[:, i], w], axis=-1)
        gates = inp @ params["W_ih"] + h @ params["W_hh"] + params["b_lstm"][0]
        i_g = jax.nn.sigmoid(gates[:, :H])
        f_g = jax.nn.sigmoid(gates[:, H:2 * H])
        g_g = jnp.tanh(gates[:, 2 * H:3 * H])
        o_g = jax.nn.sigmoid(gates[:, 3 * H:])
        c = f_g * c + i_g * g_g
        h_pre = o_g * jnp.tanh(c)
        h = h_pre + t[:, i] * jnp.tanh(h_pre @ params["W_f"] + params["b_f"][0])
        mls = h @ params["W_w"] + params["b_w"][0]
        mu = mls[:, :dim]
        log_std = jnp.clip(mls[:, dim:], MIN_LOG_STD, MAX_LOG_STD)
        std = jnp.exp(log_std)
        w = mu + std * eps[:, i]
        z = (w - mu) / std
        log_p = log_p + jnp.sum(-log_std - HALF_LOG_2PI - 0.5 * z * z,
                                axis=-1, keepdims=True)
        ws.append(w)
    return jnp.stack(ws, axis=1), log_p


def make_params(key, dim, obs_dim, hidden_state_dim):
    H = hidden_state_dim
    in_dim = obs_dim + dim
    ks = jax.random.split(key, 9)
    s = 0.1
    return {
        # initial_layer: Linear(obs_dim, 2H)
        "W0": s * jax.random.normal(ks[0], (obs_dim, 2 * H), jnp.float32),
        "b0": s * jax.random.normal(ks[1], (1, 2 * H), jnp.float32),
        # LSTM cell gates: Linear(in_dim + H, 4H)
        "W_ih": s * jax.random.normal(ks[2], (in_dim, 4 * H), jnp.float32),
        "W_hh": s * jax.random.normal(ks[3], (H, 4 * H), jnp.float32),
        "b_lstm": s * jax.random.normal(ks[4], (1, 4 * H), jnp.float32),
        # time-modulated residual "flow"
        "W_f": s * jax.random.normal(ks[5], (H, H), jnp.float32),
        "b_f": s * jax.random.normal(ks[6], (1, H), jnp.float32),
        # w_layer: Linear(H, 2*dim)
        "W_w": s * jax.random.normal(ks[7], (H, 2 * dim), jnp.float32),
        "b_w": s * jax.random.normal(ks[8], (1, 2 * dim), jnp.float32),
    }


if __name__ == "__main__":
    B, T = 8, 8
    dim, obs_dim, hidden_state_dim = 4, 4, 32

    key = jax.random.PRNGKey(0)
    k_par, k_x, k_t, k_x0, k_eps = jax.random.split(key, 5)

    params = make_params(k_par, dim, obs_dim, hidden_state_dim)
    x = jax.random.normal(k_x, (B, T, obs_dim), jnp.float32)
    t = jnp.abs(jax.random.normal(k_t, (B, T, 1), jnp.float32))
    x0 = jax.random.normal(k_x0, (B, 1, obs_dim), jnp.float32)
    eps = jax.random.normal(k_eps, (B, T, dim), jnp.float32)  # rsample noise

    fwd = jax.jit(posterior_lstm_forward)
    ws, log_p = fwd(params, x, t, x0, eps)
    ws, log_p = jax.block_until_ready((ws, log_p))

    ws_ref, log_p_ref = reference_forward(params, x, t, x0, eps)
    np.testing.assert_allclose(np.asarray(ws), np.asarray(ws_ref),
                               rtol=1e-4, atol=1e-4)
    np.testing.assert_allclose(np.asarray(log_p), np.asarray(log_p_ref),
                               rtol=1e-4, atol=1e-4)
    print("KERNEL_OK")
</pallas_src>

<mosaic_0001>
module attributes {stable_mosaic.version = 11 : i64} {
  func.func @_posterior_lstm_kernel(%arg0: i32, %arg1: memref<8x8x4xf32, #tpu.memory_space<vmem>>, %arg2: memref<8x8x1xf32, #tpu.memory_space<vmem>>, %arg3: memref<8x1x4xf32, #tpu.memory_space<vmem>>, %arg4: memref<8x8x4xf32, #tpu.memory_space<vmem>>, %arg5: memref<4x64xf32, #tpu.memory_space<vmem>>, %arg6: memref<1x64xf32, #tpu.memory_space<vmem>>, %arg7: memref<8x128xf32, #tpu.memory_space<vmem>>, %arg8: memref<32x128xf32, #tpu.memory_space<vmem>>, %arg9: memref<1x128xf32, #tpu.memory_space<vmem>>, %arg10: memref<32x32xf32, #tpu.memory_space<vmem>>, %arg11: memref<1x32xf32, #tpu.memory_space<vmem>>, %arg12: memref<32x8xf32, #tpu.memory_space<vmem>>, %arg13: memref<1x8xf32, #tpu.memory_space<vmem>>, %arg14: memref<8x32xf32, #tpu.memory_space<vmem>>, %arg15: memref<8x1xf32, #tpu.memory_space<vmem>>) attributes {dimension_semantics = [#tpu.dimension_semantics<arbitrary>], iteration_bounds = array<i64: 1>, scalar_prefetch = 0 : i64, scratch_operands = 0 : i64, tpu.core_type = #tpu.core_type<tc>, window_params = [{pipeline_mode = #tpu.pipeline_mode<synchronous>, transform_indices = @transform_0, window_bounds = array<i64: 8, 8, 4>}, {pipeline_mode = #tpu.pipeline_mode<synchronous>, transform_indices = @transform_1, window_bounds = array<i64: 8, 8, 1>}, {pipeline_mode = #tpu.pipeline_mode<synchronous>, transform_indices = @transform_2, window_bounds = array<i64: 8, 1, 4>}, {pipeline_mode = #tpu.pipeline_mode<synchronous>, transform_indices = @transform_3, window_bounds = array<i64: 8, 8, 4>}, {pipeline_mode = #tpu.pipeline_mode<synchronous>, transform_indices = @transform_4, window_bounds = array<i64: 4, 64>}, {pipeline_mode = #tpu.pipeline_mode<synchronous>, transform_indices = @transform_5, window_bounds = array<i64: 1, 64>}, {pipeline_mode = #tpu.pipeline_mode<synchronous>, transform_indices = @transform_6, window_bounds = array<i64: 8, 128>}, {pipeline_mode = #tpu.pipeline_mode<synchronous>, transform_indices = @transform_7, window_bounds = array<i64: 32, 128>}, {pipeline_mode = #tpu.pipeline_mode<synchronous>, transform_indices = @transform_8, window_bounds = array<i64: 1, 128>}, {pipeline_mode = #tpu.pipeline_mode<synchronous>, transform_indices = @transform_9, window_bounds = array<i64: 32, 32>}, {pipeline_mode = #tpu.pipeline_mode<synchronous>, transform_indices = @transform_10, window_bounds = array<i64: 1, 32>}, {pipeline_mode = #tpu.pipeline_mode<synchronous>, transform_indices = @transform_11, window_bounds = array<i64: 32, 8>}, {pipeline_mode = #tpu.pipeline_mode<synchronous>, transform_indices = @transform_12, window_bounds = array<i64: 1, 8>}, {pipeline_mode = #tpu.pipeline_mode<synchronous>, transform_indices = @transform_13, window_bounds = array<i64: 8, 32>}, {pipeline_mode = #tpu.pipeline_mode<synchronous>, transform_indices = @transform_14, window_bounds = array<i64: 8, 1>}]} {
    %c0 = arith.constant 0 : index
    %c0_0 = arith.constant 0 : index
    %c0_1 = arith.constant 0 : index
    %0 = vector.load %arg3[%c0, %c0_0, %c0_1] : memref<8x1x4xf32, #tpu.memory_space<vmem>>, vector<8x1x4xf32>
    %1 = vector.shape_cast %0 : vector<8x1x4xf32> to vector<8x4xf32>
    %c0_2 = arith.constant 0 : index
    %c0_3 = arith.constant 0 : index
    %2 = vector.load %arg5[%c0_2, %c0_3] : memref<4x64xf32, #tpu.memory_space<vmem>>, vector<4x64xf32>
    %cst = arith.constant dense<0.000000e+00> : vector<8x64xf32>
    %3 = tpu.matmul %1, %2, %cst {dimension_numbers = #tpu.dot_dimension_numbers<[1], [0], [0], [1], [0, 0, 1, 1], [], []>} : vector<8x4xf32>, vector<4x64xf32>, vector<8x64xf32> -> vector<8x64xf32>
    %c0_4 = arith.constant 0 : index
    %c0_5 = arith.constant 0 : index
    %4 = vector.load %arg6[%c0_4, %c0_5] : memref<1x64xf32, #tpu.memory_space<vmem>>, vector<1x64xf32>
    %5 = vector.broadcast %4 : vector<1x64xf32> to vector<8x64xf32>
    %6 = arith.addf %3, %5 : vector<8x64xf32>
    %7 = vector.extract_strided_slice %6 {offsets = [0, 0], sizes = [8, 32], strides = [1, 1]} : vector<8x64xf32> to vector<8x32xf32>
    %8 = vector.extract_strided_slice %6 {offsets = [0, 32], sizes = [8, 32], strides = [1, 1]} : vector<8x64xf32> to vector<8x32xf32>
    %c0_6 = arith.constant 0 : index
    %c0_7 = arith.constant 0 : index
    %9 = vector.load %arg7[%c0_6, %c0_7] : memref<8x128xf32, #tpu.memory_space<vmem>>, vector<8x128xf32>
    %c0_8 = arith.constant 0 : index
    %c0_9 = arith.constant 0 : index
    %10 = vector.load %arg8[%c0_8, %c0_9] : memref<32x128xf32, #tpu.memory_space<vmem>>, vector<32x128xf32>
    %11 = tpu.concatenate %9, %10 in 0 : vector<8x128xf32>, vector<32x128xf32> -> vector<40x128xf32>
    %c0_10 = arith.constant 0 : index
    %c0_11 = arith.constant 0 : index
    %12 = vector.load %arg9[%c0_10, %c0_11] : memref<1x128xf32, #tpu.memory_space<vmem>>, vector<1x128xf32>
    %13 = tpu.iota {dimensions = array<i32: 1>} : vector<1x128xi32>
    %c64_i32 = arith.constant 64 : i32
    %14 = vector.broadcast %c64_i32 : i32 to vector<1x128xi32>
    %15 = arith.cmpi sge, %13, %14 : vector<1x128xi32>
    %c96_i32 = arith.constant 96 : i32
    %16 = vector.broadcast %c96_i32 : i32 to vector<1x128xi32>
    %17 = arith.cmpi slt, %13, %16 : vector<1x128xi32>
    %18 = arith.andi %15, %17 : vector<1x128xi1>
    %cst_12 = arith.constant 2.000000e+00 : f32
    %cst_13 = arith.constant 1.000000e+00 : f32
    %19 = vector.broadcast %cst_12 : f32 to vector<1x128xf32>
    %20 = vector.broadcast %cst_13 : f32 to vector<1x128xf32>
    %21 = arith.select %18, %19, %20 : vector<1x128xi1>, vector<1x128xf32>
    %22 = vector.broadcast %21 : vector<1x128xf32> to vector<40x128xf32>
    %23 = arith.mulf %11, %22 : vector<40x128xf32>
    %24 = arith.mulf %12, %21 : vector<1x128xf32>
    %c0_14 = arith.constant 0 : index
    %c0_15 = arith.constant 0 : index
    %25 = vector.load %arg10[%c0_14, %c0_15] : memref<32x32xf32, #tpu.memory_space<vmem>>, vector<32x32xf32>
    %c0_16 = arith.constant 0 : index
    %c0_17 = arith.constant 0 : index
    %26 = vector.load %arg11[%c0_16, %c0_17] : memref<1x32xf32, #tpu.memory_space<vmem>>, vector<1x32xf32>
    %c0_18 = arith.constant 0 : index
    %c0_19 = arith.constant 0 : index
    %27 = vector.load %arg12[%c0_18, %c0_19] : memref<32x8xf32, #tpu.memory_space<vmem>>, vector<32x8xf32>
    %c0_20 = arith.constant 0 : index
    %c0_21 = arith.constant 0 : index
    %28 = vector.load %arg13[%c0_20, %c0_21] : memref<1x8xf32, #tpu.memory_space<vmem>>, vector<1x8xf32>
    %c0_22 = arith.constant 0 : index
    %c0_23 = arith.constant 0 : index
    %c0_24 = arith.constant 0 : index
    %29 = vector.load %arg1[%c0_22, %c0_23, %c0_24] : memref<8x8x4xf32, #tpu.memory_space<vmem>>, vector<8x8x4xf32>
    %c0_25 = arith.constant 0 : index
    %c0_26 = arith.constant 0 : index
    %c0_27 = arith.constant 0 : index
    %30 = vector.load %arg2[%c0_25, %c0_26, %c0_27] : memref<8x8x1xf32, #tpu.memory_space<vmem>>, vector<8x8x1xf32>
    %c0_28 = arith.constant 0 : index
    %c0_29 = arith.constant 0 : index
    %c0_30 = arith.constant 0 : index
    %31 = vector.load %arg4[%c0_28, %c0_29, %c0_30] : memref<8x8x4xf32, #tpu.memory_space<vmem>>, vector<8x8x4xf32>
    %cst_31 = arith.constant 0.000000e+00 : f32
    %32 = vector.broadcast %cst_31 : f32 to vector<8x4xf32>
    %cst_32 = arith.constant 0.000000e+00 : f32
    %33 = vector.broadcast %cst_32 : f32 to vector<8x1xf32>
    %34 = vector.extract_strided_slice %29 {offsets = [0, 0, 0], sizes = [8, 1, 4], strides = [1, 1, 1]} : vector<8x8x4xf32> to vector<8x1x4xf32>
    %35 = vector.shape_cast %34 : vector<8x1x4xf32> to vector<8x4xf32>
    %36 = vector.extract_strided_slice %30 {offsets = [0, 0, 0], sizes = [8, 1, 1], strides = [1, 1, 1]} : vector<8x8x1xf32> to vector<8x1x1xf32>
    %37 = vector.shape_cast %36 : vector<8x1x1xf32> to vector<8x1xf32>
    %38 = vector.extract_strided_slice %31 {offsets = [0, 0, 0], sizes = [8, 1, 4], strides = [1, 1, 1]} : vector<8x8x4xf32> to vector<8x1x4xf32>
    %39 = vector.shape_cast %38 : vector<8x1x4xf32> to vector<8x4xf32>
    %40 = tpu.concatenate %35, %32, %8 in 1 : vector<8x4xf32>, vector<8x4xf32>, vector<8x32xf32> -> vector<8x40xf32>
    %cst_33 = arith.constant dense<0.000000e+00> : vector<8x128xf32>
    %41 = tpu.matmul %40, %23, %cst_33 {dimension_numbers = #tpu.dot_dimension_numbers<[1], [0], [0], [1], [0, 0, 1, 1], [], []>} : vector<8x40xf32>, vector<40x128xf32>, vector<8x128xf32> -> vector<8x128xf32>
    %42 = vector.broadcast %24 : vector<1x128xf32> to vector<8x128xf32>
    %43 = arith.addf %41, %42 : vector<8x128xf32>
    %44 = arith.negf %43 : vector<8x128xf32>
    %45 = math.exp %44 : vector<8x128xf32>
    %cst_34 = arith.constant 1.000000e+00 : f32
    %46 = vector.broadcast %cst_34 : f32 to vector<8x128xf32>
    %47 = arith.addf %46, %45 : vector<8x128xf32>
    %48 = arith.divf %46, %47 : vector<8x128xf32>
    %49 = vector.extract_strided_slice %48 {offsets = [0, 0], sizes = [8, 32], strides = [1, 1]} : vector<8x128xf32> to vector<8x32xf32>
    %50 = vector.extract_strided_slice %48 {offsets = [0, 32], sizes = [8, 32], strides = [1, 1]} : vector<8x128xf32> to vector<8x32xf32>
    %51 = vector.extract_strided_slice %48 {offsets = [0, 64], sizes = [8, 32], strides = [1, 1]} : vector<8x128xf32> to vector<8x32xf32>
    %cst_35 = arith.constant 2.000000e+00 : f32
    %52 = vector.broadcast %cst_35 : f32 to vector<8x32xf32>
    %53 = arith.mulf %52, %51 : vector<8x32xf32>
    %cst_36 = arith.constant 1.000000e+00 : f32
    %54 = vector.broadcast %cst_36 : f32 to vector<8x32xf32>
    %55 = arith.subf %53, %54 : vector<8x32xf32>
    %56 = vector.extract_strided_slice %48 {offsets = [0, 96], sizes = [8, 32], strides = [1, 1]} : vector<8x128xf32> to vector<8x32xf32>
    %57 = arith.mulf %50, %7 : vector<8x32xf32>
    %58 = arith.mulf %49, %55 : vector<8x32xf32>
    %59 = arith.addf %57, %58 : vector<8x32xf32>
    %60 = math.tanh %59 : vector<8x32xf32>
    %61 = arith.mulf %56, %60 : vector<8x32xf32>
    %cst_37 = arith.constant dense<0.000000e+00> : vector<8x32xf32>
    %62 = tpu.matmul %61, %25, %cst_37 {dimension_numbers = #tpu.dot_dimension_numbers<[1], [0], [0], [1], [0, 0, 1, 1], [], []>} : vector<8x32xf32>, vector<32x32xf32>, vector<8x32xf32> -> vector<8x32xf32>
    %63 = vector.broadcast %26 : vector<1x32xf32> to vector<8x32xf32>
    %64 = arith.addf %62, %63 : vector<8x32xf32>
    %65 = math.tanh %64 : vector<8x32xf32>
    %66 = vector.broadcast %37 : vector<8x1xf32> to vector<8x32xf32>
    %67 = arith.mulf %66, %65 : vector<8x32xf32>
    %68 = arith.addf %61, %67 : vector<8x32xf32>
    %cst_38 = arith.constant dense<0.000000e+00> : vector<8x8xf32>
    %69 = tpu.matmul %68, %27, %cst_38 {dimension_numbers = #tpu.dot_dimension_numbers<[1], [0], [0], [1], [0, 0, 1, 1], [], []>} : vector<8x32xf32>, vector<32x8xf32>, vector<8x8xf32> -> vector<8x8xf32>
    %70 = vector.broadcast %28 : vector<1x8xf32> to vector<8x8xf32>
    %71 = arith.addf %69, %70 : vector<8x8xf32>
    %72 = vector.extract_strided_slice %71 {offsets = [0, 0], sizes = [8, 4], strides = [1, 1]} : vector<8x8xf32> to vector<8x4xf32>
    %73 = vector.extract_strided_slice %71 {offsets = [0, 4], sizes = [8, 4], strides = [1, 1]} : vector<8x8xf32> to vector<8x4xf32>
    %cst_39 = arith.constant -2.000000e+01 : f32
    %cst_40 = arith.constant 2.000000e+00 : f32
    %74 = vector.broadcast %cst_39 : f32 to vector<8x4xf32>
    %75 = arith.maximumf %74, %73 : vector<8x4xf32>
    %76 = vector.broadcast %cst_40 : f32 to vector<8x4xf32>
    %77 = arith.minimumf %76, %75 : vector<8x4xf32>
    %78 = math.exp %77 : vector<8x4xf32>
    %79 = arith.mulf %78, %39 : vector<8x4xf32>
    %80 = arith.addf %72, %79 : vector<8x4xf32>
    %cst_41 = arith.constant 0.000000e+00 : f32
    %81 = vector.broadcast %cst_41 : f32 to vector<8x4xf32>
    %82 = arith.subf %81, %77 : vector<8x4xf32>
    %cst_42 = arith.constant 0.918938517 : f32
    %83 = vector.broadcast %cst_42 : f32 to vector<8x4xf32>
    %84 = arith.subf %82, %83 : vector<8x4xf32>
    %cst_43 = arith.constant 5.000000e-01 : f32
    %85 = vector.broadcast %cst_43 : f32 to vector<8x4xf32>
    %86 = arith.mulf %85, %39 : vector<8x4xf32>
    %87 = arith.mulf %86, %39 : vector<8x4xf32>
    %88 = arith.subf %84, %87 : vector<8x4xf32>
    %cst_44 = arith.constant dense<0.000000e+00> : vector<8xf32>
    %89 = vector.multi_reduction <add>, %88, %cst_44 [1] : vector<8x4xf32> to vector<8xf32>
    %90 = vector.shape_cast %89 : vector<8xf32> to vector<8x1xf32>
    %91 = arith.addf %33, %90 : vector<8x1xf32>
    %92 = vector.extract_strided_slice %29 {offsets = [0, 1, 0], sizes = [8, 1, 4], strides = [1, 1, 1]} : vector<8x8x4xf32> to vector<8x1x4xf32>
    %93 = vector.shape_cast %92 : vector<8x1x4xf32> to vector<8x4xf32>
    %94 = vector.extract_strided_slice %30 {offsets = [0, 1, 0], sizes = [8, 1, 1], strides = [1, 1, 1]} : vector<8x8x1xf32> to vector<8x1x1xf32>
    %95 = vector.shape_cast %94 : vector<8x1x1xf32> to vector<8x1xf32>
    %96 = vector.extract_strided_slice %31 {offsets = [0, 1, 0], sizes = [8, 1, 4], strides = [1, 1, 1]} : vector<8x8x4xf32> to vector<8x1x4xf32>
    %97 = vector.shape_cast %96 : vector<8x1x4xf32> to vector<8x4xf32>
    %98 = tpu.concatenate %93, %80, %68 in 1 : vector<8x4xf32>, vector<8x4xf32>, vector<8x32xf32> -> vector<8x40xf32>
    %cst_45 = arith.constant dense<0.000000e+00> : vector<8x128xf32>
    %99 = tpu.matmul %98, %23, %cst_45 {dimension_numbers = #tpu.dot_dimension_numbers<[1], [0], [0], [1], [0, 0, 1, 1], [], []>} : vector<8x40xf32>, vector<40x128xf32>, vector<8x128xf32> -> vector<8x128xf32>
    %100 = vector.broadcast %24 : vector<1x128xf32> to vector<8x128xf32>
    %101 = arith.addf %99, %100 : vector<8x128xf32>
    %102 = arith.negf %101 : vector<8x128xf32>
    %103 = math.exp %102 : vector<8x128xf32>
    %cst_46 = arith.constant 1.000000e+00 : f32
    %104 = vector.broadcast %cst_46 : f32 to vector<8x128xf32>
    %105 = arith.addf %104, %103 : vector<8x128xf32>
    %106 = arith.divf %104, %105 : vector<8x128xf32>
    %107 = vector.extract_strided_slice %106 {offsets = [0, 0], sizes = [8, 32], strides = [1, 1]} : vector<8x128xf32> to vector<8x32xf32>
    %108 = vector.extract_strided_slice %106 {offsets = [0, 32], sizes = [8, 32], strides = [1, 1]} : vector<8x128xf32> to vector<8x32xf32>
    %109 = vector.extract_strided_slice %106 {offsets = [0, 64], sizes = [8, 32], strides = [1, 1]} : vector<8x128xf32> to vector<8x32xf32>
    %cst_47 = arith.constant 2.000000e+00 : f32
    %110 = vector.broadcast %cst_47 : f32 to vector<8x32xf32>
    %111 = arith.mulf %110, %109 : vector<8x32xf32>
    %cst_48 = arith.constant 1.000000e+00 : f32
    %112 = vector.broadcast %cst_48 : f32 to vector<8x32xf32>
    %113 = arith.subf %111, %112 : vector<8x32xf32>
    %114 = vector.extract_strided_slice %106 {offsets = [0, 96], sizes = [8, 32], strides = [1, 1]} : vector<8x128xf32> to vector<8x32xf32>
    %115 = arith.mulf %108, %59 : vector<8x32xf32>
    %116 = arith.mulf %107, %113 : vector<8x32xf32>
    %117 = arith.addf %115, %116 : vector<8x32xf32>
    %118 = math.tanh %117 : vector<8x32xf32>
    %119 = arith.mulf %114, %118 : vector<8x32xf32>
    %cst_49 = arith.constant dense<0.000000e+00> : vector<8x32xf32>
    %120 = tpu.matmul %119, %25, %cst_49 {dimension_numbers = #tpu.dot_dimension_numbers<[1], [0], [0], [1], [0, 0, 1, 1], [], []>} : vector<8x32xf32>, vector<32x32xf32>, vector<8x32xf32> -> vector<8x32xf32>
    %121 = vector.broadcast %26 : vector<1x32xf32> to vector<8x32xf32>
    %122 = arith.addf %120, %121 : vector<8x32xf32>
    %123 = math.tanh %122 : vector<8x32xf32>
    %124 = vector.broadcast %95 : vector<8x1xf32> to vector<8x32xf32>
    %125 = arith.mulf %124, %123 : vector<8x32xf32>
    %126 = arith.addf %119, %125 : vector<8x32xf32>
    %cst_50 = arith.constant dense<0.000000e+00> : vector<8x8xf32>
    %127 = tpu.matmul %126, %27, %cst_50 {dimension_numbers = #tpu.dot_dimension_numbers<[1], [0], [0], [1], [0, 0, 1, 1], [], []>} : vector<8x32xf32>, vector<32x8xf32>, vector<8x8xf32> -> vector<8x8xf32>
    %128 = vector.broadcast %28 : vector<1x8xf32> to vector<8x8xf32>
    %129 = arith.addf %127, %128 : vector<8x8xf32>
    %130 = vector.extract_strided_slice %129 {offsets = [0, 0], sizes = [8, 4], strides = [1, 1]} : vector<8x8xf32> to vector<8x4xf32>
    %131 = vector.extract_strided_slice %129 {offsets = [0, 4], sizes = [8, 4], strides = [1, 1]} : vector<8x8xf32> to vector<8x4xf32>
    %cst_51 = arith.constant -2.000000e+01 : f32
    %cst_52 = arith.constant 2.000000e+00 : f32
    %132 = vector.broadcast %cst_51 : f32 to vector<8x4xf32>
    %133 = arith.maximumf %132, %131 : vector<8x4xf32>
    %134 = vector.broadcast %cst_52 : f32 to vector<8x4xf32>
    %135 = arith.minimumf %134, %133 : vector<8x4xf32>
    %136 = math.exp %135 : vector<8x4xf32>
    %137 = arith.mulf %136, %97 : vector<8x4xf32>
    %138 = arith.addf %130, %137 : vector<8x4xf32>
    %cst_53 = arith.constant 0.000000e+00 : f32
    %139 = vector.broadcast %cst_53 : f32 to vector<8x4xf32>
    %140 = arith.subf %139, %135 : vector<8x4xf32>
    %cst_54 = arith.constant 0.918938517 : f32
    %141 = vector.broadcast %cst_54 : f32 to vector<8x4xf32>
    %142 = arith.subf %140, %141 : vector<8x4xf32>
    %cst_55 = arith.constant 5.000000e-01 : f32
    %143 = vector.broadcast %cst_55 : f32 to vector<8x4xf32>
    %144 = arith.mulf %143, %97 : vector<8x4xf32>
    %145 = arith.mulf %144, %97 : vector<8x4xf32>
    %146 = arith.subf %142, %145 : vector<8x4xf32>
    %cst_56 = arith.constant dense<0.000000e+00> : vector<8xf32>
    %147 = vector.multi_reduction <add>, %146, %cst_56 [1] : vector<8x4xf32> to vector<8xf32>
    %148 = vector.shape_cast %147 : vector<8xf32> to vector<8x1xf32>
    %149 = arith.addf %91, %148 : vector<8x1xf32>
    %150 = vector.extract_strided_slice %29 {offsets = [0, 2, 0], sizes = [8, 1, 4], strides = [1, 1, 1]} : vector<8x8x4xf32> to vector<8x1x4xf32>
    %151 = vector.shape_cast %150 : vector<8x1x4xf32> to vector<8x4xf32>
    %152 = vector.extract_strided_slice %30 {offsets = [0, 2, 0], sizes = [8, 1, 1], strides = [1, 1, 1]} : vector<8x8x1xf32> to vector<8x1x1xf32>
    %153 = vector.shape_cast %152 : vector<8x1x1xf32> to vector<8x1xf32>
    %154 = vector.extract_strided_slice %31 {offsets = [0, 2, 0], sizes = [8, 1, 4], strides = [1, 1, 1]} : vector<8x8x4xf32> to vector<8x1x4xf32>
    %155 = vector.shape_cast %154 : vector<8x1x4xf32> to vector<8x4xf32>
    %156 = tpu.concatenate %151, %138, %126 in 1 : vector<8x4xf32>, vector<8x4xf32>, vector<8x32xf32> -> vector<8x40xf32>
    %cst_57 = arith.constant dense<0.000000e+00> : vector<8x128xf32>
    %157 = tpu.matmul %156, %23, %cst_57 {dimension_numbers = #tpu.dot_dimension_numbers<[1], [0], [0], [1], [0, 0, 1, 1], [], []>} : vector<8x40xf32>, vector<40x128xf32>, vector<8x128xf32> -> vector<8x128xf32>
    %158 = vector.broadcast %24 : vector<1x128xf32> to vector<8x128xf32>
    %159 = arith.addf %157, %158 : vector<8x128xf32>
    %160 = arith.negf %159 : vector<8x128xf32>
    %161 = math.exp %160 : vector<8x128xf32>
    %cst_58 = arith.constant 1.000000e+00 : f32
    %162 = vector.broadcast %cst_58 : f32 to vector<8x128xf32>
    %163 = arith.addf %162, %161 : vector<8x128xf32>
    %164 = arith.divf %162, %163 : vector<8x128xf32>
    %165 = vector.extract_strided_slice %164 {offsets = [0, 0], sizes = [8, 32], strides = [1, 1]} : vector<8x128xf32> to vector<8x32xf32>
    %166 = vector.extract_strided_slice %164 {offsets = [0, 32], sizes = [8, 32], strides = [1, 1]} : vector<8x128xf32> to vector<8x32xf32>
    %167 = vector.extract_strided_slice %164 {offsets = [0, 64], sizes = [8, 32], strides = [1, 1]} : vector<8x128xf32> to vector<8x32xf32>
    %cst_59 = arith.constant 2.000000e+00 : f32
    %168 = vector.broadcast %cst_59 : f32 to vector<8x32xf32>
    %169 = arith.mulf %168, %167 : vector<8x32xf32>
    %cst_60 = arith.constant 1.000000e+00 : f32
    %170 = vector.broadcast %cst_60 : f32 to vector<8x32xf32>
    %171 = arith.subf %169, %170 : vector<8x32xf32>
    %172 = vector.extract_strided_slice %164 {offsets = [0, 96], sizes = [8, 32], strides = [1, 1]} : vector<8x128xf32> to vector<8x32xf32>
    %173 = arith.mulf %166, %117 : vector<8x32xf32>
    %174 = arith.mulf %165, %171 : vector<8x32xf32>
    %175 = arith.addf %173, %174 : vector<8x32xf32>
    %176 = math.tanh %175 : vector<8x32xf32>
    %177 = arith.mulf %172, %176 : vector<8x32xf32>
    %cst_61 = arith.constant dense<0.000000e+00> : vector<8x32xf32>
    %178 = tpu.matmul %177, %25, %cst_61 {dimension_numbers = #tpu.dot_dimension_numbers<[1], [0], [0], [1], [0, 0, 1, 1], [], []>} : vector<8x32xf32>, vector<32x32xf32>, vector<8x32xf32> -> vector<8x32xf32>
    %179 = vector.broadcast %26 : vector<1x32xf32> to vector<8x32xf32>
    %180 = arith.addf %178, %179 : vector<8x32xf32>
    %181 = math.tanh %180 : vector<8x32xf32>
    %182 = vector.broadcast %153 : vector<8x1xf32> to vector<8x32xf32>
    %183 = arith.mulf %182, %181 : vector<8x32xf32>
    %184 = arith.addf %177, %183 : vector<8x32xf32>
    %cst_62 = arith.constant dense<0.000000e+00> : vector<8x8xf32>
    %185 = tpu.matmul %184, %27, %cst_62 {dimension_numbers = #tpu.dot_dimension_numbers<[1], [0], [0], [1], [0, 0, 1, 1], [], []>} : vector<8x32xf32>, vector<32x8xf32>, vector<8x8xf32> -> vector<8x8xf32>
    %186 = vector.broadcast %28 : vector<1x8xf32> to vector<8x8xf32>
    %187 = arith.addf %185, %186 : vector<8x8xf32>
    %188 = vector.extract_strided_slice %187 {offsets = [0, 0], sizes = [8, 4], strides = [1, 1]} : vector<8x8xf32> to vector<8x4xf32>
    %189 = vector.extract_strided_slice %187 {offsets = [0, 4], sizes = [8, 4], strides = [1, 1]} : vector<8x8xf32> to vector<8x4xf32>
    %cst_63 = arith.constant -2.000000e+01 : f32
    %cst_64 = arith.constant 2.000000e+00 : f32
    %190 = vector.broadcast %cst_63 : f32 to vector<8x4xf32>
    %191 = arith.maximumf %190, %189 : vector<8x4xf32>
    %192 = vector.broadcast %cst_64 : f32 to vector<8x4xf32>
    %193 = arith.minimumf %192, %191 : vector<8x4xf32>
    %194 = math.exp %193 : vector<8x4xf32>
    %195 = arith.mulf %194, %155 : vector<8x4xf32>
    %196 = arith.addf %188, %195 : vector<8x4xf32>
    %cst_65 = arith.constant 0.000000e+00 : f32
    %197 = vector.broadcast %cst_65 : f32 to vector<8x4xf32>
    %198 = arith.subf %197, %193 : vector<8x4xf32>
    %cst_66 = arith.constant 0.918938517 : f32
    %199 = vector.broadcast %cst_66 : f32 to vector<8x4xf32>
    %200 = arith.subf %198, %199 : vector<8x4xf32>
    %cst_67 = arith.constant 5.000000e-01 : f32
    %201 = vector.broadcast %cst_67 : f32 to vector<8x4xf32>
    %202 = arith.mulf %201, %155 : vector<8x4xf32>
    %203 = arith.mulf %202, %155 : vector<8x4xf32>
    %204 = arith.subf %200, %203 : vector<8x4xf32>
    %cst_68 = arith.constant dense<0.000000e+00> : vector<8xf32>
    %205 = vector.multi_reduction <add>, %204, %cst_68 [1] : vector<8x4xf32> to vector<8xf32>
    %206 = vector.shape_cast %205 : vector<8xf32> to vector<8x1xf32>
    %207 = arith.addf %149, %206 : vector<8x1xf32>
    %208 = vector.extract_strided_slice %29 {offsets = [0, 3, 0], sizes = [8, 1, 4], strides = [1, 1, 1]} : vector<8x8x4xf32> to vector<8x1x4xf32>
    %209 = vector.shape_cast %208 : vector<8x1x4xf32> to vector<8x4xf32>
    %210 = vector.extract_strided_slice %30 {offsets = [0, 3, 0], sizes = [8, 1, 1], strides = [1, 1, 1]} : vector<8x8x1xf32> to vector<8x1x1xf32>
    %211 = vector.shape_cast %210 : vector<8x1x1xf32> to vector<8x1xf32>
    %212 = vector.extract_strided_slice %31 {offsets = [0, 3, 0], sizes = [8, 1, 4], strides = [1, 1, 1]} : vector<8x8x4xf32> to vector<8x1x4xf32>
    %213 = vector.shape_cast %212 : vector<8x1x4xf32> to vector<8x4xf32>
    %214 = tpu.concatenate %209, %196, %184 in 1 : vector<8x4xf32>, vector<8x4xf32>, vector<8x32xf32> -> vector<8x40xf32>
    %cst_69 = arith.constant dense<0.000000e+00> : vector<8x128xf32>
    %215 = tpu.matmul %214, %23, %cst_69 {dimension_numbers = #tpu.dot_dimension_numbers<[1], [0], [0], [1], [0, 0, 1, 1], [], []>} : vector<8x40xf32>, vector<40x128xf32>, vector<8x128xf32> -> vector<8x128xf32>
    %216 = vector.broadcast %24 : vector<1x128xf32> to vector<8x128xf32>
    %217 = arith.addf %215, %216 : vector<8x128xf32>
    %218 = arith.negf %217 : vector<8x128xf32>
    %219 = math.exp %218 : vector<8x128xf32>
    %cst_70 = arith.constant 1.000000e+00 : f32
    %220 = vector.broadcast %cst_70 : f32 to vector<8x128xf32>
    %221 = arith.addf %220, %219 : vector<8x128xf32>
    %222 = arith.divf %220, %221 : vector<8x128xf32>
    %223 = vector.extract_strided_slice %222 {offsets = [0, 0], sizes = [8, 32], strides = [1, 1]} : vector<8x128xf32> to vector<8x32xf32>
    %224 = vector.extract_strided_slice %222 {offsets = [0, 32], sizes = [8, 32], strides = [1, 1]} : vector<8x128xf32> to vector<8x32xf32>
    %225 = vector.extract_strided_slice %222 {offsets = [0, 64], sizes = [8, 32], strides = [1, 1]} : vector<8x128xf32> to vector<8x32xf32>
    %cst_71 = arith.constant 2.000000e+00 : f32
    %226 = vector.broadcast %cst_71 : f32 to vector<8x32xf32>
    %227 = arith.mulf %226, %225 : vector<8x32xf32>
    %cst_72 = arith.constant 1.000000e+00 : f32
    %228 = vector.broadcast %cst_72 : f32 to vector<8x32xf32>
    %229 = arith.subf %227, %228 : vector<8x32xf32>
    %230 = vector.extract_strided_slice %222 {offsets = [0, 96], sizes = [8, 32], strides = [1, 1]} : vector<8x128xf32> to vector<8x32xf32>
    %231 = arith.mulf %224, %175 : vector<8x32xf32>
    %232 = arith.mulf %223, %229 : vector<8x32xf32>
    %233 = arith.addf %231, %232 : vector<8x32xf32>
    %234 = math.tanh %233 : vector<8x32xf32>
    %235 = arith.mulf %230, %234 : vector<8x32xf32>
    %cst_73 = arith.constant dense<0.000000e+00> : vector<8x32xf32>
    %236 = tpu.matmul %235, %25, %cst_73 {dimension_numbers = #tpu.dot_dimension_numbers<[1], [0], [0], [1], [0, 0, 1, 1], [], []>} : vector<8x32xf32>, vector<32x32xf32>, vector<8x32xf32> -> vector<8x32xf32>
    %237 = vector.broadcast %26 : vector<1x32xf32> to vector<8x32xf32>
    %238 = arith.addf %236, %237 : vector<8x32xf32>
    %239 = math.tanh %238 : vector<8x32xf32>
    %240 = vector.broadcast %211 : vector<8x1xf32> to vector<8x32xf32>
    %241 = arith.mulf %240, %239 : vector<8x32xf32>
    %242 = arith.addf %235, %241 : vector<8x32xf32>
    %cst_74 = arith.constant dense<0.000000e+00> : vector<8x8xf32>
    %243 = tpu.matmul %242, %27, %cst_74 {dimension_numbers = #tpu.dot_dimension_numbers<[1], [0], [0], [1], [0, 0, 1, 1], [], []>} : vector<8x32xf32>, vector<32x8xf32>, vector<8x8xf32> -> vector<8x8xf32>
    %244 = vector.broadcast %28 : vector<1x8xf32> to vector<8x8xf32>
    %245 = arith.addf %243, %244 : vector<8x8xf32>
    %246 = vector.extract_strided_slice %245 {offsets = [0, 0], sizes = [8, 4], strides = [1, 1]} : vector<8x8xf32> to vector<8x4xf32>
    %247 = vector.extract_strided_slice %245 {offsets = [0, 4], sizes = [8, 4], strides = [1, 1]} : vector<8x8xf32> to vector<8x4xf32>
    %cst_75 = arith.constant -2.000000e+01 : f32
    %cst_76 = arith.constant 2.000000e+00 : f32
    %248 = vector.broadcast %cst_75 : f32 to vector<8x4xf32>
    %249 = arith.maximumf %248, %247 : vector<8x4xf32>
    %250 = vector.broadcast %cst_76 : f32 to vector<8x4xf32>
    %251 = arith.minimumf %250, %249 : vector<8x4xf32>
    %252 = math.exp %251 : vector<8x4xf32>
    %253 = arith.mulf %252, %213 : vector<8x4xf32>
    %254 = arith.addf %246, %253 : vector<8x4xf32>
    %cst_77 = arith.constant 0.000000e+00 : f32
    %255 = vector.broadcast %cst_77 : f32 to vector<8x4xf32>
    %256 = arith.subf %255, %251 : vector<8x4xf32>
    %cst_78 = arith.constant 0.918938517 : f32
    %257 = vector.broadcast %cst_78 : f32 to vector<8x4xf32>
    %258 = arith.subf %256, %257 : vector<8x4xf32>
    %cst_79 = arith.constant 5.000000e-01 : f32
    %259 = vector.broadcast %cst_79 : f32 to vector<8x4xf32>
    %260 = arith.mulf %259, %213 : vector<8x4xf32>
    %261 = arith.mulf %260, %213 : vector<8x4xf32>
    %262 = arith.subf %258, %261 : vector<8x4xf32>
    %cst_80 = arith.constant dense<0.000000e+00> : vector<8xf32>
    %263 = vector.multi_reduction <add>, %262, %cst_80 [1] : vector<8x4xf32> to vector<8xf32>
    %264 = vector.shape_cast %263 : vector<8xf32> to vector<8x1xf32>
    %265 = arith.addf %207, %264 : vector<8x1xf32>
    %266 = vector.extract_strided_slice %29 {offsets = [0, 4, 0], sizes = [8, 1, 4], strides = [1, 1, 1]} : vector<8x8x4xf32> to vector<8x1x4xf32>
    %267 = vector.shape_cast %266 : vector<8x1x4xf32> to vector<8x4xf32>
    %268 = vector.extract_strided_slice %30 {offsets = [0, 4, 0], sizes = [8, 1, 1], strides = [1, 1, 1]} : vector<8x8x1xf32> to vector<8x1x1xf32>
    %269 = vector.shape_cast %268 : vector<8x1x1xf32> to vector<8x1xf32>
    %270 = vector.extract_strided_slice %31 {offsets = [0, 4, 0], sizes = [8, 1, 4], strides = [1, 1, 1]} : vector<8x8x4xf32> to vector<8x1x4xf32>
    %271 = vector.shape_cast %270 : vector<8x1x4xf32> to vector<8x4xf32>
    %272 = tpu.concatenate %267, %254, %242 in 1 : vector<8x4xf32>, vector<8x4xf32>, vector<8x32xf32> -> vector<8x40xf32>
    %cst_81 = arith.constant dense<0.000000e+00> : vector<8x128xf32>
    %273 = tpu.matmul %272, %23, %cst_81 {dimension_numbers = #tpu.dot_dimension_numbers<[1], [0], [0], [1], [0, 0, 1, 1], [], []>} : vector<8x40xf32>, vector<40x128xf32>, vector<8x128xf32> -> vector<8x128xf32>
    %274 = vector.broadcast %24 : vector<1x128xf32> to vector<8x128xf32>
    %275 = arith.addf %273, %274 : vector<8x128xf32>
    %276 = arith.negf %275 : vector<8x128xf32>
    %277 = math.exp %276 : vector<8x128xf32>
    %cst_82 = arith.constant 1.000000e+00 : f32
    %278 = vector.broadcast %cst_82 : f32 to vector<8x128xf32>
    %279 = arith.addf %278, %277 : vector<8x128xf32>
    %280 = arith.divf %278, %279 : vector<8x128xf32>
    %281 = vector.extract_strided_slice %280 {offsets = [0, 0], sizes = [8, 32], strides = [1, 1]} : vector<8x128xf32> to vector<8x32xf32>
    %282 = vector.extract_strided_slice %280 {offsets = [0, 32], sizes = [8, 32], strides = [1, 1]} : vector<8x128xf32> to vector<8x32xf32>
    %283 = vector.extract_strided_slice %280 {offsets = [0, 64], sizes = [8, 32], strides = [1, 1]} : vector<8x128xf32> to vector<8x32xf32>
    %cst_83 = arith.constant 2.000000e+00 : f32
    %284 = vector.broadcast %cst_83 : f32 to vector<8x32xf32>
    %285 = arith.mulf %284, %283 : vector<8x32xf32>
    %cst_84 = arith.constant 1.000000e+00 : f32
    %286 = vector.broadcast %cst_84 : f32 to vector<8x32xf32>
    %287 = arith.subf %285, %286 : vector<8x32xf32>
    %288 = vector.extract_strided_slice %280 {offsets = [0, 96], sizes = [8, 32], strides = [1, 1]} : vector<8x128xf32> to vector<8x32xf32>
    %289 = arith.mulf %282, %233 : vector<8x32xf32>
    %290 = arith.mulf %281, %287 : vector<8x32xf32>
    %291 = arith.addf %289, %290 : vector<8x32xf32>
    %292 = math.tanh %291 : vector<8x32xf32>
    %293 = arith.mulf %288, %292 : vector<8x32xf32>
    %cst_85 = arith.constant dense<0.000000e+00> : vector<8x32xf32>
    %294 = tpu.matmul %293, %25, %cst_85 {dimension_numbers = #tpu.dot_dimension_numbers<[1], [0], [0], [1], [0, 0, 1, 1], [], []>} : vector<8x32xf32>, vector<32x32xf32>, vector<8x32xf32> -> vector<8x32xf32>
    %295 = vector.broadcast %26 : vector<1x32xf32> to vector<8x32xf32>
    %296 = arith.addf %294, %295 : vector<8x32xf32>
    %297 = math.tanh %296 : vector<8x32xf32>
    %298 = vector.broadcast %269 : vector<8x1xf32> to vector<8x32xf32>
    %299 = arith.mulf %298, %297 : vector<8x32xf32>
    %300 = arith.addf %293, %299 : vector<8x32xf32>
    %cst_86 = arith.constant dense<0.000000e+00> : vector<8x8xf32>
    %301 = tpu.matmul %300, %27, %cst_86 {dimension_numbers = #tpu.dot_dimension_numbers<[1], [0], [0], [1], [0, 0, 1, 1], [], []>} : vector<8x32xf32>, vector<32x8xf32>, vector<8x8xf32> -> vector<8x8xf32>
    %302 = vector.broadcast %28 : vector<1x8xf32> to vector<8x8xf32>
    %303 = arith.addf %301, %302 : vector<8x8xf32>
    %304 = vector.extract_strided_slice %303 {offsets = [0, 0], sizes = [8, 4], strides = [1, 1]} : vector<8x8xf32> to vector<8x4xf32>
    %305 = vector.extract_strided_slice %303 {offsets = [0, 4], sizes = [8, 4], strides = [1, 1]} : vector<8x8xf32> to vector<8x4xf32>
    %cst_87 = arith.constant -2.000000e+01 : f32
    %cst_88 = arith.constant 2.000000e+00 : f32
    %306 = vector.broadcast %cst_87 : f32 to vector<8x4xf32>
    %307 = arith.maximumf %306, %305 : vector<8x4xf32>
    %308 = vector.broadcast %cst_88 : f32 to vector<8x4xf32>
    %309 = arith.minimumf %308, %307 : vector<8x4xf32>
    %310 = math.exp %309 : vector<8x4xf32>
    %311 = arith.mulf %310, %271 : vector<8x4xf32>
    %312 = arith.addf %304, %311 : vector<8x4xf32>
    %cst_89 = arith.constant 0.000000e+00 : f32
    %313 = vector.broadcast %cst_89 : f32 to vector<8x4xf32>
    %314 = arith.subf %313, %309 : vector<8x4xf32>
    %cst_90 = arith.constant 0.918938517 : f32
    %315 = vector.broadcast %cst_90 : f32 to vector<8x4xf32>
    %316 = arith.subf %314, %315 : vector<8x4xf32>
    %cst_91 = arith.constant 5.000000e-01 : f32
    %317 = vector.broadcast %cst_91 : f32 to vector<8x4xf32>
    %318 = arith.mulf %317, %271 : vector<8x4xf32>
    %319 = arith.mulf %318, %271 : vector<8x4xf32>
    %320 = arith.subf %316, %319 : vector<8x4xf32>
    %cst_92 = arith.constant dense<0.000000e+00> : vector<8xf32>
    %321 = vector.multi_reduction <add>, %320, %cst_92 [1] : vector<8x4xf32> to vector<8xf32>
    %322 = vector.shape_cast %321 : vector<8xf32> to vector<8x1xf32>
    %323 = arith.addf %265, %322 : vector<8x1xf32>
    %324 = vector.extract_strided_slice %29 {offsets = [0, 5, 0], sizes = [8, 1, 4], strides = [1, 1, 1]} : vector<8x8x4xf32> to vector<8x1x4xf32>
    %325 = vector.shape_cast %324 : vector<8x1x4xf32> to vector<8x4xf32>
    %326 = vector.extract_strided_slice %30 {offsets = [0, 5, 0], sizes = [8, 1, 1], strides = [1, 1, 1]} : vector<8x8x1xf32> to vector<8x1x1xf32>
    %327 = vector.shape_cast %326 : vector<8x1x1xf32> to vector<8x1xf32>
    %328 = vector.extract_strided_slice %31 {offsets = [0, 5, 0], sizes = [8, 1, 4], strides = [1, 1, 1]} : vector<8x8x4xf32> to vector<8x1x4xf32>
    %329 = vector.shape_cast %328 : vector<8x1x4xf32> to vector<8x4xf32>
    %330 = tpu.concatenate %325, %312, %300 in 1 : vector<8x4xf32>, vector<8x4xf32>, vector<8x32xf32> -> vector<8x40xf32>
    %cst_93 = arith.constant dense<0.000000e+00> : vector<8x128xf32>
    %331 = tpu.matmul %330, %23, %cst_93 {dimension_numbers = #tpu.dot_dimension_numbers<[1], [0], [0], [1], [0, 0, 1, 1], [], []>} : vector<8x40xf32>, vector<40x128xf32>, vector<8x128xf32> -> vector<8x128xf32>
    %332 = vector.broadcast %24 : vector<1x128xf32> to vector<8x128xf32>
    %333 = arith.addf %331, %332 : vector<8x128xf32>
    %334 = arith.negf %333 : vector<8x128xf32>
    %335 = math.exp %334 : vector<8x128xf32>
    %cst_94 = arith.constant 1.000000e+00 : f32
    %336 = vector.broadcast %cst_94 : f32 to vector<8x128xf32>
    %337 = arith.addf %336, %335 : vector<8x128xf32>
    %338 = arith.divf %336, %337 : vector<8x128xf32>
    %339 = vector.extract_strided_slice %338 {offsets = [0, 0], sizes = [8, 32], strides = [1, 1]} : vector<8x128xf32> to vector<8x32xf32>
    %340 = vector.extract_strided_slice %338 {offsets = [0, 32], sizes = [8, 32], strides = [1, 1]} : vector<8x128xf32> to vector<8x32xf32>
    %341 = vector.extract_strided_slice %338 {offsets = [0, 64], sizes = [8, 32], strides = [1, 1]} : vector<8x128xf32> to vector<8x32xf32>
    %cst_95 = arith.constant 2.000000e+00 : f32
    %342 = vector.broadcast %cst_95 : f32 to vector<8x32xf32>
    %343 = arith.mulf %342, %341 : vector<8x32xf32>
    %cst_96 = arith.constant 1.000000e+00 : f32
    %344 = vector.broadcast %cst_96 : f32 to vector<8x32xf32>
    %345 = arith.subf %343, %344 : vector<8x32xf32>
    %346 = vector.extract_strided_slice %338 {offsets = [0, 96], sizes = [8, 32], strides = [1, 1]} : vector<8x128xf32> to vector<8x32xf32>
    %347 = arith.mulf %340, %291 : vector<8x32xf32>
    %348 = arith.mulf %339, %345 : vector<8x32xf32>
    %349 = arith.addf %347, %348 : vector<8x32xf32>
    %350 = math.tanh %349 : vector<8x32xf32>
    %351 = arith.mulf %346, %350 : vector<8x32xf32>
    %cst_97 = arith.constant dense<0.000000e+00> : vector<8x32xf32>
    %352 = tpu.matmul %351, %25, %cst_97 {dimension_numbers = #tpu.dot_dimension_numbers<[1], [0], [0], [1], [0, 0, 1, 1], [], []>} : vector<8x32xf32>, vector<32x32xf32>, vector<8x32xf32> -> vector<8x32xf32>
    %353 = vector.broadcast %26 : vector<1x32xf32> to vector<8x32xf32>
    %354 = arith.addf %352, %353 : vector<8x32xf32>
    %355 = math.tanh %354 : vector<8x32xf32>
    %356 = vector.broadcast %327 : vector<8x1xf32> to vector<8x32xf32>
    %357 = arith.mulf %356, %355 : vector<8x32xf32>
    %358 = arith.addf %351, %357 : vector<8x32xf32>
    %cst_98 = arith.constant dense<0.000000e+00> : vector<8x8xf32>
    %359 = tpu.matmul %358, %27, %cst_98 {dimension_numbers = #tpu.dot_dimension_numbers<[1], [0], [0], [1], [0, 0, 1, 1], [], []>} : vector<8x32xf32>, vector<32x8xf32>, vector<8x8xf32> -> vector<8x8xf32>
    %360 = vector.broadcast %28 : vector<1x8xf32> to vector<8x8xf32>
    %361 = arith.addf %359, %360 : vector<8x8xf32>
    %362 = vector.extract_strided_slice %361 {offsets = [0, 0], sizes = [8, 4], strides = [1, 1]} : vector<8x8xf32> to vector<8x4xf32>
    %363 = vector.extract_strided_slice %361 {offsets = [0, 4], sizes = [8, 4], strides = [1, 1]} : vector<8x8xf32> to vector<8x4xf32>
    %cst_99 = arith.constant -2.000000e+01 : f32
    %cst_100 = arith.constant 2.000000e+00 : f32
    %364 = vector.broadcast %cst_99 : f32 to vector<8x4xf32>
    %365 = arith.maximumf %364, %363 : vector<8x4xf32>
    %366 = vector.broadcast %cst_100 : f32 to vector<8x4xf32>
    %367 = arith.minimumf %366, %365 : vector<8x4xf32>
    %368 = math.exp %367 : vector<8x4xf32>
    %369 = arith.mulf %368, %329 : vector<8x4xf32>
    %370 = arith.addf %362, %369 : vector<8x4xf32>
    %cst_101 = arith.constant 0.000000e+00 : f32
    %371 = vector.broadcast %cst_101 : f32 to vector<8x4xf32>
    %372 = arith.subf %371, %367 : vector<8x4xf32>
    %cst_102 = arith.constant 0.918938517 : f32
    %373 = vector.broadcast %cst_102 : f32 to vector<8x4xf32>
    %374 = arith.subf %372, %373 : vector<8x4xf32>
    %cst_103 = arith.constant 5.000000e-01 : f32
    %375 = vector.broadcast %cst_103 : f32 to vector<8x4xf32>
    %376 = arith.mulf %375, %329 : vector<8x4xf32>
    %377 = arith.mulf %376, %329 : vector<8x4xf32>
    %378 = arith.subf %374, %377 : vector<8x4xf32>
    %cst_104 = arith.constant dense<0.000000e+00> : vector<8xf32>
    %379 = vector.multi_reduction <add>, %378, %cst_104 [1] : vector<8x4xf32> to vector<8xf32>
    %380 = vector.shape_cast %379 : vector<8xf32> to vector<8x1xf32>
    %381 = arith.addf %323, %380 : vector<8x1xf32>
    %382 = vector.extract_strided_slice %29 {offsets = [0, 6, 0], sizes = [8, 1, 4], strides = [1, 1, 1]} : vector<8x8x4xf32> to vector<8x1x4xf32>
    %383 = vector.shape_cast %382 : vector<8x1x4xf32> to vector<8x4xf32>
    %384 = vector.extract_strided_slice %30 {offsets = [0, 6, 0], sizes = [8, 1, 1], strides = [1, 1, 1]} : vector<8x8x1xf32> to vector<8x1x1xf32>
    %385 = vector.shape_cast %384 : vector<8x1x1xf32> to vector<8x1xf32>
    %386 = vector.extract_strided_slice %31 {offsets = [0, 6, 0], sizes = [8, 1, 4], strides = [1, 1, 1]} : vector<8x8x4xf32> to vector<8x1x4xf32>
    %387 = vector.shape_cast %386 : vector<8x1x4xf32> to vector<8x4xf32>
    %388 = tpu.concatenate %383, %370, %358 in 1 : vector<8x4xf32>, vector<8x4xf32>, vector<8x32xf32> -> vector<8x40xf32>
    %cst_105 = arith.constant dense<0.000000e+00> : vector<8x128xf32>
    %389 = tpu.matmul %388, %23, %cst_105 {dimension_numbers = #tpu.dot_dimension_numbers<[1], [0], [0], [1], [0, 0, 1, 1], [], []>} : vector<8x40xf32>, vector<40x128xf32>, vector<8x128xf32> -> vector<8x128xf32>
    %390 = vector.broadcast %24 : vector<1x128xf32> to vector<8x128xf32>
    %391 = arith.addf %389, %390 : vector<8x128xf32>
    %392 = arith.negf %391 : vector<8x128xf32>
    %393 = math.exp %392 : vector<8x128xf32>
    %cst_106 = arith.constant 1.000000e+00 : f32
    %394 = vector.broadcast %cst_106 : f32 to vector<8x128xf32>
    %395 = arith.addf %394, %393 : vector<8x128xf32>
    %396 = arith.divf %394, %395 : vector<8x128xf32>
    %397 = vector.extract_strided_slice %396 {offsets = [0, 0], sizes = [8, 32], strides = [1, 1]} : vector<8x128xf32> to vector<8x32xf32>
    %398 = vector.extract_strided_slice %396 {offsets = [0, 32], sizes = [8, 32], strides = [1, 1]} : vector<8x128xf32> to vector<8x32xf32>
    %399 = vector.extract_strided_slice %396 {offsets = [0, 64], sizes = [8, 32], strides = [1, 1]} : vector<8x128xf32> to vector<8x32xf32>
    %cst_107 = arith.constant 2.000000e+00 : f32
    %400 = vector.broadcast %cst_107 : f32 to vector<8x32xf32>
    %401 = arith.mulf %400, %399 : vector<8x32xf32>
    %cst_108 = arith.constant 1.000000e+00 : f32
    %402 = vector.broadcast %cst_108 : f32 to vector<8x32xf32>
    %403 = arith.subf %401, %402 : vector<8x32xf32>
    %404 = vector.extract_strided_slice %396 {offsets = [0, 96], sizes = [8, 32], strides = [1, 1]} : vector<8x128xf32> to vector<8x32xf32>
    %405 = arith.mulf %398, %349 : vector<8x32xf32>
    %406 = arith.mulf %397, %403 : vector<8x32xf32>
    %407 = arith.addf %405, %406 : vector<8x32xf32>
    %408 = math.tanh %407 : vector<8x32xf32>
    %409 = arith.mulf %404, %408 : vector<8x32xf32>
    %cst_109 = arith.constant dense<0.000000e+00> : vector<8x32xf32>
    %410 = tpu.matmul %409, %25, %cst_109 {dimension_numbers = #tpu.dot_dimension_numbers<[1], [0], [0], [1], [0, 0, 1, 1], [], []>} : vector<8x32xf32>, vector<32x32xf32>, vector<8x32xf32> -> vector<8x32xf32>
    %411 = vector.broadcast %26 : vector<1x32xf32> to vector<8x32xf32>
    %412 = arith.addf %410, %411 : vector<8x32xf32>
    %413 = math.tanh %412 : vector<8x32xf32>
    %414 = vector.broadcast %385 : vector<8x1xf32> to vector<8x32xf32>
    %415 = arith.mulf %414, %413 : vector<8x32xf32>
    %416 = arith.addf %409, %415 : vector<8x32xf32>
    %cst_110 = arith.constant dense<0.000000e+00> : vector<8x8xf32>
    %417 = tpu.matmul %416, %27, %cst_110 {dimension_numbers = #tpu.dot_dimension_numbers<[1], [0], [0], [1], [0, 0, 1, 1], [], []>} : vector<8x32xf32>, vector<32x8xf32>, vector<8x8xf32> -> vector<8x8xf32>
    %418 = vector.broadcast %28 : vector<1x8xf32> to vector<8x8xf32>
    %419 = arith.addf %417, %418 : vector<8x8xf32>
    %420 = vector.extract_strided_slice %419 {offsets = [0, 0], sizes = [8, 4], strides = [1, 1]} : vector<8x8xf32> to vector<8x4xf32>
    %421 = vector.extract_strided_slice %419 {offsets = [0, 4], sizes = [8, 4], strides = [1, 1]} : vector<8x8xf32> to vector<8x4xf32>
    %cst_111 = arith.constant -2.000000e+01 : f32
    %cst_112 = arith.constant 2.000000e+00 : f32
    %422 = vector.broadcast %cst_111 : f32 to vector<8x4xf32>
    %423 = arith.maximumf %422, %421 : vector<8x4xf32>
    %424 = vector.broadcast %cst_112 : f32 to vector<8x4xf32>
    %425 = arith.minimumf %424, %423 : vector<8x4xf32>
    %426 = math.exp %425 : vector<8x4xf32>
    %427 = arith.mulf %426, %387 : vector<8x4xf32>
    %428 = arith.addf %420, %427 : vector<8x4xf32>
    %cst_113 = arith.constant 0.000000e+00 : f32
    %429 = vector.broadcast %cst_113 : f32 to vector<8x4xf32>
    %430 = arith.subf %429, %425 : vector<8x4xf32>
    %cst_114 = arith.constant 0.918938517 : f32
    %431 = vector.broadcast %cst_114 : f32 to vector<8x4xf32>
    %432 = arith.subf %430, %431 : vector<8x4xf32>
    %cst_115 = arith.constant 5.000000e-01 : f32
    %433 = vector.broadcast %cst_115 : f32 to vector<8x4xf32>
    %434 = arith.mulf %433, %387 : vector<8x4xf32>
    %435 = arith.mulf %434, %387 : vector<8x4xf32>
    %436 = arith.subf %432, %435 : vector<8x4xf32>
    %cst_116 = arith.constant dense<0.000000e+00> : vector<8xf32>
    %437 = vector.multi_reduction <add>, %436, %cst_116 [1] : vector<8x4xf32> to vector<8xf32>
    %438 = vector.shape_cast %437 : vector<8xf32> to vector<8x1xf32>
    %439 = arith.addf %381, %438 : vector<8x1xf32>
    %440 = vector.extract_strided_slice %29 {offsets = [0, 7, 0], sizes = [8, 1, 4], strides = [1, 1, 1]} : vector<8x8x4xf32> to vector<8x1x4xf32>
    %441 = vector.shape_cast %440 : vector<8x1x4xf32> to vector<8x4xf32>
    %442 = vector.extract_strided_slice %30 {offsets = [0, 7, 0], sizes = [8, 1, 1], strides = [1, 1, 1]} : vector<8x8x1xf32> to vector<8x1x1xf32>
    %443 = vector.shape_cast %442 : vector<8x1x1xf32> to vector<8x1xf32>
    %444 = vector.extract_strided_slice %31 {offsets = [0, 7, 0], sizes = [8, 1, 4], strides = [1, 1, 1]} : vector<8x8x4xf32> to vector<8x1x4xf32>
    %445 = vector.shape_cast %444 : vector<8x1x4xf32> to vector<8x4xf32>
    %446 = tpu.concatenate %441, %428, %416 in 1 : vector<8x4xf32>, vector<8x4xf32>, vector<8x32xf32> -> vector<8x40xf32>
    %cst_117 = arith.constant dense<0.000000e+00> : vector<8x128xf32>
    %447 = tpu.matmul %446, %23, %cst_117 {dimension_numbers = #tpu.dot_dimension_numbers<[1], [0], [0], [1], [0, 0, 1, 1], [], []>} : vector<8x40xf32>, vector<40x128xf32>, vector<8x128xf32> -> vector<8x128xf32>
    %448 = vector.broadcast %24 : vector<1x128xf32> to vector<8x128xf32>
    %449 = arith.addf %447, %448 : vector<8x128xf32>
    %450 = arith.negf %449 : vector<8x128xf32>
    %451 = math.exp %450 : vector<8x128xf32>
    %cst_118 = arith.constant 1.000000e+00 : f32
    %452 = vector.broadcast %cst_118 : f32 to vector<8x128xf32>
    %453 = arith.addf %452, %451 : vector<8x128xf32>
    %454 = arith.divf %452, %453 : vector<8x128xf32>
    %455 = vector.extract_strided_slice %454 {offsets = [0, 0], sizes = [8, 32], strides = [1, 1]} : vector<8x128xf32> to vector<8x32xf32>
    %456 = vector.extract_strided_slice %454 {offsets = [0, 32], sizes = [8, 32], strides = [1, 1]} : vector<8x128xf32> to vector<8x32xf32>
    %457 = vector.extract_strided_slice %454 {offsets = [0, 64], sizes = [8, 32], strides = [1, 1]} : vector<8x128xf32> to vector<8x32xf32>
    %cst_119 = arith.constant 2.000000e+00 : f32
    %458 = vector.broadcast %cst_119 : f32 to vector<8x32xf32>
    %459 = arith.mulf %458, %457 : vector<8x32xf32>
    %cst_120 = arith.constant 1.000000e+00 : f32
    %460 = vector.broadcast %cst_120 : f32 to vector<8x32xf32>
    %461 = arith.subf %459, %460 : vector<8x32xf32>
    %462 = vector.extract_strided_slice %454 {offsets = [0, 96], sizes = [8, 32], strides = [1, 1]} : vector<8x128xf32> to vector<8x32xf32>
    %463 = arith.mulf %456, %407 : vector<8x32xf32>
    %464 = arith.mulf %455, %461 : vector<8x32xf32>
    %465 = arith.addf %463, %464 : vector<8x32xf32>
    %466 = math.tanh %465 : vector<8x32xf32>
    %467 = arith.mulf %462, %466 : vector<8x32xf32>
    %cst_121 = arith.constant dense<0.000000e+00> : vector<8x32xf32>
    %468 = tpu.matmul %467, %25, %cst_121 {dimension_numbers = #tpu.dot_dimension_numbers<[1], [0], [0], [1], [0, 0, 1, 1], [], []>} : vector<8x32xf32>, vector<32x32xf32>, vector<8x32xf32> -> vector<8x32xf32>
    %469 = vector.broadcast %26 : vector<1x32xf32> to vector<8x32xf32>
    %470 = arith.addf %468, %469 : vector<8x32xf32>
    %471 = math.tanh %470 : vector<8x32xf32>
    %472 = vector.broadcast %443 : vector<8x1xf32> to vector<8x32xf32>
    %473 = arith.mulf %472, %471 : vector<8x32xf32>
    %474 = arith.addf %467, %473 : vector<8x32xf32>
    %cst_122 = arith.constant dense<0.000000e+00> : vector<8x8xf32>
    %475 = tpu.matmul %474, %27, %cst_122 {dimension_numbers = #tpu.dot_dimension_numbers<[1], [0], [0], [1], [0, 0, 1, 1], [], []>} : vector<8x32xf32>, vector<32x8xf32>, vector<8x8xf32> -> vector<8x8xf32>
    %476 = vector.broadcast %28 : vector<1x8xf32> to vector<8x8xf32>
    %477 = arith.addf %475, %476 : vector<8x8xf32>
    %478 = vector.extract_strided_slice %477 {offsets = [0, 0], sizes = [8, 4], strides = [1, 1]} : vector<8x8xf32> to vector<8x4xf32>
    %479 = vector.extract_strided_slice %477 {offsets = [0, 4], sizes = [8, 4], strides = [1, 1]} : vector<8x8xf32> to vector<8x4xf32>
    %cst_123 = arith.constant -2.000000e+01 : f32
    %cst_124 = arith.constant 2.000000e+00 : f32
    %480 = vector.broadcast %cst_123 : f32 to vector<8x4xf32>
    %481 = arith.maximumf %480, %479 : vector<8x4xf32>
    %482 = vector.broadcast %cst_124 : f32 to vector<8x4xf32>
    %483 = arith.minimumf %482, %481 : vector<8x4xf32>
    %484 = math.exp %483 : vector<8x4xf32>
    %485 = arith.mulf %484, %445 : vector<8x4xf32>
    %486 = arith.addf %478, %485 : vector<8x4xf32>
    %cst_125 = arith.constant 0.000000e+00 : f32
    %487 = vector.broadcast %cst_125 : f32 to vector<8x4xf32>
    %488 = arith.subf %487, %483 : vector<8x4xf32>
    %cst_126 = arith.constant 0.918938517 : f32
    %489 = vector.broadcast %cst_126 : f32 to vector<8x4xf32>
    %490 = arith.subf %488, %489 : vector<8x4xf32>
    %cst_127 = arith.constant 5.000000e-01 : f32
    %491 = vector.broadcast %cst_127 : f32 to vector<8x4xf32>
    %492 = arith.mulf %491, %445 : vector<8x4xf32>
    %493 = arith.mulf %492, %445 : vector<8x4xf32>
    %494 = arith.subf %490, %493 : vector<8x4xf32>
    %cst_128 = arith.constant dense<0.000000e+00> : vector<8xf32>
    %495 = vector.multi_reduction <add>, %494, %cst_128 [1] : vector<8x4xf32> to vector<8xf32>
    %496 = vector.shape_cast %495 : vector<8xf32> to vector<8x1xf32>
    %497 = arith.addf %439, %496 : vector<8x1xf32>
    %498 = tpu.concatenate %80, %138, %196, %254, %312, %370, %428, %486 in 1 : vector<8x4xf32>, vector<8x4xf32>, vector<8x4xf32>, vector<8x4xf32>, vector<8x4xf32>, vector<8x4xf32>, vector<8x4xf32>, vector<8x4xf32> -> vector<8x32xf32>
    %c0_129 = arith.constant 0 : index
    %c0_130 = arith.constant 0 : index
    %499 = vector.load %arg14[%c0_129, %c0_130] : memref<8x32xf32, #tpu.memory_space<vmem>>, vector<8x32xf32>
    tpu.vector_store %arg14[%c0_129, %c0_130], %498 {strides = array<i32>} : memref<8x32xf32, #tpu.memory_space<vmem>>, vector<8x32xf32>,
    %c0_131 = arith.constant 0 : index
    %c0_132 = arith.constant 0 : index
    %500 = vector.load %arg15[%c0_131, %c0_132] : memref<8x1xf32, #tpu.memory_space<vmem>>, vector<8x1xf32>
    tpu.vector_store %arg15[%c0_131, %c0_132], %497 {strides = array<i32>} : memref<8x1xf32, #tpu.memory_space<vmem>>, vector<8x1xf32>,
    return
  }
  func.func @transform_0(%arg0: i32) -> (i32, i32, i32) {
    %c0_i32 = arith.constant 0 : i32
    %c0_i32_0 = arith.constant 0 : i32
    %c0_i32_1 = arith.constant 0 : i32
    %c0_i32_2 = arith.constant 0 : i32
    return %c0_i32, %c0_i32_0, %c0_i32_1 : i32, i32, i32
  }
  func.func @transform_1(%arg0: i32) -> (i32, i32, i32) {
    %c0_i32 = arith.constant 0 : i32
    %c0_i32_0 = arith.constant 0 : i32
    %c0_i32_1 = arith.constant 0 : i32
    %c0_i32_2 = arith.constant 0 : i32
    return %c0_i32, %c0_i32_0, %c0_i32_1 : i32, i32, i32
  }
  func.func @transform_2(%arg0: i32) -> (i32, i32, i32) {
    %c0_i32 = arith.constant 0 : i32
    %c0_i32_0 = arith.constant 0 : i32
    %c0_i32_1 = arith.constant 0 : i32
    %c0_i32_2 = arith.constant 0 : i32
    return %c0_i32, %c0_i32_0, %c0_i32_1 : i32, i32, i32
  }
  func.func @transform_3(%arg0: i32) -> (i32, i32, i32) {
    %c0_i32 = arith.constant 0 : i32
    %c0_i32_0 = arith.constant 0 : i32
    %c0_i32_1 = arith.constant 0 : i32
    %c0_i32_2 = arith.constant 0 : i32
    return %c0_i32, %c0_i32_0, %c0_i32_1 : i32, i32, i32
  }
  func.func @transform_4(%arg0: i32) -> (i32, i32) {
    %c0_i32 = arith.constant 0 : i32
    %c0_i32_0 = arith.constant 0 : i32
    %c0_i32_1 = arith.constant 0 : i32
    return %c0_i32, %c0_i32_0 : i32, i32
  }
  func.func @transform_5(%arg0: i32) -> (i32, i32) {
    %c0_i32 = arith.constant 0 : i32
    %c0_i32_0 = arith.constant 0 : i32
    %c0_i32_1 = arith.constant 0 : i32
    return %c0_i32, %c0_i32_0 : i32, i32
  }
  func.func @transform_6(%arg0: i32) -> (i32, i32) {
    %c0_i32 = arith.constant 0 : i32
    %c0_i32_0 = arith.constant 0 : i32
    %c0_i32_1 = arith.constant 0 : i32
    return %c0_i32, %c0_i32_0 : i32, i32
  }
  func.func @transform_7(%arg0: i32) -> (i32, i32) {
    %c0_i32 = arith.constant 0 : i32
    %c0_i32_0 = arith.constant 0 : i32
    %c0_i32_1 = arith.constant 0 : i32
    return %c0_i32, %c0_i32_0 : i32, i32
  }
  func.func @transform_8(%arg0: i32) -> (i32, i32) {
    %c0_i32 = arith.constant 0 : i32
    %c0_i32_0 = arith.constant 0 : i32
    %c0_i32_1 = arith.constant 0 : i32
    return %c0_i32, %c0_i32_0 : i32, i32
  }
  func.func @transform_9(%arg0: i32) -> (i32, i32) {
    %c0_i32 = arith.constant 0 : i32
    %c0_i32_0 = arith.constant 0 : i32
    %c0_i32_1 = arith.constant 0 : i32
    return %c0_i32, %c0_i32_0 : i32, i32
  }
  func.func @transform_10(%arg0: i32) -> (i32, i32) {
    %c0_i32 = arith.constant 0 : i32
    %c0_i32_0 = arith.constant 0 : i32
    %c0_i32_1 = arith.constant 0 : i32
    return %c0_i32, %c0_i32_0 : i32, i32
  }
  func.func @transform_11(%arg0: i32) -> (i32, i32) {
    %c0_i32 = arith.constant 0 : i32
    %c0_i32_0 = arith.constant 0 : i32
    %c0_i32_1 = arith.constant 0 : i32
    return %c0_i32, %c0_i32_0 : i32, i32
  }
  func.func @transform_12(%arg0: i32) -> (i32, i32) {
    %c0_i32 = arith.constant 0 : i32
    %c0_i32_0 = arith.constant 0 : i32
    %c0_i32_1 = arith.constant 0 : i32
    return %c0_i32, %c0_i32_0 : i32, i32
  }
  func.func @transform_13(%arg0: i32) -> (i32, i32) {
    %c0_i32 = arith.constant 0 : i32
    %c0_i32_0 = arith.constant 0 : i32
    %c0_i32_1 = arith.constant 0 : i32
    return %c0_i32, %c0_i32_0 : i32, i32
  }
  func.func @transform_14(%arg0: i32) -> (i32, i32) {
    %c0_i32 = arith.constant 0 : i32
    %c0_i32_0 = arith.constant 0 : i32
    %c0_i32_1 = arith.constant 0 : i32
    return %c0_i32, %c0_i32_0 : i32, i32
  }
}

</mosaic_0001>

<bundles_post_ra>
// kernel: posterior_lstm_forward.1
= control target key start
LH: loop header
LB: loop body
LE: loop exit
PB: predicated region body
PF: predicated region fallthrough
CT: control target
= control target key end

     0   :  { %vm122_vm0 = vcmask 1043456   ;;  %v5543_v0 = vmov 0.0   ;;  %vm4172_vm1 = vmmov 0   ;;  %v4173_v4 = vmov 1966171168   ;;  %s4176_s23 = smov 32   ;;  %s5526_s4 = inlined_call_operand.vmem [shape: f32[4,64], index: 4, kind: input, shape index: {}]   ;;  %s5527_s2 = inlined_call_operand.vmem [shape: f32[8,1,4], index: 2, kind: input, shape index: {}]   ;;  %s5528_s6 = inlined_call_operand.vmem [shape: f32[8,128], index: 6, kind: input, shape index: {}]   ;;  %s5529_s7 = inlined_call_operand.vmem [shape: f32[32,128], index: 7, kind: input, shape index: {}]   ;;  %s5530_s5 = inlined_call_operand.vmem [shape: f32[1,64], index: 5, kind: input, shape index: {}]   ;;  %s5531_s0 = inlined_call_operand.vmem [shape: f32[8,8,4], index: 0, kind: input, shape index: {}]   ;;  %s5532_s8 = inlined_call_operand.vmem [shape: f32[1,128], index: 8, kind: input, shape index: {}]   ;;  %s5533_s9 = inlined_call_operand.vmem [shape: f32[32,32], index: 9, kind: input, shape index: {}]   ;;  %s5534_s1 = inlined_call_operand.vmem [shape: f32[8,8,1], index: 1, kind: input, shape index: {}]   ;;  %s5535_s10 = inlined_call_operand.vmem [shape: f32[1,32], index: 10, kind: input, shape index: {}]   ;;  %s5536_s11 = inlined_call_operand.vmem [shape: f32[32,8], index: 11, kind: input, shape index: {}]   ;;  %s5537_s3 = inlined_call_operand.vmem [shape: f32[8,8,4], index: 3, kind: input, shape index: {}]   ;;  %s5538_s12 = inlined_call_operand.vmem [shape: f32[1,8], index: 12, kind: input, shape index: {}]   ;;  %s5539_s14 = inlined_call_operand.vmem [shape: f32[8,1], index: 14, kind: output, shape index: {1}]   ;;  %s5540_s13 = inlined_call_operand.vmem [shape: f32[8,32], index: 13, kind: output, shape index: {0}]  }
   0x1   :  { %3621 = vmatprep.subr.mxu0 %v5543_v0  ;;  %v54_v1 = vld [vmem:[%s5526_s4] sm:$0xf]  ;;  %3623 = vmatprep.mubr.msk.f32.mxu0 %vm4172_vm1, %v5543_v0  ;;  %v75_v5 = vunpack.c.l.s4 %v4173_v4  ;;  %v77_v6 = vlaneseq  ;;  %v50_v9 = vld [vmem:[%s5527_s2 + $0x4] sm:$0x1]  ;;  %v51_v10 = vld [vmem:[%s5527_s2 + $0x5] sm:$0x1] }
   0x2   :  { %v46_v2 = vld [vmem:[%s5527_s2] sm:$0x1]  ;;  %v47_v3 = vld [vmem:[%s5527_s2 + $0x1] sm:$0x1]  ;;  %3622 = vmatpush3.msk.msra.mxu0 %vm122_vm0, %v54_v1  ;;  %v48_v7 = vld [vmem:[%s5527_s2 + $0x2] sm:$0x1]  ;;  %3636 = vmatprep.mubr.msk.f32.mxu1 %vm4172_vm1, %v5543_v0  ;;  %v72_v16 = vcombine.low %v50_v9, %v51_v10 }
   0x3   :  { %v49_v8 = vld [vmem:[%s5527_s2 + $0x3] sm:$0x1]  ;;  %v52_v11 = vld [vmem:[%s5527_s2 + $0x6] sm:$0x1]  ;;  %v53_v12 = vld [vmem:[%s5527_s2 + $0x7] sm:$0x1]  ;;  %v70_v13 = vcombine.low %v46_v2, %v47_v3  ;;  %v76_v14 = vunpack.c.0.s8 %v75_v5 }
   0x4   :  { %v71_v15 = vcombine.low %v48_v7, %v49_v8  ;;  %v73_v17 = vcombine.low %v52_v11, %v53_v12  ;;  %v4298_v18 = vshrl.u32 %v77_v6, 7  ;;  %vm119_vm2 = vcmask 31744   ;;  %v196_v33 = vld [vmem:[%s5528_s6] sm:$0xff]  ;;  %v198_v35 = vld [vmem:[%s5529_s7 + $0x8] sm:$0xff]  ;;  %v199_v38 = vld [vmem:[%s5529_s7 + $0x10] sm:$0xff]  ;;  %s4177_s24 = smov 104  }
   0x5   :  { %v203_v29 = vand.u32 127, %v77_v6  ;;  %v4174_v30 = vmov 1.0   ;;  %v5541_v32 = vmov 0.0|0.0   ;;  %v197_v34 = vld [vmem:[%s5529_s7] sm:$0xff]  ;;  %v200_v43 = vld [vmem:[%s5529_s7 + $0x18] sm:$0xff]  ;;  %v225_v49 = vld [vmem:[%s5531_s0 + $0x8] sm:$0xff] }
   0x6   :  { %v79_v19 = vsub.s32 %v76_v14, %v4298_v18  ;;  %3906 = vmatprep.subr.bf16.mxu1 %v5541_v32  ;;  %3912 = vmatprep.subr.bf16.mxu0 %v5541_v32  ;;  %v3438_v45 = vld [vmem:[%s5530_s5] ss:$0 sm:$0xff]  ;;  %v226_v50 = vld [vmem:[%s5531_s0 + $0x10] sm:$0xff]  ;;  %v4350_v51 = vrot.slane %v225_v49, 7  ;;  %vm257_vm6 = vcmask 1041409   ;;  %v227_v53 = vld [vmem:[%s5531_s0 + $0x18] sm:$0xff] }
   0x7   :  { %vm204_vm3 = vcmp.ge.s32.totalorder %v203_v29, 64  ;;  %vm205_vm4 = vcmp.lt.s32.totalorder %v203_v29, 96  ;;  %v4355_v52 = vld [vmem:[%s5531_s0] sm:$0xff]  ;;  %v4360_v54 = vrot.slane %v226_v50, 6  ;;  %vm260_vm7 = vcmask 1042434   ;;  %v229_v59 = vld [vmem:[%s5531_s0 + $0x28] sm:$0xff] }
   0x8   :  { %v80_v20 = vrot.slane %v70_v13, %v79_v19  ;;  %v87_v21 = vrot.slane %v71_v15, %v79_v19  ;;  %v94_v22 = vrot.slane %v72_v16, %v79_v19  ;;  %v101_v23 = vrot.slane %v73_v17, %v79_v19  ;;  %vm206_vm5 = vmand %vm204_vm3, %vm205_vm4  ;;  %v228_v56 = vld [vmem:[%s5531_s0 + $0x20] sm:$0xff]  ;;  %v230_v62 = vld [vmem:[%s5531_s0 + $0x30] sm:$0xff]  ;;  %s4178_s22 = smov 64   ;;  %s4181_s5 = smov 4  }
   0x9   :  { %v4304_v31 = vsel %vm206_vm5, 2.0, %v4174_v30  ;;  %v258_v55 = vsel %vm257_vm6, %v4350_v51, %v4355_v52  ;;  %v4368_v57 = vrot.slane %v227_v53, 5  ;;  %vm263_vm8 = vcmask 1043459   ;;  %v231_v2 = vld [vmem:[%s5531_s0 + $0x38] sm:$0xff]  ;;  %v201_v11 = vld [vmem:[%s5532_s8] sm:$0x1] }
   0xa   :  { %v102_v24 = vcombine.low %v80_v20, %v87_v21  ;;  %v103_v25 = vcombine.low %v94_v22, %v101_v23  ;;  %v208_v36 = vmul.f32 %v4304_v31, %v196_v33  ;;  %v209_v37 = vmul.f32 %v4304_v31, %v197_v34  ;;  %v214_v30 = vld [vmem:[%s5533_s9] sm:$0xff]  ;;  %v216_v33 = vld [vmem:[%s5533_s9 + $0x10] sm:$0xff]  ;;  %s4182_s2 = smov 124   ;;  %s4185_s7 = smov 12  }
   0xb   :  { %v210_v39 = vmul.f32 %v4304_v31, %v198_v35  ;;  %v211_v40 = vmul.f32 %v4304_v31, %v199_v38  ;;  %v4336_v44 = vmul.f32 %v4304_v31, %v200_v43  ;;  %v261_v58 = vsel %vm260_vm7, %v4360_v54, %v258_v55  ;;  %v217_v35 = vld [vmem:[%s5533_s9 + $0x18] sm:$0xff]  ;;  %v237_v43 = vld [vmem:[%s5534_s1 + $0x28] sm:$0xff]  ;;  %v232_v49 = vld [vmem:[%s5534_s1] sm:$0xff]  ;;  %s4186_s25 = smov 20   ;;  %s4187_s26 = smov 16  }
   0xc   :  { %v110_v26 = vrot.slane %v102_v24, %v79_v19  ;;  %v117_v27 = vrot.slane %v103_v25, %v79_v19  ;;  %v4324_v41 = vpack.c.bf16 %v209_v37, %v208_v36  ;;  %v4375_v60 = vrot.slane %v228_v56, 4  ;;  %v236_v50 = vld [vmem:[%s5534_s1 + $0x20] sm:$0xff]  ;;  %v238_v53 = vld [vmem:[%s5534_s1 + $0x30] sm:$0xff]  ;;  %s4189_s27 = smov 28  }
   0xd   :  { %v4327_v42 = vpack.c.bf16 %v211_v40, %v210_v39  ;;  %vm266_vm9 = vcmask 1044484   ;;  %v264_v61 = vsel %vm263_vm8, %v4368_v57, %v261_v58  ;;  %v4382_v63 = vrot.slane %v229_v59, 3  ;;  %v233_v39 = vld [vmem:[%s5534_s1 + $0x8] sm:$0xff]  ;;  %v235_v40 = vld [vmem:[%s5534_s1 + $0x18] sm:$0xff]  ;;  %v4478_v56 = vld [vmem:[%s5535_s10] ss:$0 sm:$0xff] }
   0xe   :  { %v118_v28 = vcombine.low %v110_v26, %v117_v27  ;;  %3908 = vmatpush3.bf16.msra.mxu1 %v4324_v41  ;;  %vm269_vm10 = vcmask 1045509   ;;  %v267_v1 = vsel %vm266_vm9, %v4375_v60, %v264_v61  ;;  %v4389_v3 = vrot.slane %v230_v62, 2 }
   0xf   :  { %3909 = vmatprep.subr.bf16.mxu1 %v5541_v32  ;;  %vm272_vm11 = vcmask 1046534   ;;  %v270_v4 = vsel %vm269_vm10, %v4382_v63, %v267_v1  ;;  %v4393_v5 = vrot.slane %v231_v2, 1  ;;  %vm275_vm12 = vcmask 1047559  }
  0x10   :  { %3624 = vmatmul.mubr.msk.f32.vlgmr.msra.gmra.mrb[0].mxu0 %vm119_vm2, %v118_v28  ;;  %v273_v6 = vsel %vm272_vm11, %v4389_v3, %v270_v4  ;;  %vm283_vm13 = vcmask 64512   ;;  %vm291_vm14 = vcmask 326656   ;;  %v288_v12 = vsub.s32 0, %v4298_v18 }
  0x11   :  { %3647 = vmatprep.mubr.msk.f32.mxu0 %vm4172_vm1, %v5543_v0  ;;  %v276_v7 = vsel %vm275_vm12, %v4393_v5, %v273_v6  ;;  %v213_v13 = vmul.f32 %v4304_v31, %v201_v11  ;;  %v215_v31 = vld [vmem:[%s5533_s9 + $0x8] sm:$0xff]  ;;  %v4438_v36 = vpack.c.bf16 %v217_v35, %v216_v33  ;;  %v4179_v38 = vmov 0   ;;  %s4183_s9 = smov 40  }
  0x12   :  { %3911 = vmatpush3.bf16.msra.mxu1 %v4327_v42  ;;  %v282_v8 = vsel %vm119_vm2, %v276_v7, 0.0  ;;  %v4432_v34 = vpack.c.bf16 %v215_v31, %v214_v30  ;;  %4070 = vset.pattern.permute.xlu1 %v4179_v38  ;;  %vm402_vm15 = vcmask 261120   ;;  %v222_v30 = vld [vmem:[%s5536_s11 + $0x18] sm:$0xff]  ;;  %vm757_vm3 = vcmask 1046528  }
  0x13   :  { %3634 = vmatprep.subr.mxu1 %v5543_v0  ;;  %v4415_v14 = vrot.slane %v213_v13, %v288_v12  ;;  %4069 = vset.pattern.permute.xlu0 %v4179_v38  ;;  %vm1137_vm4 = vcmask 1045504   ;;  %vm1517_vm5 = vcmask 1044480  }
  0x14   :  { %3914 = vmatpush3.bf16.msra.mxu0 %v4432_v34 }
  0x15   :  { %3915 = vmatprep.subr.bf16.mxu0 %v5541_v32 }
  0x16   :  { %3635 = vmatpush3.msra.mxu1 %v4336_v44 }
  0x17   :  { %3924 = vmatprep.subr.bf16.mxu1 %v5541_v32 }
  0x18   :  { %3917 = vmatpush3.bf16.msra.mxu0 %v4438_v36 }
  0x19   :  { %3918 = vmatprep.subr.bf16.mxu0 %v5541_v32 }
  0xe3   :  { %v192_v46 = vpop.f32.mrb[0].mxu0 }
  0xe4   :  { %v193_v47 = vadd.f32 %v3438_v45, %v192_v46  ;;  %v3625_v48 = vpop.f32.mrb[1].mxu0 }
  0xe5   :  { %v234_v48 = vld [vmem:[%s5534_s1 + $0x10] sm:$0xff] }
  0xe6   :  { %373 = vrot.lane.b32.xlu1 %v193_v47, %s4176_s23  ;;  %279 = vrot.lane.b32.xlu0 %v193_v47, %s4177_s24  ;;  %v239_v47 = vld [vmem:[%s5534_s1 + $0x38] sm:$0xff]  ;;  %s4188_s1 = smov 24  }
 0x158   :  { %v280_v9 = vpop.permute.xlu0 %279  ;;  %v374_v26 = vpop.permute.xlu1 %373 }
 0x159   :  { %v284_v10 = vsel %vm283_vm13, %v282_v8, %v280_v9 }
 0x15a   :  { %3637 = vmatmul.mubr.msk.f32.vlgmr.msra.gmra.mrb[0].mxu1 %vm291_vm14, %v284_v10 }
 0x15b   :  { %3926 = vmatpush3.bf16.msra.mxu1 %v4324_v41  ;;  %3671 = vmatprep.mubr.msk.f32.mxu1 %vm4172_vm1, %v5543_v0 }
 0x15c   :  { %3927 = vmatprep.subr.bf16.mxu1 %v5541_v32 }
 0x15f   :  { %3929 = vmatpush3.bf16.msra.mxu1 %v4327_v42 }
 0x160   :  { %3669 = vmatprep.subr.mxu1 %v5543_v0 }
 0x163   :  { %3670 = vmatpush3.msra.mxu1 %v4336_v44 }
 0x164   :  { %3936 = vmatprep.subr.bf16.mxu1 %v5541_v32 }
 0x22d   :  { %v361_v15 = vpop.f32.mrb[0].mxu1 }
 0x22e   :  { %v362_v16 = vadd.f32 %v361_v15, %v4415_v14  ;;  %v3638_v17 = vpop.f32.mrb[1].mxu1 }
 0x230   :  { %v3442_v19 = vmul.f32 -1.442695, %v362_v16 }
 0x232   :  { %4071 = vpow2.f32 %v3442_v19 }
 0x23c   :  { %v4072_v20 = vpop.eup %4071 }
 0x23d   :  { %v368_v21 = vadd.f32 1.0, %v4072_v20 }
 0x23f   :  { %4073 = vrcp.f32 %v368_v21 }
 0x249   :  { %v4074_v22 = vpop.eup %4073 }
 0x24a   :  { %v371_v23 = vmul.f32 2.0, %v4074_v22  ;;  %v376_v27 = vmul.f32 %v4074_v22, %v374_v26 }
 0x24c   :  { %v3443_v24 = vadd.f32 -1.0, %v371_v23  ;;  %v220_v23 = vld [vmem:[%s5536_s11 + $0x8] sm:$0xff] }
 0x24e   :  { %378 = vrot.lane.b32.xlu0 %v3443_v24, %s4178_s22 }
 0x2c0   :  { %v379_v18 = vpop.permute.xlu0 %378 }
 0x2c1   :  { %v381_v25 = vmul.f32 %v4074_v22, %v379_v18 }
 0x2c3   :  { %383 = vrot.lane.b32.xlu1 %v381_v25, %s4176_s23 }
 0x335   :  { %v384_v28 = vpop.permute.xlu1 %383 }
 0x336   :  { %v4420_v29 = vadd.f32 %v384_v28, %v376_v27  ;;  %v221_v28 = vld [vmem:[%s5536_s11 + $0x10] sm:$0xff] }
 0x338   :  { %4075 = vtanh.f32 %v4420_v29 }
 0x342   :  { %v4076_v37 = vpop.eup %4075 }
 0x343   :  { %389 = vrot.lane.b32.xlu0 %v4076_v37, %s4178_s22 }
 0x347   :  { %483 = vperm.xlu0 %4069, %v233_v39  }
 0x34b   :  { %493 = vperm.xlu0 %4069, %v235_v40  }
 0x34f   :  { %503 = vperm.xlu0 %4069, %v237_v43  }
 0x353   :  { %513 = vperm.xlu0 %4069, %v239_v47  }
 0x3b5   :  { %v390_v45 = vpop.permute.xlu0 %389 }
 0x3b6   :  { %v4453_v46 = vmul.f32 %v4074_v22, %v390_v45  ;;  %v219_v22 = vld [vmem:[%s5536_s11] sm:$0xff]  ;;  %v4522_v45 = vpack.c.bf16 %v222_v30, %v221_v28  ;;  %s4180_s11 = smov 96  }
 0x3b7   :  { %v4516_v35 = vpack.c.bf16 %v220_v23, %v219_v22 }
 0x3b8   :  { %400 = vrot.lane.b32.xlu1 %v4453_v46, %s4176_s23 }
 0x3bc   :  { %488 = vperm.xlu1 %4070, %v234_v48  }
 0x3c0   :  { %478 = vperm.xlu1 %4070, %v232_v49  }
 0x3c4   :  { %498 = vperm.xlu1 %4070, %v236_v50  }
 0x3c6   :  { %v4482_v61 = vpop.permute.xlu0 %483 }
 0x3c8   :  { %508 = vperm.xlu1 %4070, %v238_v53  }
 0x3ca   :  { %v4487_v4 = vpop.permute.xlu0 %493 }
 0x3ce   :  { %v4491_v8 = vpop.permute.xlu0 %503 }
 0x3d2   :  { %v4513_v31 = vpop.permute.xlu0 %513 }
 0x42a   :  { %v401_v55 = vpop.permute.xlu1 %400 }
 0x42b   :  { %3648 = vmatmul.mubr.msk.f32.vlgmr.msra.gmra.mrb[2].mxu0 %vm402_vm15, %v401_v55 }
 0x42c   :  { %3658 = vmatprep.mubr.msk.f32.mxu0 %vm4172_vm1, %v5543_v0  ;;  %3920 = vmatpush3.bf16.msra.mxu0 %v4516_v35 }
 0x42d   :  { %3921 = vmatprep.subr.bf16.mxu0 %v5541_v32 }
 0x430   :  { %3923 = vmatpush3.bf16.msra.mxu0 %v4522_v45 }
 0x431   :  { %3930 = vmatprep.subr.bf16.mxu0 %v5541_v32 }
 0x43b   :  { %v4480_v58 = vpop.permute.xlu1 %488 }
 0x43f   :  { %v4485_v2 = vpop.permute.xlu1 %478 }
 0x443   :  { %v4489_v6 = vpop.permute.xlu1 %498 }
 0x447   :  { %v4503_v24 = vpop.permute.xlu1 %508 }
 0x4fe   :  { %v471_v59 = vpop.f32.mrb[2].mxu0 }
 0x4ff   :  { %v472_v62 = vadd.f32 %v4478_v56, %v471_v59  ;;  %v3649_v1 = vpop.f32.mrb[3].mxu0 }
 0x500   :  { %v4536_v1 = vld [vmem:[%s5537_s3] sm:$0xff] }
 0x501   :  { %4077 = vtanh.f32 %v472_v62 }
 0x50b   :  { %v4078_v7 = vpop.eup %4077 }
 0x50c   :  { %v517_v9 = vrot.slane %v4078_v7, 1  ;;  %v518_v10 = vrot.slane %v4078_v7, 2  ;;  %v519_v11 = vrot.slane %v4078_v7, 3  ;;  %v520_v12 = vrot.slane %v4078_v7, 4 }
 0x50d   :  { %v521_v13 = vrot.slane %v4078_v7, 5  ;;  %v522_v15 = vrot.slane %v4078_v7, 6  ;;  %v523_v16 = vrot.slane %v4078_v7, 7  ;;  %v532_v18 = vmul.f32 %v4078_v7, %v4485_v2  ;;  %v4541_v7 = vld [vmem:[%s5537_s3 + $0x8] sm:$0xff] }
 0x50e   :  { %v533_v17 = vmul.f32 %v517_v9, %v4482_v61  ;;  %v534_v19 = vmul.f32 %v518_v10, %v4480_v58  ;;  %v535_v20 = vmul.f32 %v519_v11, %v4487_v4  ;;  %v536_v21 = vmul.f32 %v520_v12, %v4489_v6  ;;  %v4546_v9 = vld [vmem:[%s5537_s3 + $0x10] sm:$0xff]  ;;  %v4551_v10 = vld [vmem:[%s5537_s3 + $0x18] sm:$0xff]  ;;  %v4556_v11 = vld [vmem:[%s5537_s3 + $0x20] sm:$0xff] }
 0x50f   :  { %v537_v25 = vmul.f32 %v521_v13, %v4491_v8  ;;  %v538_v33 = vmul.f32 %v522_v15, %v4503_v24  ;;  %v539_v37 = vmul.f32 %v523_v16, %v4513_v31  ;;  %v4561_v12 = vld [vmem:[%s5537_s3 + $0x28] sm:$0xff]  ;;  %v659_v13 = vrot.slane %v4541_v7, 7  ;;  %v4568_v16 = vld [vmem:[%s5537_s3 + $0x30] sm:$0xff] }
 0x510   :  { %v548_v26 = vrot.slane %v533_v17, 7  ;;  %v550_v27 = vrot.slane %v534_v19, 6  ;;  %v552_v39 = vrot.slane %v535_v20, 5  ;;  %v554_v43 = vrot.slane %v536_v21, 4  ;;  %v4573_v17 = vld [vmem:[%s5537_s3 + $0x38] sm:$0xff] }
 0x511   :  { %v556_v48 = vrot.slane %v537_v25, 3  ;;  %v558_v50 = vrot.slane %v538_v33, 2  ;;  %v560_v55 = vrot.slane %v539_v37, 1  ;;  %v661_v15 = vrot.slane %v4546_v9, 6 }
 0x512   :  { %v549_v38 = vsel %vm257_vm6, %v548_v26, %v532_v18  ;;  %v663_v19 = vrot.slane %v4551_v10, 5  ;;  %v665_v20 = vrot.slane %v4556_v11, 4  ;;  %v660_v21 = vsel %vm257_vm6, %v659_v13, %v4536_v1 }
 0x513   :  { %v551_v40 = vsel %vm260_vm7, %v550_v27, %v549_v38  ;;  %v667_v22 = vrot.slane %v4561_v12, 3  ;;  %v662_v23 = vsel %vm260_vm7, %v661_v15, %v660_v21  ;;  %v669_v18 = vrot.slane %v4568_v16, 2 }
 0x514   :  { %v553_v47 = vsel %vm263_vm8, %v552_v39, %v551_v40  ;;  %v664_v25 = vsel %vm263_vm8, %v663_v19, %v662_v23  ;;  %v671_v26 = vrot.slane %v4573_v17, 1 }
 0x515   :  { %v555_v49 = vsel %vm266_vm9, %v554_v43, %v553_v47  ;;  %v666_v27 = vsel %vm266_vm9, %v665_v20, %v664_v25  ;;  %v734_v20 = vsel %vm260_vm7, %v4350_v51, %v4355_v52 }
 0x516   :  { %v557_v53 = vsel %vm269_vm10, %v556_v48, %v555_v49  ;;  %v668_v28 = vsel %vm269_vm10, %v667_v22, %v666_v27  ;;  %v735_v21 = vsel %vm263_vm8, %v4360_v54, %v734_v20 }
 0x517   :  { %v559_v59 = vsel %vm272_vm11, %v558_v50, %v557_v53  ;;  %v670_v30 = vsel %vm272_vm11, %v669_v18, %v668_v28  ;;  %v736_v22 = vsel %vm266_vm9, %v4368_v57, %v735_v21 }
 0x518   :  { %v561_v62 = vsel %vm275_vm12, %v560_v55, %v559_v59  ;;  %v672_v37 = vsel %vm275_vm12, %v671_v26, %v670_v30  ;;  %v737_v23 = vsel %vm269_vm10, %v4375_v60, %v736_v22 }
 0x519   :  { %562 = vrot.lane.b32.xlu1 %v561_v62, %s4180_s11  ;;  %v738_v18 = vsel %vm272_vm11, %v4382_v63, %v737_v23 }
 0x51a   :  { %v739_v25 = vsel %vm275_vm12, %v4389_v3, %v738_v18 }
 0x51d   :  { %673 = vrot.lane.b32.xlu1 %v672_v37, %s4181_s5 }
 0x58b   :  { %v563_v33 = vpop.permute.xlu1 %562 }
 0x58c   :  { %v565_v38 = vadd.f32 %v563_v33, %v4453_v46  ;;  %v4601_v46 = vld [vmem:[%s5538_s12] ss:$0 sm:$0xff] }
 0x58e   :  { %573 = vrot.lane.b32.xlu0 %v565_v38, %s4176_s23  ;;  %v747_v62 = vrot.slane %v565_v38, 7 }
 0x58f   :  { %v674_v53 = vpop.permute.xlu1 %673 }
 0x600   :  { %v574_v39 = vpop.permute.xlu0 %573 }
 0x601   :  { %3659 = vmatmul.mubr.msk.f32.vlgmr.msra.gmra.mrb[4].mxu0 %vm402_vm15, %v574_v39 }
 0x602   :  { %3932 = vmatpush3.bf16.msra.mxu0 %v4432_v34  ;;  %3682 = vmatprep.mubr.msk.f32.mxu0 %vm4172_vm1, %v5543_v0 }
 0x603   :  { %3933 = vmatprep.subr.bf16.mxu0 %v5541_v32 }
 0x606   :  { %3935 = vmatpush3.bf16.msra.mxu0 %v4438_v36 }
 0x607   :  { %3942 = vmatprep.subr.bf16.mxu0 %v5541_v32 }
 0x6d4   :  { %v643_v40 = vpop.f32.mrb[4].mxu0 }
 0x6d5   :  { %v644_v43 = vadd.f32 %v4601_v46, %v643_v40  ;;  %v3660_v47 = vpop.f32.mrb[5].mxu0 }
 0x6d7   :  { %v647_v48 = vmax.f32 %v644_v43, -20.0 }
 0x6d9   :  { %v4604_v49 = vmin.f32 %v647_v48, 2.0 }
 0x6db   :  { %v649_v50 = vmul.f32 1.442695, %v4604_v49 }
 0x6dd   :  { %4079 = vpow2.f32 %v649_v50 }
 0x6e7   :  { %v4080_v55 = vpop.eup %4079 }
 0x6e8   :  { %v676_v59 = vmul.f32 %v4080_v55, %v674_v53 }
 0x6ea   :  { %678 = vrot.lane.b32.xlu0 %v676_v59, %s4182_s2 }
 0x6ee   :  { %748 = vrot.lane.b32.xlu0 %v747_v62, %s4183_s9 }
 0x75c   :  { %v679_v13 = vpop.permute.xlu0 %678 }
 0x75d   :  { %v4609_v15 = vadd.f32 %v679_v13, %v644_v43 }
 0x75f   :  { %5549 = vst [vmem:[#allocation2_spill] sm:$0xff] %v4609_v15  ;;  %v743_v19 = vrot.slane %v4609_v15, 7 }
 0x760   :  { %v749_v27 = vpop.permute.xlu0 %748 }
 0x761   :  { %744 = vrot.lane.b32.xlu1 %v743_v19, %s4181_s5 }
 0x7d3   :  { %v745_v26 = vpop.permute.xlu1 %744 }
 0x7d4   :  { %v751_v28 = vsel %vm119_vm2, %v739_v25, %v745_v26  ;;  %v752_v30 = vsel %vm119_vm2, %v4393_v5, %v745_v26 }
 0x7d5   :  { %v753_v33 = vsel %vm283_vm13, %v751_v28, %v749_v27  ;;  %v754_v37 = vsel %vm283_vm13, %v752_v30, %v749_v27 }
 0x7d6   :  { %v758_v38 = vrot.slane %v753_v33, 1  ;;  %v759_v39 = vrot.slane %v754_v37, 1 }
 0x7d8   :  { %v760_v40 = vsel %vm757_vm3, %v758_v38, %v759_v39  ;;  %vm2656_vm3 = vcmask 1041408  }
 0x7d9   :  { %3672 = vmatmul.mubr.msk.f32.vlgmr.msra.gmra.mrb[2].mxu1 %vm291_vm14, %v760_v40 }
 0x7da   :  { %3938 = vmatpush3.bf16.msra.mxu1 %v4516_v35  ;;  %3693 = vmatprep.mubr.msk.f32.mxu1 %vm4172_vm1, %v5543_v0 }
 0x7db   :  { %3939 = vmatprep.subr.bf16.mxu1 %v5541_v32 }
 0x7de   :  { %3941 = vmatpush3.bf16.msra.mxu1 %v4522_v45 }
 0x7df   :  { %3948 = vmatprep.subr.bf16.mxu1 %v5541_v32 }
 0x8ac   :  { %v829_v43 = vpop.f32.mrb[2].mxu1 }
 0x8ad   :  { %v830_v47 = vadd.f32 %v829_v43, %v4415_v14  ;;  %v3673_v48 = vpop.f32.mrb[3].mxu1 }
 0x8af   :  { %v3450_v50 = vmul.f32 -1.442695, %v830_v47 }
 0x8b1   :  { %4081 = vpow2.f32 %v3450_v50 }
 0x8bb   :  { %v4082_v53 = vpop.eup %4081 }
 0x8bc   :  { %v836_v55 = vadd.f32 1.0, %v4082_v53 }
 0x8be   :  { %4083 = vrcp.f32 %v836_v55 }
 0x8c8   :  { %v4084_v59 = vpop.eup %4083 }
 0x8c9   :  { %v839_v62 = vmul.f32 2.0, %v4084_v59  ;;  %v841_v21 = vmul.f32 %v4084_v59, %v4420_v29 }
 0x8cb   :  { %v3451_v13 = vadd.f32 -1.0, %v839_v62 }
 0x8cd   :  { %843 = vrot.lane.b32.xlu1 %v3451_v13, %s4178_s22 }
 0x93f   :  { %v844_v19 = vpop.permute.xlu1 %843 }
 0x940   :  { %v846_v20 = vmul.f32 %v4084_v59, %v844_v19 }
 0x942   :  { %848 = vrot.lane.b32.xlu0 %v846_v20, %s4176_s23 }
 0x9b4   :  { %v849_v22 = vpop.permute.xlu0 %848 }
 0x9b5   :  { %v4642_v23 = vadd.f32 %v849_v22, %v841_v21 }
 0x9b7   :  { %4085 = vtanh.f32 %v4642_v23 }
 0x9c1   :  { %v4086_v18 = vpop.eup %4085 }
 0x9c2   :  { %854 = vrot.lane.b32.xlu1 %v4086_v18, %s4178_s22 }
 0xa34   :  { %v855_v25 = vpop.permute.xlu1 %854 }
 0xa35   :  { %v857_v26 = vmul.f32 %v4084_v59, %v855_v25 }
 0xa37   :  { %859 = vrot.lane.b32.xlu0 %v857_v26, %s4176_s23 }
 0xaa9   :  { %v860_v27 = vpop.permute.xlu0 %859 }
 0xaaa   :  { %3683 = vmatmul.mubr.msk.f32.vlgmr.msra.gmra.mrb[6].mxu0 %vm402_vm15, %v860_v27 }
 0xaab   :  { %3944 = vmatpush3.bf16.msra.mxu0 %v4324_v41  ;;  %3706 = vmatprep.mubr.msk.f32.mxu0 %vm4172_vm1, %v5543_v0 }
 0xaac   :  { %3945 = vmatprep.subr.bf16.mxu0 %v5541_v32 }
 0xaaf   :  { %3947 = vmatpush3.bf16.msra.mxu0 %v4327_v42 }
 0xab0   :  { %3704 = vmatprep.subr.mxu0 %v5543_v0 }
 0xab3   :  { %3705 = vmatpush3.msra.mxu0 %v4336_v44 }
 0xab4   :  { %3954 = vmatprep.subr.bf16.mxu0 %v5541_v32 }
 0xb7d   :  { %v929_v29 = vpop.f32.mrb[6].mxu0 }
 0xb7e   :  { %v930_v28 = vadd.f32 %v4478_v56, %v929_v29  ;;  %v3684_v30 = vpop.f32.mrb[7].mxu0 }
 0xb80   :  { %4087 = vtanh.f32 %v930_v28 }
 0xb8a   :  { %v4088_v33 = vpop.eup %4087 }
 0xb8b   :  { %v935_v37 = vrot.slane %v4088_v33, 7  ;;  %v936_v38 = vrot.slane %v4088_v33, 1  ;;  %v937_v39 = vrot.slane %v4088_v33, 2  ;;  %v938_v40 = vrot.slane %v4088_v33, 3 }
 0xb8c   :  { %v939_v43 = vrot.slane %v4088_v33, 4  ;;  %v940_v47 = vrot.slane %v4088_v33, 5  ;;  %v941_v48 = vrot.slane %v4088_v33, 6  ;;  %v951_v62 = vmul.f32 %v4088_v33, %v4482_v61 }
 0xb8d   :  { %v950_v50 = vmul.f32 %v935_v37, %v4485_v2  ;;  %v952_v53 = vmul.f32 %v936_v38, %v4480_v58  ;;  %v953_v55 = vmul.f32 %v937_v39, %v4487_v4  ;;  %v954_v59 = vmul.f32 %v938_v40, %v4489_v6 }
 0xb8e   :  { %v955_v13 = vmul.f32 %v939_v43, %v4491_v8  ;;  %v956_v21 = vmul.f32 %v940_v47, %v4503_v24  ;;  %v957_v22 = vmul.f32 %v941_v48, %v4513_v31  ;;  %v1063_v47 = vrot.slane %v4536_v1, 1 }
 0xb8f   :  { %v966_v19 = vrot.slane %v950_v50, 1  ;;  %v968_v20 = vrot.slane %v952_v53, 7  ;;  %v970_v25 = vrot.slane %v953_v55, 6  ;;  %v972_v29 = vrot.slane %v954_v59, 5 }
 0xb90   :  { %v974_v30 = vrot.slane %v955_v13, 4  ;;  %v976_v33 = vrot.slane %v956_v21, 3  ;;  %v978_v39 = vrot.slane %v957_v22, 2  ;;  %v1065_v48 = vrot.slane %v4546_v9, 7 }
 0xb91   :  { %v967_v18 = vsel %vm257_vm6, %v951_v62, %v966_v19  ;;  %v1067_v50 = vrot.slane %v4551_v10, 6  ;;  %v1069_v53 = vrot.slane %v4556_v11, 5  ;;  %v1064_v55 = vsel %vm257_vm6, %v4541_v7, %v1063_v47 }
 0xb92   :  { %v969_v27 = vsel %vm260_vm7, %v968_v20, %v967_v18  ;;  %v1071_v59 = vrot.slane %v4561_v12, 4  ;;  %v1066_v62 = vsel %vm260_vm7, %v1065_v48, %v1064_v55  ;;  %v1073_v13 = vrot.slane %v4568_v16, 3 }
 0xb93   :  { %v971_v28 = vsel %vm263_vm8, %v970_v25, %v969_v27  ;;  %v1068_v19 = vsel %vm263_vm8, %v1067_v50, %v1066_v62  ;;  %v1075_v20 = vrot.slane %v4573_v17, 2 }
 0xb94   :  { %v973_v37 = vsel %vm266_vm9, %v972_v29, %v971_v28  ;;  %v1070_v21 = vsel %vm266_vm9, %v1069_v53, %v1068_v19 }
 0xb95   :  { %v975_v38 = vsel %vm269_vm10, %v974_v30, %v973_v37  ;;  %v1072_v22 = vsel %vm269_vm10, %v1071_v59, %v1070_v21  ;;  %v1114_v59 = vsel %vm263_vm8, %v4350_v51, %v4355_v52  ;;  %v1119_v21 = vsel %vm257_vm6, %v4393_v5, %v4389_v3 }
 0xb96   :  { %v977_v40 = vsel %vm272_vm11, %v976_v33, %v975_v38  ;;  %v1074_v18 = vsel %vm272_vm11, %v1073_v13, %v1072_v22  ;;  %v1115_v62 = vsel %vm266_vm9, %v4360_v54, %v1114_v59 }
 0xb97   :  { %v979_v43 = vsel %vm275_vm12, %v978_v39, %v977_v40  ;;  %v1076_v25 = vsel %vm275_vm12, %v1075_v20, %v1074_v18  ;;  %v1116_v13 = vsel %vm269_vm10, %v4368_v57, %v1115_v62 }
 0xb98   :  { %980 = vrot.lane.b32.xlu1 %v979_v43, %s4180_s11  ;;  %v1117_v19 = vsel %vm272_vm11, %v4375_v60, %v1116_v13 }
 0xb99   :  { %v1118_v20 = vsel %vm275_vm12, %v4382_v63, %v1117_v19 }
 0xb9c   :  { %1077 = vrot.lane.b32.xlu1 %v1076_v25, %s4181_s5 }
 0xc0a   :  { %v981_v27 = vpop.permute.xlu1 %980 }
 0xc0b   :  { %v983_v29 = vadd.f32 %v981_v27, %v857_v26 }
 0xc0d   :  { %985 = vrot.lane.b32.xlu0 %v983_v29, %s4176_s23  ;;  %v1127_v48 = vrot.slane %v983_v29, 6 }
 0xc0e   :  { %v1078_v40 = vpop.permute.xlu1 %1077 }
 0xc7f   :  { %v986_v28 = vpop.permute.xlu0 %985 }
 0xc80   :  { %3694 = vmatmul.mubr.msk.f32.vlgmr.msra.gmra.mrb[4].mxu1 %vm402_vm15, %v986_v28 }
 0xc81   :  { %3950 = vmatpush3.bf16.msra.mxu1 %v4432_v34  ;;  %3717 = vmatprep.mubr.msk.f32.mxu1 %vm4172_vm1, %v5543_v0 }
 0xc82   :  { %3951 = vmatprep.subr.bf16.mxu1 %v5541_v32 }
 0xc85   :  { %3953 = vmatpush3.bf16.msra.mxu1 %v4438_v36 }
 0xc86   :  { %3960 = vmatprep.subr.bf16.mxu1 %v5541_v32 }
 0xd53   :  { %v1055_v30 = vpop.f32.mrb[4].mxu1 }
 0xd54   :  { %v1056_v37 = vadd.f32 %v4601_v46, %v1055_v30  ;;  %v3695_v26 = vpop.f32.mrb[5].mxu1 }
 0xd56   :  { %v1059_v33 = vmax.f32 %v1056_v37, -20.0 }
 0xd58   :  { %v4698_v38 = vmin.f32 %v1059_v33, 2.0 }
 0xd5a   :  { %v1061_v39 = vmul.f32 1.442695, %v4698_v38 }
 0xd5c   :  { %4089 = vpow2.f32 %v1061_v39 }
 0xd66   :  { %v4090_v43 = vpop.eup %4089 }
 0xd67   :  { %v1080_v47 = vmul.f32 %v4090_v43, %v1078_v40 }
 0xd69   :  { %1082 = vrot.lane.b32.xlu0 %v1080_v47, %s4182_s2 }
 0xd6d   :  { %1128 = vrot.lane.b32.xlu0 %v1127_v48, %s4183_s9 }
 0xddb   :  { %v1083_v50 = vpop.permute.xlu0 %1082 }
 0xddc   :  { %v4703_v53 = vadd.f32 %v1083_v50, %v1056_v37 }
 0xdde   :  { %5550 = vst [vmem:[#allocation3_spill] sm:$0xff] %v4703_v53  ;;  %v1123_v55 = vrot.slane %v4703_v53, 6 }
 0xddf   :  { %v1129_v18 = vpop.permute.xlu0 %1128 }
 0xde0   :  { %1124 = vrot.lane.b32.xlu1 %v1123_v55, %s4181_s5 }
 0xe52   :  { %v1125_v22 = vpop.permute.xlu1 %1124 }
 0xe53   :  { %v1131_v25 = vsel %vm119_vm2, %v1118_v20, %v1125_v22  ;;  %v1132_v27 = vsel %vm119_vm2, %v1119_v21, %v1125_v22 }
 0xe54   :  { %v1133_v29 = vsel %vm283_vm13, %v1131_v25, %v1129_v18  ;;  %v1134_v28 = vsel %vm283_vm13, %v1132_v27, %v1129_v18 }
 0xe55   :  { %v1138_v30 = vrot.slane %v1133_v29, 2  ;;  %v1139_v37 = vrot.slane %v1134_v28, 2 }
 0xe57   :  { %v1140_v26 = vsel %vm1137_vm4, %v1138_v30, %v1139_v37  ;;  %vm3036_vm4 = vcmask 1040384  }
 0xe58   :  { %3707 = vmatmul.mubr.msk.f32.vlgmr.msra.gmra.mrb[8].mxu0 %vm291_vm14, %v1140_v26 }
 0xe59   :  { %3956 = vmatpush3.bf16.msra.mxu0 %v4516_v35  ;;  %3728 = vmatprep.mubr.msk.f32.mxu0 %vm4172_vm1, %v5543_v0 }
 0xe5a   :  { %3957 = vmatprep.subr.bf16.mxu0 %v5541_v32 }
 0xe5d   :  { %3959 = vmatpush3.bf16.msra.mxu0 %v4522_v45 }
 0xe5e   :  { %3966 = vmatprep.subr.bf16.mxu0 %v5541_v32 }
 0xf2b   :  { %v1209_v33 = vpop.f32.mrb[8].mxu0 }
 0xf2c   :  { %v1210_v39 = vadd.f32 %v1209_v33, %v4415_v14  ;;  %v3708_v40 = vpop.f32.mrb[9].mxu0 }
 0xf2e   :  { %v3456_v43 = vmul.f32 -1.442695, %v1210_v39 }
 0xf30   :  { %4091 = vpow2.f32 %v3456_v43 }
 0xf3a   :  { %v4092_v47 = vpop.eup %4091 }
 0xf3b   :  { %v1216_v48 = vadd.f32 1.0, %v4092_v47 }
 0xf3d   :  { %4093 = vrcp.f32 %v1216_v48 }
 0xf47   :  { %v4094_v50 = vpop.eup %4093 }
 0xf48   :  { %v1219_v55 = vmul.f32 2.0, %v4094_v50  ;;  %v1221_v19 = vmul.f32 %v4094_v50, %v4642_v23 }
 0xf4a   :  { %v3457_v59 = vadd.f32 -1.0, %v1219_v55 }
 0xf4c   :  { %1223 = vrot.lane.b32.xlu1 %v3457_v59, %s4178_s22 }
 0xfbe   :  { %v1224_v62 = vpop.permute.xlu1 %1223 }
 0xfbf   :  { %v1226_v13 = vmul.f32 %v4094_v50, %v1224_v62 }
 0xfc1   :  { %1228 = vrot.lane.b32.xlu0 %v1226_v13, %s4176_s23 }
0x1033   :  { %v1229_v20 = vpop.permute.xlu0 %1228 }
0x1034   :  { %v4736_v21 = vadd.f32 %v1229_v20, %v1221_v19 }
0x1036   :  { %4095 = vtanh.f32 %v4736_v21 }
0x1040   :  { %v4096_v22 = vpop.eup %4095 }
0x1041   :  { %1234 = vrot.lane.b32.xlu1 %v4096_v22, %s4178_s22 }
0x10b3   :  { %v1235_v18 = vpop.permute.xlu1 %1234 }
0x10b4   :  { %v1237_v25 = vmul.f32 %v4094_v50, %v1235_v18 }
0x10b6   :  { %1239 = vrot.lane.b32.xlu0 %v1237_v25, %s4176_s23 }
0x1128   :  { %v1240_v27 = vpop.permute.xlu0 %1239 }
0x1129   :  { %3718 = vmatmul.mubr.msk.f32.vlgmr.msra.gmra.mrb[6].mxu1 %vm402_vm15, %v1240_v27 }
0x112a   :  { %3962 = vmatpush3.bf16.msra.mxu1 %v4324_v41  ;;  %3741 = vmatprep.mubr.msk.f32.mxu1 %vm4172_vm1, %v5543_v0 }
0x112b   :  { %3963 = vmatprep.subr.bf16.mxu1 %v5541_v32 }
0x112e   :  { %3965 = vmatpush3.bf16.msra.mxu1 %v4327_v42 }
0x112f   :  { %3739 = vmatprep.subr.mxu1 %v5543_v0 }
0x1132   :  { %3740 = vmatpush3.msra.mxu1 %v4336_v44 }
0x1133   :  { %3972 = vmatprep.subr.bf16.mxu1 %v5541_v32 }
0x11fc   :  { %v1309_v23 = vpop.f32.mrb[6].mxu1 }
0x11fd   :  { %v1310_v29 = vadd.f32 %v4478_v56, %v1309_v23  ;;  %v3719_v28 = vpop.f32.mrb[7].mxu1 }
0x11ff   :  { %4097 = vtanh.f32 %v1310_v29 }
0x1209   :  { %v4098_v30 = vpop.eup %4097 }
0x120a   :  { %v1315_v37 = vrot.slane %v4098_v30, 6  ;;  %v1316_v26 = vrot.slane %v4098_v30, 7  ;;  %v1317_v33 = vrot.slane %v4098_v30, 1  ;;  %v1318_v39 = vrot.slane %v4098_v30, 2 }
0x120b   :  { %v1319_v40 = vrot.slane %v4098_v30, 3  ;;  %v1320_v43 = vrot.slane %v4098_v30, 4  ;;  %v1321_v47 = vrot.slane %v4098_v30, 5  ;;  %v1332_v20 = vmul.f32 %v4098_v30, %v4480_v58 }
0x120c   :  { %v1330_v48 = vmul.f32 %v1315_v37, %v4485_v2  ;;  %v1331_v50 = vmul.f32 %v1316_v26, %v4482_v61  ;;  %v1333_v55 = vmul.f32 %v1317_v33, %v4487_v4  ;;  %v1334_v59 = vmul.f32 %v1318_v39, %v4489_v6 }
0x120d   :  { %v1335_v62 = vmul.f32 %v1319_v40, %v4491_v8  ;;  %v1336_v22 = vmul.f32 %v1320_v43, %v4503_v24  ;;  %v1337_v18 = vmul.f32 %v1321_v47, %v4513_v31  ;;  %v1443_v47 = vrot.slane %v4536_v1, 2 }
0x120e   :  { %v1346_v13 = vrot.slane %v1330_v48, 2  ;;  %v1347_v19 = vrot.slane %v1331_v50, 1  ;;  %v1350_v23 = vrot.slane %v1333_v55, 7  ;;  %v1352_v28 = vrot.slane %v1334_v59, 6 }
0x120f   :  { %v1354_v26 = vrot.slane %v1335_v62, 5  ;;  %v1356_v39 = vrot.slane %v1336_v22, 4  ;;  %v1358_v48 = vrot.slane %v1337_v18, 3  ;;  %v1444_v50 = vrot.slane %v4541_v7, 1 }
0x1210   :  { %v1348_v27 = vsel %vm257_vm6, %v1347_v19, %v1346_v13  ;;  %v1447_v55 = vrot.slane %v4551_v10, 7  ;;  %v1449_v59 = vrot.slane %v4556_v11, 6  ;;  %v1451_v13 = vrot.slane %v4561_v12, 5 }
0x1211   :  { %v1349_v29 = vsel %vm260_vm7, %v1332_v20, %v1348_v27  ;;  %v1445_v62 = vsel %vm257_vm6, %v1444_v50, %v1443_v47  ;;  %v1453_v20 = vrot.slane %v4568_v16, 4  ;;  %v1455_v18 = vrot.slane %v4573_v17, 3 }
0x1212   :  { %v1351_v37 = vsel %vm263_vm8, %v1350_v23, %v1349_v29  ;;  %v1446_v19 = vsel %vm260_vm7, %v4546_v9, %v1445_v62 }
0x1213   :  { %v1353_v33 = vsel %vm266_vm9, %v1352_v28, %v1351_v37  ;;  %v1448_v22 = vsel %vm263_vm8, %v1447_v55, %v1446_v19 }
0x1214   :  { %v1355_v40 = vsel %vm269_vm10, %v1354_v26, %v1353_v33  ;;  %v1450_v27 = vsel %vm266_vm9, %v1449_v59, %v1448_v22 }
0x1215   :  { %v1357_v30 = vsel %vm272_vm11, %v1356_v39, %v1355_v40  ;;  %v1452_v23 = vsel %vm269_vm10, %v1451_v13, %v1450_v27  ;;  %v1498_v27 = vsel %vm257_vm6, %v4389_v3, %v4382_v63 }
0x1216   :  { %v1359_v43 = vsel %vm275_vm12, %v1358_v48, %v1357_v30  ;;  %v1454_v29 = vsel %vm272_vm11, %v1453_v20, %v1452_v23  ;;  %v1494_v20 = vsel %vm266_vm9, %v4350_v51, %v4355_v52 }
0x1217   :  { %1360 = vrot.lane.b32.xlu1 %v1359_v43, %s4180_s11  ;;  %v1456_v28 = vsel %vm275_vm12, %v1455_v18, %v1454_v29  ;;  %v1495_v22 = vsel %vm269_vm10, %v4360_v54, %v1494_v20  ;;  %v1499_v29 = vsel %vm260_vm7, %v4393_v5, %v1498_v27 }
0x1218   :  { %v1496_v18 = vsel %vm272_vm11, %v4368_v57, %v1495_v22 }
0x1219   :  { %v1497_v23 = vsel %vm275_vm12, %v4375_v60, %v1496_v18 }
0x121b   :  { %1457 = vrot.lane.b32.xlu1 %v1456_v28, %s4181_s5 }
0x1289   :  { %v1361_v37 = vpop.permute.xlu1 %1360 }
0x128a   :  { %v1363_v26 = vadd.f32 %v1361_v37, %v1237_v25 }
0x128c   :  { %1365 = vrot.lane.b32.xlu0 %v1363_v26, %s4176_s23  ;;  %v1507_v59 = vrot.slane %v1363_v26, 5 }
0x128d   :  { %v1458_v47 = vpop.permute.xlu1 %1457 }
0x12fe   :  { %v1366_v33 = vpop.permute.xlu0 %1365 }
0x12ff   :  { %3729 = vmatmul.mubr.msk.f32.vlgmr.msra.gmra.mrb[10].mxu0 %vm402_vm15, %v1366_v33 }
0x1300   :  { %3968 = vmatpush3.bf16.msra.mxu0 %v4432_v34  ;;  %3752 = vmatprep.mubr.msk.f32.mxu0 %vm4172_vm1, %v5543_v0 }
0x1301   :  { %3969 = vmatprep.subr.bf16.mxu0 %v5541_v32 }
0x1304   :  { %3971 = vmatpush3.bf16.msra.mxu0 %v4438_v36 }
0x1305   :  { %3978 = vmatprep.subr.bf16.mxu0 %v5541_v32 }
0x13d2   :  { %v1435_v39 = vpop.f32.mrb[10].mxu0 }
0x13d3   :  { %v1436_v40 = vadd.f32 %v4601_v46, %v1435_v39  ;;  %v3730_v25 = vpop.f32.mrb[11].mxu0 }
0x13d5   :  { %v1439_v48 = vmax.f32 %v1436_v40, -20.0 }
0x13d7   :  { %v4792_v30 = vmin.f32 %v1439_v48, 2.0 }
0x13d9   :  { %v1441_v43 = vmul.f32 1.442695, %v4792_v30 }
0x13db   :  { %4099 = vpow2.f32 %v1441_v43 }
0x13e5   :  { %v4100_v50 = vpop.eup %4099 }
0x13e6   :  { %v1460_v55 = vmul.f32 %v4100_v50, %v1458_v47 }
0x13e8   :  { %1462 = vrot.lane.b32.xlu0 %v1460_v55, %s4182_s2 }
0x13ec   :  { %1508 = vrot.lane.b32.xlu0 %v1507_v59, %s4183_s9 }
0x145a   :  { %v1463_v62 = vpop.permute.xlu0 %1462 }
0x145b   :  { %v4797_v13 = vadd.f32 %v1463_v62, %v1436_v40 }
0x145d   :  { %v1503_v19 = vrot.slane %v4797_v13, 5 }
0x145e   :  { %v1509_v37 = vpop.permute.xlu0 %1508 }
0x145f   :  { %1504 = vrot.lane.b32.xlu1 %v1503_v19, %s4181_s5 }
0x14d1   :  { %v1505_v28 = vpop.permute.xlu1 %1504 }
0x14d2   :  { %v1511_v52 = vsel %vm119_vm2, %v1497_v23, %v1505_v28  ;;  %v1512_v26 = vsel %vm119_vm2, %v1499_v29, %v1505_v28 }
0x14d3   :  { %v1513_v33 = vsel %vm283_vm13, %v1511_v52, %v1509_v37  ;;  %v1514_v39 = vsel %vm283_vm13, %v1512_v26, %v1509_v37 }
0x14d4   :  { %v1518_v40 = vrot.slane %v1513_v33, 3  ;;  %v1519_v25 = vrot.slane %v1514_v39, 3 }
0x14d6   :  { %v1520_v48 = vsel %vm1517_vm5, %v1518_v40, %v1519_v25 }
0x14d7   :  { %3742 = vmatmul.mubr.msk.f32.vlgmr.msra.gmra.mrb[8].mxu1 %vm291_vm14, %v1520_v48 }
0x14d8   :  { %3974 = vmatpush3.bf16.msra.mxu1 %v4516_v35  ;;  %3763 = vmatprep.mubr.msk.f32.mxu1 %vm4172_vm1, %v5543_v0 }
0x14d9   :  { %3975 = vmatprep.subr.bf16.mxu1 %v5541_v32 }
0x14dc   :  { %3977 = vmatpush3.bf16.msra.mxu1 %v4522_v45 }
0x14dd   :  { %3984 = vmatprep.subr.bf16.mxu1 %v5541_v32 }
0x15aa   :  { %v1589_v43 = vpop.f32.mrb[8].mxu1 }
0x15ab   :  { %v1590_v47 = vadd.f32 %v1589_v43, %v4415_v14  ;;  %v3743_v50 = vpop.f32.mrb[9].mxu1 }
0x15ad   :  { %v3462_v55 = vmul.f32 -1.442695, %v1590_v47 }
0x15af   :  { %4101 = vpow2.f32 %v3462_v55 }
0x15b9   :  { %v4102_v59 = vpop.eup %4101 }
0x15ba   :  { %v1596_v62 = vadd.f32 1.0, %v4102_v59 }
0x15bc   :  { %4103 = vrcp.f32 %v1596_v62 }
0x15c6   :  { %v4104_v19 = vpop.eup %4103 }
0x15c7   :  { %v1599_v20 = vmul.f32 2.0, %v4104_v19  ;;  %v1601_v23 = vmul.f32 %v4104_v19, %v4736_v21 }
0x15c9   :  { %v3463_v22 = vadd.f32 -1.0, %v1599_v20 }
0x15cb   :  { %1603 = vrot.lane.b32.xlu1 %v3463_v22, %s4178_s22 }
0x163d   :  { %v1604_v18 = vpop.permute.xlu1 %1603 }
0x163e   :  { %v1606_v27 = vmul.f32 %v4104_v19, %v1604_v18 }
0x1640   :  { %1608 = vrot.lane.b32.xlu0 %v1606_v27, %s4176_s23 }
0x16b2   :  { %v1609_v29 = vpop.permute.xlu0 %1608 }
0x16b3   :  { %v4830_v28 = vadd.f32 %v1609_v29, %v1601_v23 }
0x16b5   :  { %4105 = vtanh.f32 %v4830_v28 }
0x16bf   :  { %v4106_v37 = vpop.eup %4105 }
0x16c0   :  { %1614 = vrot.lane.b32.xlu1 %v4106_v37, %s4178_s22 }
0x1732   :  { %v1615_v52 = vpop.permute.xlu1 %1614 }
0x1733   :  { %v1617_v26 = vmul.f32 %v4104_v19, %v1615_v52 }
0x1735   :  { %1619 = vrot.lane.b32.xlu0 %v1617_v26, %s4176_s23 }
0x17a7   :  { %v1620_v33 = vpop.permute.xlu0 %1619 }
0x17a8   :  { %3753 = vmatmul.mubr.msk.f32.vlgmr.msra.gmra.mrb[12].mxu0 %vm402_vm15, %v1620_v33 }
0x17a9   :  { %3980 = vmatpush3.bf16.msra.mxu0 %v4324_v41  ;;  %3776 = vmatprep.mubr.msk.f32.mxu0 %vm4172_vm1, %v5543_v0 }
0x17aa   :  { %3981 = vmatprep.subr.bf16.mxu0 %v5541_v32 }
0x17ad   :  { %3983 = vmatpush3.bf16.msra.mxu0 %v4327_v42 }
0x17ae   :  { %3774 = vmatprep.subr.mxu0 %v5543_v0 }
0x17b1   :  { %3775 = vmatpush3.msra.mxu0 %v4336_v44 }
0x17b2   :  { %3990 = vmatprep.subr.bf16.mxu0 %v5541_v32 }
0x187b   :  { %v1689_v21 = vpop.f32.mrb[12].mxu0 }
0x187c   :  { %v1690_v39 = vadd.f32 %v4478_v56, %v1689_v21  ;;  %v3754_v40 = vpop.f32.mrb[13].mxu0 }
0x187e   :  { %4107 = vtanh.f32 %v1690_v39 }
0x1888   :  { %v4108_v25 = vpop.eup %4107 }
0x1889   :  { %v1695_v48 = vrot.slane %v4108_v25, 5  ;;  %v1696_v43 = vrot.slane %v4108_v25, 6  ;;  %v1697_v47 = vrot.slane %v4108_v25, 7  ;;  %v1698_v50 = vrot.slane %v4108_v25, 1 }
0x188a   :  { %v1699_v55 = vrot.slane %v4108_v25, 2  ;;  %v1700_v59 = vrot.slane %v4108_v25, 3  ;;  %v1701_v62 = vrot.slane %v4108_v25, 4  ;;  %v1713_v52 = vmul.f32 %v4108_v25, %v4487_v4 }
0x188b   :  { %v1710_v19 = vmul.f32 %v1695_v48, %v4485_v2  ;;  %v1711_v20 = vmul.f32 %v1696_v43, %v4482_v61  ;;  %v1712_v22 = vmul.f32 %v1697_v47, %v4480_v58  ;;  %v1714_v18 = vmul.f32 %v1698_v50, %v4489_v6 }
0x188c   :  { %v1715_v56 = vmul.f32 %v1699_v55, %v4491_v8  ;;  %v1716_v37 = vmul.f32 %v1700_v59, %v4503_v24  ;;  %v1717_v33 = vmul.f32 %v1701_v62, %v4513_v31  ;;  %v1823_v62 = vrot.slane %v4536_v1, 3 }
0x188d   :  { %v1726_v27 = vrot.slane %v1710_v19, 3  ;;  %v1727_v23 = vrot.slane %v1711_v20, 2  ;;  %v1729_v29 = vrot.slane %v1712_v22, 1  ;;  %v1732_v40 = vrot.slane %v1714_v18, 7 }
0x188e   :  { %v1734_v43 = vrot.slane %v1715_v56, 6  ;;  %v1736_v50 = vrot.slane %v1716_v37, 5  ;;  %v1738_v19 = vrot.slane %v1717_v33, 4  ;;  %v1824_v20 = vrot.slane %v4541_v7, 2 }
0x188f   :  { %v1728_v21 = vsel %vm257_vm6, %v1727_v23, %v1726_v27  ;;  %v1826_v22 = vrot.slane %v4546_v9, 1  ;;  %v1829_v18 = vrot.slane %v4556_v11, 7  ;;  %v1831_v27 = vrot.slane %v4561_v12, 6 }
0x1890   :  { %v1730_v39 = vsel %vm260_vm7, %v1729_v29, %v1728_v21  ;;  %v1825_v56 = vsel %vm257_vm6, %v1824_v20, %v1823_v62  ;;  %v1833_v29 = vrot.slane %v4568_v16, 5  ;;  %v1877_v62 = vsel %vm257_vm6, %v4382_v63, %v4375_v60 }
0x1891   :  { %v1731_v48 = vsel %vm263_vm8, %v1713_v52, %v1730_v39  ;;  %v1827_v23 = vsel %vm260_vm7, %v1826_v22, %v1825_v56  ;;  %v1835_v52 = vrot.slane %v4573_v17, 4  ;;  %v1878_v22 = vsel %vm260_vm7, %v4389_v3, %v1877_v62 }
0x1892   :  { %v1733_v47 = vsel %vm266_vm9, %v1732_v40, %v1731_v48  ;;  %v1828_v37 = vsel %vm263_vm8, %v4551_v10, %v1827_v23  ;;  %v1879_v56 = vsel %vm263_vm8, %v4393_v5, %v1878_v22 }
0x1893   :  { %v1735_v55 = vsel %vm269_vm10, %v1734_v43, %v1733_v47  ;;  %v1830_v1 = vsel %vm266_vm9, %v1829_v18, %v1828_v37 }
0x1894   :  { %v1737_v59 = vsel %vm272_vm11, %v1736_v50, %v1735_v55  ;;  %v1832_v7 = vsel %vm269_vm10, %v1831_v27, %v1830_v1 }
0x1895   :  { %v1739_v25 = vsel %vm275_vm12, %v1738_v19, %v1737_v59  ;;  %v1834_v9 = vsel %vm272_vm11, %v1833_v29, %v1832_v7  ;;  %v4898_v59 = vld [vmem:[%s5531_s0] sm:$0xff] }
0x1896   :  { %1740 = vrot.lane.b32.xlu1 %v1739_v25, %s4180_s11  ;;  %v1836_v11 = vsel %vm275_vm12, %v1835_v52, %v1834_v9  ;;  %v1874_v25 = vsel %vm269_vm10, %v4350_v51, %v4898_v59 }
0x1897   :  { %v1875_v20 = vsel %vm272_vm11, %v4360_v54, %v1874_v25 }
0x1898   :  { %v1876_v18 = vsel %vm275_vm12, %v4368_v57, %v1875_v20 }
0x189a   :  { %1837 = vrot.lane.b32.xlu1 %v1836_v11, %s4181_s5 }
0x1908   :  { %v1741_v12 = vpop.permute.xlu1 %1740 }
0x1909   :  { %v1743_v33 = vadd.f32 %v1741_v12, %v1617_v26 }
0x190b   :  { %1745 = vrot.lane.b32.xlu0 %v1743_v33, %s4176_s23  ;;  %v1887_v50 = vrot.slane %v1743_v33, 4 }
0x190c   :  { %v1838_v48 = vpop.permute.xlu1 %1837 }
0x197d   :  { %v1746_v16 = vpop.permute.xlu0 %1745 }
0x197e   :  { %3764 = vmatmul.mubr.msk.f32.vlgmr.msra.gmra.mrb[10].mxu1 %vm402_vm15, %v1746_v16 }
0x197f   :  { %3986 = vmatpush3.bf16.msra.mxu1 %v4432_v34  ;;  %3787 = vmatprep.mubr.msk.f32.mxu1 %vm4172_vm1, %v5543_v0 }
0x1980   :  { %3987 = vmatprep.subr.bf16.mxu1 %v5541_v32 }
0x1983   :  { %3989 = vmatpush3.bf16.msra.mxu1 %v4438_v36 }
0x1984   :  { %3996 = vmatprep.subr.bf16.mxu1 %v5541_v32 }
0x1a51   :  { %v1815_v10 = vpop.f32.mrb[10].mxu1 }
0x1a52   :  { %v1816_v17 = vadd.f32 %v4601_v46, %v1815_v10  ;;  %v3765_v26 = vpop.f32.mrb[11].mxu1 }
0x1a54   :  { %v1819_v21 = vmax.f32 %v1816_v17, -20.0 }
0x1a56   :  { %v4886_v39 = vmin.f32 %v1819_v21, 2.0 }
0x1a58   :  { %v1821_v40 = vmul.f32 1.442695, %v4886_v39 }
0x1a5a   :  { %4109 = vpow2.f32 %v1821_v40 }
0x1a64   :  { %v4110_v43 = vpop.eup %4109 }
0x1a65   :  { %v1840_v47 = vmul.f32 %v4110_v43, %v1838_v48 }
0x1a67   :  { %1842 = vrot.lane.b32.xlu0 %v1840_v47, %s4182_s2 }
0x1a6b   :  { %1888 = vrot.lane.b32.xlu0 %v1887_v50, %s4183_s9 }
0x1ad9   :  { %v1843_v55 = vpop.permute.xlu0 %1842 }
0x1ada   :  { %v4891_v19 = vadd.f32 %v1843_v55, %v1816_v17 }
0x1adc   :  { %v1883_v46 = vrot.slane %v4891_v19, 4 }
0x1add   :  { %v1889_v23 = vpop.permute.xlu0 %1888 }
0x1ade   :  { %1884 = vrot.lane.b32.xlu1 %v1883_v46, %s4181_s5 }
0x1b50   :  { %v1885_v27 = vpop.permute.xlu1 %1884 }
0x1b51   :  { %v1891_v29 = vsel %vm119_vm2, %v1876_v18, %v1885_v27  ;;  %v1892_v37 = vsel %vm119_vm2, %v1879_v56, %v1885_v27  ;;  %v4950_v18 = vld [vmem:[%s5535_s10] ss:$0 sm:$0xff] }
0x1b52   :  { %v1893_v52 = vsel %vm283_vm13, %v1891_v29, %v1889_v23  ;;  %v1894_v1 = vsel %vm283_vm13, %v1892_v37, %v1889_v23 }
0x1b53   :  { %v1897_v7 = vrot.slane %v1893_v52, 4  ;;  %v1898_v9 = vrot.slane %v1894_v1, 4 }
0x1b55   :  { %v1899_v11 = vsel %vm122_vm0, %v1897_v7, %v1898_v9  ;;  %vm2276_vm0 = vcmask 1042432  }
0x1b56   :  { %3777 = vmatmul.mubr.msk.f32.vlgmr.msra.gmra.mrb[14].mxu0 %vm291_vm14, %v1899_v11 }
0x1b57   :  { %3992 = vmatpush3.bf16.msra.mxu0 %v4516_v35  ;;  %3798 = vmatprep.mubr.msk.f32.mxu0 %vm4172_vm1, %v5543_v0 }
0x1b58   :  { %3993 = vmatprep.subr.bf16.mxu0 %v5541_v32 }
0x1b5b   :  { %3995 = vmatpush3.bf16.msra.mxu0 %v4522_v45 }
0x1b5c   :  { %4002 = vmatprep.subr.bf16.mxu0 %v5541_v32 }
0x1c29   :  { %v1968_v12 = vpop.f32.mrb[14].mxu0 }
0x1c2a   :  { %v1969_v33 = vadd.f32 %v1968_v12, %v4415_v14  ;;  %v3778_v16 = vpop.f32.mrb[15].mxu0 }
0x1c2c   :  { %v3468_v10 = vmul.f32 -1.442695, %v1969_v33 }
0x1c2e   :  { %4111 = vpow2.f32 %v3468_v10 }
0x1c38   :  { %v4112_v17 = vpop.eup %4111 }
0x1c39   :  { %v1975_v26 = vadd.f32 1.0, %v4112_v17 }
0x1c3b   :  { %4113 = vrcp.f32 %v1975_v26 }
0x1c45   :  { %v4114_v21 = vpop.eup %4113 }
0x1c46   :  { %v1978_v40 = vmul.f32 2.0, %v4114_v21  ;;  %v1980_v50 = vmul.f32 %v4114_v21, %v4830_v28 }
0x1c48   :  { %v3469_v48 = vadd.f32 -1.0, %v1978_v40 }
0x1c4a   :  { %1982 = vrot.lane.b32.xlu1 %v3469_v48, %s4178_s22 }
0x1cbc   :  { %v1983_v43 = vpop.permute.xlu1 %1982 }
0x1cbd   :  { %v1985_v47 = vmul.f32 %v4114_v21, %v1983_v43 }
0x1cbf   :  { %1987 = vrot.lane.b32.xlu0 %v1985_v47, %s4176_s23 }
0x1d31   :  { %v1988_v55 = vpop.permute.xlu0 %1987 }
0x1d32   :  { %v4930_v46 = vadd.f32 %v1988_v55, %v1980_v50 }
0x1d34   :  { %4115 = vtanh.f32 %v4930_v46 }
0x1d3e   :  { %v4116_v25 = vpop.eup %4115 }
0x1d3f   :  { %1993 = vrot.lane.b32.xlu1 %v4116_v25, %s4178_s22 }
0x1db1   :  { %v1994_v62 = vpop.permute.xlu1 %1993 }
0x1db2   :  { %v4934_v20 = vmul.f32 %v4114_v21, %v1994_v62 }
0x1db4   :  { %1998 = vrot.lane.b32.xlu0 %v4934_v20, %s4176_s23 }
0x1e26   :  { %v1999_v22 = vpop.permute.xlu0 %1998 }
0x1e27   :  { %3788 = vmatmul.mubr.msk.f32.vlgmr.msra.gmra.mrb[12].mxu1 %vm402_vm15, %v1999_v22 }
0x1e28   :  { %3998 = vmatpush3.bf16.msra.mxu1 %v4324_v41  ;;  %3811 = vmatprep.mubr.msk.f32.mxu1 %vm4172_vm1, %v5543_v0 }
0x1e29   :  { %3999 = vmatprep.subr.bf16.mxu1 %v5541_v32 }
0x1e2c   :  { %4001 = vmatpush3.bf16.msra.mxu1 %v4327_v42 }
0x1e2d   :  { %3809 = vmatprep.subr.mxu1 %v5543_v0 }
0x1e30   :  { %3810 = vmatpush3.msra.mxu1 %v4336_v44 }
0x1e31   :  { %4008 = vmatprep.subr.bf16.mxu1 %v5541_v32 }
0x1efa   :  { %v2068_v28 = vpop.f32.mrb[12].mxu1 }
0x1efb   :  { %v2069_v56 = vadd.f32 %v4950_v18, %v2068_v28  ;;  %v3789_v27 = vpop.f32.mrb[13].mxu1 }
0x1efd   :  { %4117 = vtanh.f32 %v2069_v56 }
0x1f07   :  { %v4118_v23 = vpop.eup %4117 }
0x1f08   :  { %v2074_v29 = vrot.slane %v4118_v23, 4  ;;  %v2075_v37 = vrot.slane %v4118_v23, 5  ;;  %v2076_v52 = vrot.slane %v4118_v23, 6  ;;  %v2077_v1 = vrot.slane %v4118_v23, 7 }
0x1f09   :  { %v2078_v7 = vrot.slane %v4118_v23, 1  ;;  %v2079_v9 = vrot.slane %v4118_v23, 2  ;;  %v2080_v11 = vrot.slane %v4118_v23, 3  ;;  %v2093_v55 = vmul.f32 %v4118_v23, %v4489_v6  ;;  %v4972_v23 = vld [vmem:[%s5537_s3] sm:$0xff] }
0x1f0a   :  { %v2089_v12 = vmul.f32 %v2074_v29, %v4485_v2  ;;  %v2090_v33 = vmul.f32 %v2075_v37, %v4482_v61  ;;  %v2091_v16 = vmul.f32 %v2076_v52, %v4480_v58  ;;  %v2092_v10 = vmul.f32 %v2077_v1, %v4487_v4 }
0x1f0b   :  { %v2094_v17 = vmul.f32 %v2078_v7, %v4491_v8  ;;  %v2095_v48 = vmul.f32 %v2079_v9, %v4503_v24  ;;  %v2096_v43 = vmul.f32 %v2080_v11, %v4513_v31  ;;  %v2202_v1 = vrot.slane %v4972_v23, 4  ;;  %v4978_v7 = vld [vmem:[%s5537_s3 + $0x8] sm:$0xff]  ;;  %v4984_v11 = vld [vmem:[%s5537_s3 + $0x10] sm:$0xff] }
0x1f0c   :  { %v2105_v26 = vrot.slane %v2089_v12, 4  ;;  %v2106_v21 = vrot.slane %v2090_v33, 3  ;;  %v2108_v40 = vrot.slane %v2091_v16, 2  ;;  %v2110_v50 = vrot.slane %v2092_v10, 1  ;;  %v4990_v33 = vld [vmem:[%s5537_s3 + $0x18] sm:$0xff] }
0x1f0d   :  { %v2113_v22 = vrot.slane %v2094_v17, 7  ;;  %v2115_v56 = vrot.slane %v2095_v48, 6  ;;  %v2117_v29 = vrot.slane %v2096_v43, 5  ;;  %v2203_v9 = vrot.slane %v4978_v7, 3  ;;  %v4997_v17 = vld [vmem:[%s5537_s3 + $0x28] sm:$0xff] }
0x1f0e   :  { %v2107_v47 = vsel %vm257_vm6, %v2106_v21, %v2105_v26  ;;  %v2205_v12 = vrot.slane %v4984_v11, 2  ;;  %v2207_v16 = vrot.slane %v4990_v33, 1  ;;  %v2210_v26 = vrot.slane %v4997_v17, 7 }
0x1f0f   :  { %v2109_v25 = vsel %vm260_vm7, %v2108_v40, %v2107_v47  ;;  %v2204_v10 = vsel %vm257_vm6, %v2203_v9, %v2202_v1  ;;  %v5004_v40 = vld [vmem:[%s5537_s3 + $0x30] sm:$0xff]  ;;  %v5011_v47 = vld [vmem:[%s5537_s3 + $0x38] sm:$0xff] }
0x1f10   :  { %v2111_v62 = vsel %vm263_vm8, %v2110_v50, %v2109_v25  ;;  %v2206_v21 = vsel %vm260_vm7, %v2205_v12, %v2204_v10  ;;  %v2212_v48 = vrot.slane %v5004_v40, 6  ;;  %v2214_v50 = vrot.slane %v5011_v47, 5 }
0x1f11   :  { %v2112_v28 = vsel %vm266_vm9, %v2093_v55, %v2111_v62  ;;  %v2208_v43 = vsel %vm263_vm8, %v2207_v16, %v2206_v21  ;;  %v5017_v55 = vld [vmem:[%s5537_s3 + $0x20] sm:$0xff] }
0x1f12   :  { %v2114_v27 = vsel %vm269_vm10, %v2113_v22, %v2112_v28  ;;  %v2209_v25 = vsel %vm266_vm9, %v5017_v55, %v2208_v43 }
0x1f13   :  { %v2116_v37 = vsel %vm272_vm11, %v2115_v56, %v2114_v27  ;;  %v2211_v62 = vsel %vm269_vm10, %v2210_v26, %v2209_v25 }
0x1f14   :  { %v2118_v52 = vsel %vm275_vm12, %v2117_v29, %v2116_v37  ;;  %v2213_v22 = vsel %vm272_vm11, %v2212_v48, %v2211_v62  ;;  %v2255_v62 = vsel %vm257_vm6, %v4375_v60, %v4368_v57 }
0x1f15   :  { %2119 = vrot.lane.b32.xlu1 %v2118_v52, %s4180_s11  ;;  %v2215_v28 = vsel %vm275_vm12, %v2214_v50, %v2213_v22  ;;  %v2256_v22 = vsel %vm260_vm7, %v4382_v63, %v2255_v62 }
0x1f19   :  { %2216 = vrot.lane.b32.xlu1 %v2215_v28, %s4181_s5  ;;  %v2253_v28 = vsel %vm272_vm11, %v4350_v51, %v4898_v59 }
0x1f87   :  { %v2120_v56 = vpop.permute.xlu1 %2119 }
0x1f88   :  { %v2122_v27 = vadd.f32 %v2120_v56, %v4934_v20  ;;  %v5037_v20 = vld [vmem:[%s5538_s12] ss:$0 sm:$0xff]  ;;  %v2257_v56 = vsel %vm263_vm8, %v4389_v3, %v2256_v22 }
0x1f8a   :  { %2124 = vrot.lane.b32.xlu0 %v2122_v27, %s4176_s23  ;;  %v2266_v48 = vrot.slane %v2122_v27, 3  ;;  %v2254_v27 = vsel %vm275_vm12, %v4360_v54, %v2253_v28 }
0x1f8b   :  { %v2217_v10 = vpop.permute.xlu1 %2216 }
0x1ffc   :  { %v2125_v29 = vpop.permute.xlu0 %2124 }
0x1ffd   :  { %3799 = vmatmul.mubr.msk.f32.vlgmr.msra.gmra.mrb[16].mxu0 %vm402_vm15, %v2125_v29  ;;  %v2258_v29 = vsel %vm266_vm9, %v4393_v5, %v2257_v56 }
0x1ffe   :  { %4004 = vmatpush3.bf16.msra.mxu0 %v4432_v34  ;;  %3822 = vmatprep.mubr.msk.f32.mxu0 %vm4172_vm1, %v5543_v0 }
0x1fff   :  { %4005 = vmatprep.subr.bf16.mxu0 %v5541_v32 }
0x2002   :  { %4007 = vmatpush3.bf16.msra.mxu0 %v4438_v36 }
0x2003   :  { %4014 = vmatprep.subr.bf16.mxu0 %v5541_v32 }
0x20d0   :  { %v2194_v37 = vpop.f32.mrb[16].mxu0 }
0x20d1   :  { %v2195_v52 = vadd.f32 %v5037_v20, %v2194_v37  ;;  %v3800_v1 = vpop.f32.mrb[17].mxu0 }
0x20d3   :  { %v2198_v9 = vmax.f32 %v2195_v52, -20.0 }
0x20d5   :  { %v5040_v12 = vmin.f32 %v2198_v9, 2.0 }
0x20d7   :  { %v2200_v16 = vmul.f32 1.442695, %v5040_v12 }
0x20d9   :  { %4119 = vpow2.f32 %v2200_v16 }
0x20e3   :  { %v4120_v26 = vpop.eup %4119 }
0x20e4   :  { %v2219_v21 = vmul.f32 %v4120_v26, %v2217_v10 }
0x20e6   :  { %2221 = vrot.lane.b32.xlu0 %v2219_v21, %s4182_s2 }
0x20ea   :  { %2267 = vrot.lane.b32.xlu0 %v2266_v48, %s4183_s9 }
0x2158   :  { %v2222_v43 = vpop.permute.xlu0 %2221 }
0x2159   :  { %v5045_v50 = vadd.f32 %v2222_v43, %v2195_v52 }
0x215b   :  { %5551 = vst [vmem:[#allocation4_spill] sm:$0xff] %v5045_v50  ;;  %v2262_v25 = vrot.slane %v5045_v50, 3 }
0x215c   :  { %v2268_v52 = vpop.permute.xlu0 %2267 }
0x215d   :  { %2263 = vrot.lane.b32.xlu1 %v2262_v25, %s4181_s5 }
0x21cf   :  { %v2264_v37 = vpop.permute.xlu1 %2263 }
0x21d0   :  { %v2270_v1 = vsel %vm119_vm2, %v2254_v27, %v2264_v37  ;;  %v2271_v9 = vsel %vm119_vm2, %v2258_v29, %v2264_v37 }
0x21d1   :  { %v2272_v16 = vsel %vm283_vm13, %v2270_v1, %v2268_v52  ;;  %v2273_v10 = vsel %vm283_vm13, %v2271_v9, %v2268_v52 }
0x21d2   :  { %v2277_v26 = vrot.slane %v2272_v16, 5  ;;  %v2278_v21 = vrot.slane %v2273_v10, 5 }
0x21d4   :  { %v2279_v48 = vsel %vm2276_vm0, %v2277_v26, %v2278_v21 }
0x21d5   :  { %3812 = vmatmul.mubr.msk.f32.vlgmr.msra.gmra.mrb[14].mxu1 %vm291_vm14, %v2279_v48 }
0x21d6   :  { %4010 = vmatpush3.bf16.msra.mxu1 %v4516_v35  ;;  %3833 = vmatprep.mubr.msk.f32.mxu1 %vm4172_vm1, %v5543_v0 }
0x21d7   :  { %4011 = vmatprep.subr.bf16.mxu1 %v5541_v32 }
0x21da   :  { %4013 = vmatpush3.bf16.msra.mxu1 %v4522_v45 }
0x21db   :  { %4020 = vmatprep.subr.bf16.mxu1 %v5541_v32 }
0x22a8   :  { %v2348_v43 = vpop.f32.mrb[14].mxu1 }
0x22a9   :  { %v2349_v25 = vadd.f32 %v2348_v43, %v4415_v14  ;;  %v3813_v62 = vpop.f32.mrb[15].mxu1 }
0x22ab   :  { %v3474_v22 = vmul.f32 -1.442695, %v2349_v25 }
0x22ad   :  { %4121 = vpow2.f32 %v3474_v22 }
0x22b7   :  { %v4122_v28 = vpop.eup %4121 }
0x22b8   :  { %v2355_v56 = vadd.f32 1.0, %v4122_v28 }
0x22ba   :  { %4123 = vrcp.f32 %v2355_v56 }
0x22c4   :  { %v4124_v27 = vpop.eup %4123 }
0x22c5   :  { %v2358_v29 = vmul.f32 2.0, %v4124_v27  ;;  %v2360_v9 = vmul.f32 %v4124_v27, %v4930_v46 }
0x22c7   :  { %v3475_v37 = vadd.f32 -1.0, %v2358_v29 }
0x22c9   :  { %2362 = vrot.lane.b32.xlu1 %v3475_v37, %s4178_s22 }
0x233b   :  { %v2363_v52 = vpop.permute.xlu1 %2362 }
0x233c   :  { %v2365_v1 = vmul.f32 %v4124_v27, %v2363_v52 }
0x233e   :  { %2367 = vrot.lane.b32.xlu0 %v2365_v1, %s4176_s23 }
0x23b0   :  { %v2368_v16 = vpop.permute.xlu0 %2367 }
0x23b1   :  { %v5078_v10 = vadd.f32 %v2368_v16, %v2360_v9 }
0x23b3   :  { %4125 = vtanh.f32 %v5078_v10 }
0x23bd   :  { %v4126_v26 = vpop.eup %4125 }
0x23be   :  { %2373 = vrot.lane.b32.xlu1 %v4126_v26, %s4178_s22 }
0x2430   :  { %v2374_v21 = vpop.permute.xlu1 %2373 }
0x2431   :  { %v2376_v48 = vmul.f32 %v4124_v27, %v2374_v21 }
0x2433   :  { %2378 = vrot.lane.b32.xlu0 %v2376_v48, %s4176_s23 }
0x24a5   :  { %v2379_v43 = vpop.permute.xlu0 %2378 }
0x24a6   :  { %3823 = vmatmul.mubr.msk.f32.vlgmr.msra.gmra.mrb[18].mxu0 %vm402_vm15, %v2379_v43 }
0x24a7   :  { %4016 = vmatpush3.bf16.msra.mxu0 %v4324_v41  ;;  %3846 = vmatprep.mubr.msk.f32.mxu0 %vm4172_vm1, %v5543_v0 }
0x24a8   :  { %4017 = vmatprep.subr.bf16.mxu0 %v5541_v32 }
0x24ab   :  { %4019 = vmatpush3.bf16.msra.mxu0 %v4327_v42 }
0x24ac   :  { %3844 = vmatprep.subr.mxu0 %v5543_v0 }
0x24af   :  { %3845 = vmatpush3.msra.mxu0 %v4336_v44 }
0x24b0   :  { %4026 = vmatprep.subr.bf16.mxu0 %v5541_v32 }
0x2579   :  { %v2448_v46 = vpop.f32.mrb[18].mxu0 }
0x257a   :  { %v2449_v25 = vadd.f32 %v4950_v18, %v2448_v46  ;;  %v3824_v62 = vpop.f32.mrb[19].mxu0 }
0x257c   :  { %4127 = vtanh.f32 %v2449_v25 }
0x2586   :  { %v4128_v22 = vpop.eup %4127 }
0x2587   :  { %v2454_v28 = vrot.slane %v4128_v22, 3  ;;  %v2455_v56 = vrot.slane %v4128_v22, 4  ;;  %v2456_v27 = vrot.slane %v4128_v22, 5  ;;  %v2457_v29 = vrot.slane %v4128_v22, 6 }
0x2588   :  { %v2458_v37 = vrot.slane %v4128_v22, 7  ;;  %v2459_v52 = vrot.slane %v4128_v22, 1  ;;  %v2460_v1 = vrot.slane %v4128_v22, 2 }
0x2589   :  { %v2469_v9 = vmul.f32 %v2454_v28, %v4485_v2  ;;  %v2470_v16 = vmul.f32 %v2455_v56, %v4482_v61  ;;  %v2471_v26 = vmul.f32 %v2456_v27, %v4480_v58  ;;  %v2472_v21 = vmul.f32 %v2457_v29, %v4487_v4 }
0x258a   :  { %v2473_v43 = vmul.f32 %v2458_v37, %v4489_v6  ;;  %v2475_v32 = vmul.f32 %v2459_v52, %v4503_v24  ;;  %v2476_v0 = vmul.f32 %v2460_v1, %v4513_v31  ;;  %v2474_v56 = vmul.f32 %v4128_v22, %v4491_v8 }
0x258b   :  { %v2485_v46 = vrot.slane %v2469_v9, 5  ;;  %v2486_v25 = vrot.slane %v2470_v16, 4  ;;  %v2488_v62 = vrot.slane %v2471_v26, 3  ;;  %v2490_v50 = vrot.slane %v2472_v21, 2 }
0x258c   :  { %v2492_v53 = vrot.slane %v2473_v43, 1  ;;  %v2495_v37 = vrot.slane %v2475_v32, 7  ;;  %v2497_v16 = vrot.slane %v2476_v0, 6  ;;  %v2582_v26 = vrot.slane %v4972_v23, 5 }
0x258d   :  { %v2487_v15 = vsel %vm257_vm6, %v2486_v25, %v2485_v46  ;;  %v2585_v22 = vrot.slane %v4984_v11, 3  ;;  %v2592_v21 = vrot.slane %v5004_v40, 7  ;;  %v2594_v46 = vrot.slane %v5011_v47, 6 }
0x258e   :  { %v2489_v28 = vsel %vm260_vm7, %v2488_v62, %v2487_v15  ;;  %v2583_v15 = vrot.slane %v4978_v7, 4 }
0x258f   :  { %v2491_v27 = vsel %vm263_vm8, %v2490_v50, %v2489_v28  ;;  %v2587_v50 = vrot.slane %v4990_v33, 2 }
0x2590   :  { %v2493_v29 = vsel %vm266_vm9, %v2492_v53, %v2491_v27  ;;  %v2589_v53 = vrot.slane %v5017_v55, 1  ;;  %v2584_v32 = vsel %vm257_vm6, %v2583_v15, %v2582_v26 }
0x2591   :  { %v2494_v9 = vsel %vm269_vm10, %v2474_v56, %v2493_v29  ;;  %v2586_v0 = vsel %vm260_vm7, %v2585_v22, %v2584_v32 }
0x2592   :  { %v2496_v52 = vsel %vm272_vm11, %v2495_v37, %v2494_v9  ;;  %v2588_v43 = vsel %vm263_vm8, %v2587_v50, %v2586_v0  ;;  %v5552_v9 = vmov 0.0  }
0x2593   :  { %v2498_v1 = vsel %vm275_vm12, %v2497_v16, %v2496_v52  ;;  %v2590_v25 = vsel %vm266_vm9, %v2589_v53, %v2588_v43  ;;  %v5553_v16 = vmov 0.0|0.0  }
0x2594   :  { %2499 = vrot.lane.b32.xlu1 %v2498_v1, %s4180_s11  ;;  %v2591_v62 = vsel %vm269_vm10, %v4997_v17, %v2590_v25  ;;  %v2634_v25 = vsel %vm257_vm6, %v4368_v57, %v4360_v54 }
0x2595   :  { %v2593_v28 = vsel %vm272_vm11, %v2592_v21, %v2591_v62  ;;  %v2635_v62 = vsel %vm260_vm7, %v4375_v60, %v2634_v25 }
0x2596   :  { %v2595_v56 = vsel %vm275_vm12, %v2594_v46, %v2593_v28  ;;  %v2636_v28 = vsel %vm263_vm8, %v4382_v63, %v2635_v62 }
0x2598   :  { %2596 = vrot.lane.b32.xlu1 %v2595_v56, %s4181_s5  ;;  %v2637_v56 = vsel %vm266_vm9, %v4389_v3, %v2636_v28 }
0x2606   :  { %v2500_v27 = vpop.permute.xlu1 %2499 }
0x2607   :  { %v2502_v29 = vadd.f32 %v2500_v27, %v2376_v48  ;;  %v2633_v27 = vsel %vm275_vm12, %v4350_v51, %v4898_v59 }
0x2609   :  { %2504 = vrot.lane.b32.xlu0 %v2502_v29, %s4176_s23  ;;  %v2646_v0 = vrot.slane %v2502_v29, 2  ;;  %v2638_v29 = vsel %vm269_vm10, %v4393_v5, %v2637_v56 }
0x260a   :  { %v2597_v50 = vpop.permute.xlu1 %2596 }
0x267b   :  { %v2505_v37 = vpop.permute.xlu0 %2504 }
0x267c   :  { %3834 = vmatmul.mubr.msk.f32.vlgmr.msra.gmra.mrb[16].mxu1 %vm402_vm15, %v2505_v37 }
0x267d   :  { %4022 = vmatpush3.bf16.msra.mxu1 %v4432_v34  ;;  %3857 = vmatprep.mubr.msk.f32.mxu1 %vm4172_vm1, %v5552_v9 }
0x267e   :  { %4023 = vmatprep.subr.bf16.mxu1 %v5553_v16 }
0x2681   :  { %4025 = vmatpush3.bf16.msra.mxu1 %v4438_v36 }
0x2682   :  { %4032 = vmatprep.subr.bf16.mxu1 %v5553_v16 }
0x274f   :  { %v2574_v52 = vpop.f32.mrb[16].mxu1 }
0x2750   :  { %v2575_v1 = vadd.f32 %v5037_v20, %v2574_v52  ;;  %v3835_v48 = vpop.f32.mrb[17].mxu1 }
0x2752   :  { %v2578_v26 = vmax.f32 %v2575_v1, -20.0 }
0x2754   :  { %v5134_v15 = vmin.f32 %v2578_v26, 2.0 }
0x2756   :  { %v2580_v22 = vmul.f32 1.442695, %v5134_v15 }
0x2758   :  { %4129 = vpow2.f32 %v2580_v22 }
0x2762   :  { %v4130_v53 = vpop.eup %4129 }
0x2763   :  { %v2599_v32 = vmul.f32 %v4130_v53, %v2597_v50 }
0x2765   :  { %2601 = vrot.lane.b32.xlu0 %v2599_v32, %s4182_s2 }
0x2769   :  { %2647 = vrot.lane.b32.xlu0 %v2646_v0, %s4183_s9 }
0x27d7   :  { %v2602_v21 = vpop.permute.xlu0 %2601 }
0x27d8   :  { %v5139_v43 = vadd.f32 %v2602_v21, %v2575_v1 }
0x27da   :  { %5554 = vst [vmem:[#allocation5_spill] sm:$0xff] %v5139_v43  ;;  %v2642_v46 = vrot.slane %v5139_v43, 2 }
0x27db   :  { %v2648_v52 = vpop.permute.xlu0 %2647 }
0x27dc   :  { %2643 = vrot.lane.b32.xlu1 %v2642_v46, %s4181_s5 }
0x284e   :  { %v2644_v37 = vpop.permute.xlu1 %2643 }
0x284f   :  { %v2650_v1 = vsel %vm119_vm2, %v2633_v27, %v2644_v37  ;;  %v2651_v48 = vsel %vm119_vm2, %v2638_v29, %v2644_v37 }
0x2850   :  { %v2652_v26 = vsel %vm283_vm13, %v2650_v1, %v2648_v52  ;;  %v2653_v22 = vsel %vm283_vm13, %v2651_v48, %v2648_v52 }
0x2851   :  { %v2657_v50 = vrot.slane %v2652_v26, 6  ;;  %v2658_v53 = vrot.slane %v2653_v22, 6 }
0x2853   :  { %v2659_v32 = vsel %vm2656_vm3, %v2657_v50, %v2658_v53 }
0x2854   :  { %3847 = vmatmul.mubr.msk.f32.vlgmr.msra.gmra.mrb[20].mxu0 %vm291_vm14, %v2659_v32 }
0x2855   :  { %4028 = vmatpush3.bf16.msra.mxu0 %v4516_v35  ;;  %3868 = vmatprep.mubr.msk.f32.mxu0 %vm4172_vm1, %v5552_v9 }
0x2856   :  { %4029 = vmatprep.subr.bf16.mxu0 %v5553_v16 }
0x2859   :  { %4031 = vmatpush3.bf16.msra.mxu0 %v4522_v45 }
0x285a   :  { %4038 = vmatprep.subr.bf16.mxu0 %v5553_v16 }
0x2927   :  { %v2728_v0 = vpop.f32.mrb[20].mxu0 }
0x2928   :  { %v2729_v21 = vadd.f32 %v2728_v0, %v4415_v14  ;;  %v3848_v46 = vpop.f32.mrb[21].mxu0 }
0x292a   :  { %v3480_v25 = vmul.f32 -1.442695, %v2729_v21 }
0x292c   :  { %4131 = vpow2.f32 %v3480_v25 }
0x2936   :  { %v4132_v62 = vpop.eup %4131 }
0x2937   :  { %v2735_v28 = vadd.f32 1.0, %v4132_v62 }
0x2939   :  { %4133 = vrcp.f32 %v2735_v28 }
0x2943   :  { %v4134_v56 = vpop.eup %4133 }
0x2944   :  { %v2738_v27 = vmul.f32 2.0, %v4134_v56  ;;  %v2740_v1 = vmul.f32 %v4134_v56, %v5078_v10 }
0x2946   :  { %v3481_v29 = vadd.f32 -1.0, %v2738_v27 }
0x2948   :  { %2742 = vrot.lane.b32.xlu1 %v3481_v29, %s4178_s22 }
0x29ba   :  { %v2743_v37 = vpop.permute.xlu1 %2742 }
0x29bb   :  { %v2745_v52 = vmul.f32 %v4134_v56, %v2743_v37 }
0x29bd   :  { %2747 = vrot.lane.b32.xlu0 %v2745_v52, %s4176_s23 }
0x2a2f   :  { %v2748_v48 = vpop.permute.xlu0 %2747 }
0x2a30   :  { %v5172_v26 = vadd.f32 %v2748_v48, %v2740_v1 }
0x2a32   :  { %4135 = vtanh.f32 %v5172_v26 }
0x2a3c   :  { %v4136_v22 = vpop.eup %4135 }
0x2a3d   :  { %2753 = vrot.lane.b32.xlu1 %v4136_v22, %s4178_s22 }
0x2aaf   :  { %v2754_v50 = vpop.permute.xlu1 %2753 }
0x2ab0   :  { %v2756_v53 = vmul.f32 %v4134_v56, %v2754_v50 }
0x2ab2   :  { %2758 = vrot.lane.b32.xlu0 %v2756_v53, %s4176_s23 }
0x2b24   :  { %v2759_v32 = vpop.permute.xlu0 %2758 }
0x2b25   :  { %3858 = vmatmul.mubr.msk.f32.vlgmr.msra.gmra.mrb[18].mxu1 %vm402_vm15, %v2759_v32 }
0x2b26   :  { %4034 = vmatpush3.bf16.msra.mxu1 %v4324_v41  ;;  %3881 = vmatprep.mubr.msk.f32.mxu1 %vm4172_vm1, %v5552_v9 }
0x2b27   :  { %4035 = vmatprep.subr.bf16.mxu1 %v5553_v16 }
0x2b2a   :  { %4037 = vmatpush3.bf16.msra.mxu1 %v4327_v42 }
0x2b2b   :  { %3879 = vmatprep.subr.mxu1 %v5552_v9 }
0x2b2e   :  { %3880 = vmatpush3.msra.mxu1 %v4336_v44 }
0x2b2f   :  { %4044 = vmatprep.subr.bf16.mxu1 %v5553_v16 }
0x2bf8   :  { %v2828_v10 = vpop.f32.mrb[18].mxu1 }
0x2bf9   :  { %v2829_v0 = vadd.f32 %v4950_v18, %v2828_v10  ;;  %v3859_v21 = vpop.f32.mrb[19].mxu1 }
0x2bfb   :  { %4137 = vtanh.f32 %v2829_v0 }
0x2c05   :  { %v4138_v46 = vpop.eup %4137 }
0x2c06   :  { %v2834_v41 = vrot.slane %v4138_v46, 2  ;;  %v2835_v25 = vrot.slane %v4138_v46, 3  ;;  %v2836_v62 = vrot.slane %v4138_v46, 4  ;;  %v2837_v28 = vrot.slane %v4138_v46, 5 }
0x2c07   :  { %v2838_v56 = vrot.slane %v4138_v46, 6  ;;  %v2839_v27 = vrot.slane %v4138_v46, 7  ;;  %v2840_v29 = vrot.slane %v4138_v46, 1 }
0x2c08   :  { %v2849_v42 = vmul.f32 %v2834_v41, %v4485_v2  ;;  %v2850_v37 = vmul.f32 %v2835_v25, %v4482_v61  ;;  %v2851_v44 = vmul.f32 %v2836_v62, %v4480_v58  ;;  %v2852_v52 = vmul.f32 %v2837_v28, %v4487_v4 }
0x2c09   :  { %v2853_v1 = vmul.f32 %v2838_v56, %v4489_v6  ;;  %v2854_v48 = vmul.f32 %v2839_v27, %v4491_v8  ;;  %v2856_v10 = vmul.f32 %v2840_v29, %v4513_v31  ;;  %v2855_v28 = vmul.f32 %v4138_v46, %v4503_v24 }
0x2c0a   :  { %v2865_v22 = vrot.slane %v2849_v42, 6  ;;  %v2866_v50 = vrot.slane %v2850_v37, 5  ;;  %v2868_v32 = vrot.slane %v2851_v44, 4  ;;  %v2870_v21 = vrot.slane %v2852_v52, 3 }
0x2c0b   :  { %v2872_v43 = vrot.slane %v2853_v1, 2  ;;  %v2874_v62 = vrot.slane %v2854_v48, 1  ;;  %v2877_v42 = vrot.slane %v2856_v10, 7  ;;  %v2962_v44 = vrot.slane %v4972_v23, 6 }
0x2c0c   :  { %v2867_v0 = vsel %vm257_vm6, %v2866_v50, %v2865_v22  ;;  %v2963_v52 = vrot.slane %v4978_v7, 5  ;;  %v2965_v1 = vrot.slane %v4984_v11, 4  ;;  %v2967_v48 = vrot.slane %v4990_v33, 3 }
0x2c0d   :  { %v2869_v41 = vsel %vm260_vm7, %v2868_v32, %v2867_v0  ;;  %v2969_v46 = vrot.slane %v5017_v55, 2  ;;  %v2971_v22 = vrot.slane %v4997_v17, 1  ;;  %v2974_v10 = vrot.slane %v5011_v47, 7 }
0x2c0e   :  { %v2871_v25 = vsel %vm263_vm8, %v2870_v21, %v2869_v41 }
0x2c0f   :  { %v2873_v56 = vsel %vm266_vm9, %v2872_v43, %v2871_v25  ;;  %v2964_v43 = vsel %vm257_vm6, %v2963_v52, %v2962_v44 }
0x2c10   :  { %v2875_v27 = vsel %vm269_vm10, %v2874_v62, %v2873_v56  ;;  %v2966_v50 = vsel %vm260_vm7, %v2965_v1, %v2964_v43  ;;  %v3013_v43 = vsel %vm257_vm6, %v4360_v54, %v4350_v51 }
0x2c11   :  { %v2876_v37 = vsel %vm272_vm11, %v2855_v28, %v2875_v27  ;;  %v2968_v32 = vsel %vm263_vm8, %v2967_v48, %v2966_v50 }
0x2c12   :  { %v2878_v29 = vsel %vm275_vm12, %v2877_v42, %v2876_v37  ;;  %v2970_v0 = vsel %vm266_vm9, %v2969_v46, %v2968_v32 }
0x2c13   :  { %2879 = vrot.lane.b32.xlu1 %v2878_v29, %s4180_s11  ;;  %v2972_v21 = vsel %vm269_vm10, %v2971_v22, %v2970_v0  ;;  %v3014_v22 = vsel %vm260_vm7, %v4368_v57, %v3013_v43 }
0x2c14   :  { %v2973_v41 = vsel %vm272_vm11, %v5004_v40, %v2972_v21  ;;  %v3015_v50 = vsel %vm263_vm8, %v4375_v60, %v3014_v22  ;;  %v684_v22 = vmul.f32 0.5, %v4972_v23 }
0x2c15   :  { %v2975_v25 = vsel %vm275_vm12, %v2974_v10, %v2973_v41  ;;  %v3016_v32 = vsel %vm266_vm9, %v4382_v63, %v3015_v50 }
0x2c16   :  { %v3017_v10 = vsel %vm269_vm10, %v4389_v3, %v3016_v32  ;;  %v687_v32 = vmul.f32 0.5, %v4990_v33 }
0x2c17   :  { %2976 = vrot.lane.b32.xlu1 %v2975_v25, %s4181_s5  ;;  %v3018_v0 = vsel %vm272_vm11, %v4393_v5, %v3017_v10 }
0x2c85   :  { %v2880_v62 = vpop.permute.xlu1 %2879 }
0x2c86   :  { %v2882_v28 = vadd.f32 %v2880_v62, %v2756_v53 }
0x2c88   :  { %2884 = vrot.lane.b32.xlu0 %v2882_v28, %s4176_s23  ;;  %v3026_v48 = vrot.slane %v2882_v28, 1 }
0x2c89   :  { %v2977_v52 = vpop.permute.xlu1 %2976 }
0x2cfa   :  { %v2885_v56 = vpop.permute.xlu0 %2884 }
0x2cfb   :  { %3869 = vmatmul.mubr.msk.f32.vlgmr.msra.gmra.mrb[22].mxu0 %vm402_vm15, %v2885_v56 }
0x2cfc   :  { %4040 = vmatpush3.bf16.msra.mxu0 %v4432_v34  ;;  %3892 = vmatprep.mubr.msk.f32.mxu0 %vm4172_vm1, %v5552_v9 }
0x2cfd   :  { %4041 = vmatprep.subr.bf16.mxu0 %v5553_v16 }
0x2d00   :  { %4043 = vmatpush3.bf16.msra.mxu0 %v4438_v36 }
0x2dce   :  { %v2954_v27 = vpop.f32.mrb[22].mxu0 }
0x2dcf   :  { %v2955_v42 = vadd.f32 %v5037_v20, %v2954_v27  ;;  %v3870_v37 = vpop.f32.mrb[23].mxu0 }
0x2dd1   :  { %v2958_v29 = vmax.f32 %v2955_v42, -20.0 }
0x2dd3   :  { %v5227_v53 = vmin.f32 %v2958_v29, 2.0 }
0x2dd5   :  { %v2960_v44 = vmul.f32 1.442695, %v5227_v53 }
0x2dd7   :  { %4139 = vpow2.f32 %v2960_v44 }
0x2de1   :  { %v4140_v1 = vpop.eup %4139 }
0x2de2   :  { %v2979_v34 = vmul.f32 %v4140_v1, %v2977_v52 }
0x2de4   :  { %2981 = vrot.lane.b32.xlu0 %v2979_v34, %s4182_s2 }
0x2de8   :  { %3027 = vrot.lane.b32.xlu0 %v3026_v48, %s4183_s9  ;;  %v685_v48 = vmul.f32 0.5, %v4978_v7 }
0x2dea   :  { %v5275_v50 = vmul.f32 %v4978_v7, %v685_v48  ;;  %v689_v7 = vmul.f32 0.5, %v4997_v17 }
0x2e56   :  { %v2982_v46 = vpop.permute.xlu0 %2981 }
0x2e57   :  { %v5232_v36 = vadd.f32 %v2982_v46, %v2955_v42 }
0x2e59   :  { %v3022_v20 = vrot.slane %v5232_v36, 1 }
0x2e5a   :  { %v3028_v41 = vpop.permute.xlu0 %3027 }
0x2e5b   :  { %3023 = vrot.lane.b32.xlu1 %v3022_v20, %s4181_s5 }
0x2ecd   :  { %v3024_v21 = vpop.permute.xlu1 %3023 }
0x2ece   :  { %v3030_v51 = vsel %vm119_vm2, %v4898_v59, %v3024_v21  ;;  %v3031_v54 = vsel %vm119_vm2, %v3018_v0, %v3024_v21  ;;  %v688_v0 = vmul.f32 0.5, %v5017_v55  ;;  %v5283_v21 = vmul.f32 %v4972_v23, %v684_v22 }
0x2ecf   :  { %v3032_v57 = vsel %vm283_vm13, %v3030_v51, %v3028_v41  ;;  %v3033_v60 = vsel %vm283_vm13, %v3031_v54, %v3028_v41  ;;  %v708_v41 = vrot.slane %v5275_v50, 7 }
0x2ed0   :  { %v3037_v25 = vrot.slane %v3032_v57, 7  ;;  %v3038_v63 = vrot.slane %v3033_v60, 7  ;;  %v5292_v54 = vmul.f32 %v5017_v55, %v688_v0 }
0x2ed2   :  { %v3039_v62 = vsel %vm3036_vm4, %v3037_v25, %v3038_v63  ;;  %v690_v25 = vmul.f32 0.5, %v5004_v40  ;;  %v5301_v63 = vmul.f32 %v4997_v17, %v689_v7 }
0x2ed3   :  { %3882 = vmatmul.mubr.msk.f32.vlgmr.msra.gmra.mrb[20].mxu1 %vm291_vm14, %v3039_v62  ;;  %v714_v62 = vrot.slane %v5292_v54, 4 }
0x2ed4   :  { %4046 = vmatpush3.bf16.msra.mxu1 %v4516_v35  ;;  %3903 = vmatprep.mubr.msk.f32.mxu1 %vm4172_vm1, %v5552_v9  ;;  %vm3428_vm1 = vcmask 7168  }
0x2ed5   :  { %4047 = vmatprep.subr.bf16.mxu1 %v5553_v16 }
0x2ed8   :  { %4049 = vmatpush3.bf16.msra.mxu1 %v4522_v45 }
0x2fa6   :  { %v3108_v3 = vpop.f32.mrb[20].mxu1 }
0x2fa7   :  { %v3109_v5 = vadd.f32 %v3108_v3, %v4415_v14  ;;  %v3883_v59 = vpop.f32.mrb[21].mxu1 }
0x2fa9   :  { %v3486_v28 = vmul.f32 -1.442695, %v3109_v5 }
0x2fab   :  { %4141 = vpow2.f32 %v3486_v28 }
0x2fb5   :  { %v4142_v56 = vpop.eup %4141 }
0x2fb6   :  { %v3115_v27 = vadd.f32 1.0, %v4142_v56 }
0x2fb8   :  { %4143 = vrcp.f32 %v3115_v27 }
0x2fc2   :  { %v4144_v42 = vpop.eup %4143 }
0x2fc3   :  { %v3118_v37 = vmul.f32 2.0, %v4144_v42  ;;  %v3120_v45 = vmul.f32 %v4144_v42, %v5172_v26  ;;  %v686_v26 = vmul.f32 0.5, %v4984_v11 }
0x2fc5   :  { %v3487_v29 = vadd.f32 -1.0, %v3118_v37  ;;  %v5279_v10 = vmul.f32 %v4984_v11, %v686_v26  ;;  %v709_v11 = vsel %vm257_vm6, %v708_v41, %v5283_v21 }
0x2fc7   :  { %3122 = vrot.lane.b32.xlu1 %v3487_v29, %s4178_s22  ;;  %v710_v51 = vrot.slane %v5279_v10, 6 }
0x2fc9   :  { %v711_v23 = vsel %vm260_vm7, %v710_v51, %v709_v11  ;;  %v1088_v11 = vrot.slane %v5283_v21, 1 }
0x3039   :  { %v3123_v35 = vpop.permute.xlu1 %3122 }
0x303a   :  { %v3125_v9 = vmul.f32 %v4144_v42, %v3123_v35 }
0x303c   :  { %3127 = vrot.lane.b32.xlu0 %v3125_v9, %s4176_s23 }
0x30ae   :  { %v3128_v16 = vpop.permute.xlu0 %3127 }
0x30af   :  { %v3130_v44 = vadd.f32 %v3128_v16, %v3120_v45  ;;  %v5311_v45 = vmul.f32 %v5004_v40, %v690_v25  ;;  %v716_v16 = vrot.slane %v5301_v63, 3  ;;  %v1094_v25 = vrot.slane %v5292_v54, 5 }
0x30b1   :  { %4145 = vtanh.f32 %v3130_v44 }
0x30bb   :  { %v4146_v14 = vpop.eup %4145 }
0x30bc   :  { %3133 = vrot.lane.b32.xlu1 %v4146_v14, %s4178_s22 }
0x312e   :  { %v3134_v52 = vpop.permute.xlu1 %3133 }
0x312f   :  { %v5265_v1 = vmul.f32 %v4144_v42, %v3134_v52 }
0x3131   :  { %3138 = vrot.lane.b32.xlu0 %v5265_v1, %s4176_s23 }
0x31a3   :  { %v3139_v34 = vpop.permute.xlu0 %3138 }
0x31a4   :  { %3893 = vmatmul.mubr.msk.f32.vlgmr.msra.gmra.mrb[24].mxu0 %vm402_vm15, %v3139_v34 }
0x3277   :  { %v3208_v46 = vpop.f32.mrb[24].mxu0 }
0x3278   :  { %v3209_v20 = vadd.f32 %v4950_v18, %v3208_v46  ;;  %v3894_v43 = vpop.f32.mrb[25].mxu0  ;;  %v5287_v18 = vmul.f32 %v4990_v33, %v687_v32  ;;  %v691_v33 = vmul.f32 0.5, %v5011_v47  ;;  %v718_v46 = vrot.slane %v5311_v45, 2 }
0x327a   :  { %4147 = vtanh.f32 %v3209_v20  ;;  %v712_v57 = vrot.slane %v5287_v18, 5 }
0x327c   :  { %v713_v42 = vsel %vm263_vm8, %v712_v57, %v711_v23  ;;  %v1089_v57 = vsel %vm257_vm6, %v5275_v50, %v1088_v11  ;;  %v1092_v23 = vrot.slane %v5287_v18, 6 }
0x3284   :  { %v4148_v60 = vpop.eup %4147 }
0x3285   :  { %v3214_v3 = vrot.slane %v4148_v60, 1  ;;  %v3215_v55 = vrot.slane %v4148_v60, 2  ;;  %v3216_v5 = vrot.slane %v4148_v60, 3  ;;  %v3217_v59 = vrot.slane %v4148_v60, 4 }
0x3286   :  { %v3218_v28 = vrot.slane %v4148_v60, 5  ;;  %v3219_v56 = vrot.slane %v4148_v60, 6  ;;  %v3220_v27 = vrot.slane %v4148_v60, 7  ;;  %v3236_v22 = vmul.f32 %v4148_v60, %v4513_v31 }
0x3287   :  { %v3229_v37 = vmul.f32 %v3214_v3, %v4485_v2  ;;  %v3230_v29 = vmul.f32 %v3215_v55, %v4482_v61  ;;  %v3231_v35 = vmul.f32 %v3216_v5, %v4480_v58  ;;  %v3232_v17 = vmul.f32 %v3217_v59, %v4487_v4 }
0x3288   :  { %v3233_v9 = vmul.f32 %v3218_v28, %v4489_v6  ;;  %v3234_v44 = vmul.f32 %v3219_v56, %v4491_v8  ;;  %v3235_v2 = vmul.f32 %v3220_v27, %v4503_v24  ;;  %v715_v61 = vsel %vm266_vm9, %v714_v62, %v713_v42 }
0x3289   :  { %v3245_v14 = vrot.slane %v3229_v37, 7  ;;  %v3246_v52 = vrot.slane %v3230_v29, 6  ;;  %v3248_v34 = vrot.slane %v3231_v35, 5  ;;  %v3250_v48 = vrot.slane %v3232_v17, 4 }
0x328a   :  { %v5319_v4 = vmul.f32 %v5011_v47, %v691_v33  ;;  %v3252_v40 = vrot.slane %v3233_v9, 3  ;;  %v3254_v26 = vrot.slane %v3234_v44, 2  ;;  %v717_v20 = vsel %vm269_vm10, %v716_v16, %v715_v61 }
0x328b   :  { %v3247_v58 = vsel %vm257_vm6, %v3246_v52, %v3245_v14  ;;  %v3256_v43 = vrot.slane %v3235_v2, 1  ;;  %v719_v41 = vsel %vm272_vm11, %v718_v46, %v717_v20  ;;  %v1090_v31 = vrot.slane %v5279_v10, 7 }
0x328c   :  { %v3249_v6 = vsel %vm260_vm7, %v3248_v34, %v3247_v58  ;;  %v720_v47 = vrot.slane %v5319_v4, 1  ;;  %v1096_v62 = vrot.slane %v5301_v63, 4  ;;  %v682_v3 = vsub.f32 0.0, %v4604_v49 }
0x328d   :  { %v3251_v8 = vsel %vm263_vm8, %v3250_v48, %v3249_v6  ;;  %v1091_v60 = vsel %vm260_vm7, %v1090_v31, %v1089_v57  ;;  %v1098_v28 = vrot.slane %v5311_v45, 3  ;;  %v1100_v37 = vrot.slane %v5319_v4, 2 }
0x328e   :  { %v3253_v24 = vsel %vm266_vm9, %v3252_v40, %v3251_v8  ;;  %v721_v7 = vsel %vm275_vm12, %v720_v47, %v719_v41  ;;  %v1093_v33 = vsel %vm263_vm8, %v1092_v23, %v1091_v60  ;;  %v3448_v27 = vadd.f32 -0.9189385, %v682_v3 }
0x328f   :  { %v3255_v32 = vsel %vm269_vm10, %v3254_v26, %v3253_v24  ;;  %v1095_v55 = vsel %vm266_vm9, %v1094_v25, %v1093_v33  ;;  %v1469_v17 = vrot.slane %v5275_v50, 1  ;;  %v2227_v44 = vrot.slane %v5283_v21, 4 }
0x3290   :  { %v3257_v0 = vsel %vm272_vm11, %v3256_v43, %v3255_v32  ;;  %v1097_v56 = vsel %vm269_vm10, %v1096_v62, %v1095_v55  ;;  %v2228_v14 = vrot.slane %v5275_v50, 3  ;;  %v1086_v52 = vsub.f32 0.0, %v4698_v38 }
0x3291   :  { %v3258_v51 = vsel %vm275_vm12, %v3236_v22, %v3257_v0  ;;  %v1099_v35 = vsel %vm272_vm11, %v1098_v28, %v1097_v56  ;;  %v1472_v2 = vrot.slane %v5287_v18, 7  ;;  %v2230_v48 = vrot.slane %v5279_v10, 2 }
0x3292   :  { %3259 = vrot.lane.b32.xlu1 %v3258_v51, %s4180_s11  ;;  %v1101_v49 = vsel %vm275_vm12, %v1100_v37, %v1099_v35  ;;  %v2229_v6 = vsel %vm257_vm6, %v2228_v14, %v2227_v44  ;;  %v2607_v40 = vrot.slane %v5283_v21, 5  ;;  %v2608_v46 = vrot.slane %v5275_v50, 4 }
0x3293   :  { %v3454_v8 = vadd.f32 -0.9189385, %v1086_v52  ;;  %v1474_v38 = vrot.slane %v5292_v54, 6  ;;  %v2232_v24 = vrot.slane %v5287_v18, 1  ;;  %v2231_v22 = vsel %vm260_vm7, %v2230_v48, %v2229_v6 }
0x3294   :  { %v2610_v32 = vrot.slane %v5279_v10, 3  ;;  %v1476_v47 = vrot.slane %v5301_v63, 5  ;;  %v2609_v0 = vsel %vm257_vm6, %v2608_v46, %v2607_v40  ;;  %v2987_v41 = vrot.slane %v5283_v21, 6 }
0x3295   :  { %v2988_v51 = vrot.slane %v5275_v50, 5  ;;  %v2233_v11 = vsel %vm263_vm8, %v2232_v24, %v2231_v22  ;;  %v2612_v31 = vrot.slane %v5287_v18, 2  ;;  %v1478_v57 = vrot.slane %v5311_v45, 4 }
0x3296   :  { %722 = vrot.lane.b32.xlu1 %v721_v7, %s4181_s5  ;;  %v2611_v23 = vsel %vm260_vm7, %v2610_v32, %v2609_v0  ;;  %v2990_v60 = vrot.slane %v5279_v10, 4  ;;  %v2235_v33 = vrot.slane %v5301_v63, 7  ;;  %v2234_v3 = vsel %vm266_vm9, %v5292_v54, %v2233_v11  ;;  %v4163_v11 = vld [vmem:[%s5537_s3 + $0x8] sm:$0xff] }
0x3297   :  { %v2989_v62 = vsel %vm257_vm6, %v2988_v51, %v2987_v41  ;;  %v2614_v55 = vrot.slane %v5292_v54, 1  ;;  %v2992_v28 = vrot.slane %v5287_v18, 3  ;;  %v2994_v35 = vrot.slane %v5292_v54, 2  ;;  %v4162_v51 = vld [vmem:[%s5537_s3] sm:$0xff] }
0x3298   :  { %v2236_v37 = vsel %vm269_vm10, %v2235_v33, %v2234_v3  ;;  %v2996_v14 = vrot.slane %v5301_v63, 1  ;;  %v2999_v6 = vrot.slane %v5319_v4, 7  ;;  %v1851_v24 = vrot.slane %v5279_v10, 1 }
0x3299   :  { %v3367_v22 = vrot.slane %v5283_v21, 7  ;;  %v3368_v32 = vrot.slane %v5275_v50, 6  ;;  %v3370_v0 = vrot.slane %v5279_v10, 5  ;;  %v3374_v3 = vrot.slane %v5292_v54, 3 }
0x329b   :  { %v3369_v41 = vsel %vm257_vm6, %v3368_v32, %v3367_v22 }
0x3304   :  { %v3260_v5 = vpop.permute.xlu1 %3259 }
0x3305   :  { %v3262_v59 = vadd.f32 %v3260_v5, %v5265_v1  ;;  %v1468_v1 = vrot.slane %v5283_v21, 2  ;;  %v1480_v5 = vrot.slane %v5319_v4, 3 }
0x3307   :  { %3264 = vrot.lane.b32.xlu0 %v3262_v59, %s4176_s23  ;;  %v1470_v16 = vsel %vm257_vm6, %v1469_v17, %v1468_v1  ;;  %v2613_v59 = vsel %vm263_vm8, %v2612_v31, %v2611_v23  ;;  %v2239_v1 = vrot.slane %v5319_v4, 5  ;;  %v3343_v31 = vrot.slane %v4163_v11, 6  ;;  %v4164_v23 = vld [vmem:[%s5537_s3 + $0x10] sm:$0xff] }
0x3308   :  { %v723_v42 = vpop.permute.xlu1 %722  ;;  %v1471_v58 = vsel %vm260_vm7, %v5279_v10, %v1470_v16  ;;  %v2617_v16 = vrot.slane %v5311_v45, 7  ;;  %v3371_v10 = vsel %vm260_vm7, %v3370_v0, %v3369_v41 }
0x3309   :  { %v725_v29 = vsub.f32 %v3448_v27, %v723_v42  ;;  %v1473_v20 = vsel %vm263_vm8, %v1472_v2, %v1471_v58  ;;  %v2237_v27 = vrot.slane %v5311_v45, 6  ;;  %v2991_v42 = vsel %vm260_vm7, %v2990_v60, %v2989_v62 }
0x330a   :  { %v1475_v7 = vsel %vm266_vm9, %v1474_v38, %v1473_v20  ;;  %v2993_v17 = vsel %vm263_vm8, %v2992_v28, %v2991_v42  ;;  %v2619_v2 = vrot.slane %v5319_v4, 6  ;;  %v1849_v38 = vrot.slane %v5275_v50, 2 }
0x330b   :  { %727 = vrot.lane.b32.xlu0 %v725_v29, %s4182_s2  ;;  %v1477_v25 = vsel %vm269_vm10, %v1476_v47, %v1475_v7  ;;  %v2615_v29 = vsel %vm266_vm9, %v2614_v55, %v2613_v59  ;;  %v2995_v52 = vsel %vm266_vm9, %v2994_v35, %v2993_v17  ;;  %v3342_v7 = vrot.slane %v4162_v51, 7 }
0x330c   :  { %v1479_v56 = vsel %vm272_vm11, %v1478_v57, %v1477_v25  ;;  %v2616_v44 = vsel %vm269_vm10, %v5301_v63, %v2615_v29  ;;  %v2997_v58 = vsel %vm269_vm10, %v2996_v14, %v2995_v52  ;;  %v3372_v57 = vrot.slane %v5287_v18, 4 }
0x330d   :  { %v2998_v40 = vsel %vm272_vm11, %v5311_v45, %v2997_v58  ;;  %v3345_v60 = vrot.slane %v4164_v23, 5  ;;  %v1856_v25 = vrot.slane %v5301_v63, 6  ;;  %v3344_v33 = vsel %vm257_vm6, %v3343_v31, %v3342_v7  ;;  %v4170_v31 = vld [vmem:[%s5538_s12] ss:$0 sm:$0xff]  ;;  %s4184_s12 = smov 8  }
0x330e   :  { %v3000_v46 = vsel %vm275_vm12, %v2999_v6, %v2998_v40  ;;  %v3373_v55 = vsel %vm263_vm8, %v3372_v57, %v3371_v10  ;;  %v1858_v59 = vrot.slane %v5311_v45, 5  ;;  %v1860_v29 = vrot.slane %v5319_v4, 4 }
0x330f   :  { %1102 = vrot.lane.b32.xlu0 %v1101_v49, %s4181_s5  ;;  %v1481_v49 = vsel %vm275_vm12, %v1480_v5, %v1479_v56  ;;  %v3346_v28 = vsel %vm260_vm7, %v3345_v60, %v3344_v33  ;;  %v3375_v42 = vsel %vm266_vm9, %v3374_v3, %v3373_v55 }
0x3379   :  { %v3265_v9 = vpop.permute.xlu0 %3264 }
0x337a   :  { %3904 = vmatmul.mubr.msk.f32.vlgmr.msra.gmra.mrb[22].mxu1 %vm402_vm15, %v3265_v9  ;;  %v2238_v9 = vsel %vm272_vm11, %v2237_v27, %v2236_v37  ;;  %v3376_v27 = vrot.slane %v5301_v63, 2  ;;  %v4167_v63 = vld [vmem:[%s5537_s3 + $0x28] sm:$0xff] }
0x337c   :  { %v3377_v17 = vsel %vm269_vm10, %v3376_v27, %v3375_v42 }
0x337d   :  { %v728_v34 = vpop.permute.xlu0 %727 }
0x337e   :  { %v730_v61 = vsel %vm119_vm2, %v728_v34, 0.0  ;;  %v2240_v34 = vsel %vm275_vm12, %v2239_v1, %v2238_v9  ;;  %v3378_v1 = vrot.slane %v5311_v45, 1  ;;  %v3351_v9 = vrot.slane %v4167_v63, 2  ;;  %v4168_v45 = vld [vmem:[%s5537_s3 + $0x30] sm:$0xff] }
0x337f   :  { %731 = vadd.xlane.f32.xlu1 %v730_v61  ;;  %v2618_v61 = vsel %vm272_vm11, %v2617_v16, %v2616_v44  ;;  %v1466_v44 = vsub.f32 0.0, %v4792_v30 }
0x3380   :  { %v2620_v48 = vsel %vm275_vm12, %v2619_v2, %v2618_v61  ;;  %v3353_v2 = vrot.slane %v4168_v45, 1 }
0x3381   :  { %v1103_v26 = vpop.permute.xlu0 %1102  ;;  %v3460_v58 = vadd.f32 -0.9189385, %v1466_v44  ;;  %v5556_v44 = vld [vmem:[#allocation3_spill] sm:$0xff] }
0x3382   :  { %v1105_v43 = vsub.f32 %v3454_v8, %v1103_v26  ;;  %v1848_v8 = vrot.slane %v5283_v21, 3  ;;  %v1854_v21 = vrot.slane %v5292_v54, 7  ;;  %v4166_v54 = vld [vmem:[%s5537_s3 + $0x20] sm:$0xff] }
0x3383   :  { %v3349_v37 = vrot.slane %v4166_v54, 3  ;;  %v5555_v54 = vld [vmem:[#allocation5_spill] sm:$0xff] }
0x3384   :  { %1107 = vrot.lane.b32.xlu0 %v1105_v43, %s4182_s2  ;;  %v1850_v43 = vsel %vm257_vm6, %v1849_v38, %v1848_v8  ;;  %v4169_v8 = vld [vmem:[%s5537_s3 + $0x38] sm:$0xff]  ;;  %vm3417_vm6 = vcmask 97280  }
0x3385   :  { %v1852_v47 = vsel %vm260_vm7, %v1851_v24, %v1850_v43  ;;  %vm3419_vm7 = vcmask 130048  }
0x3386   :  { %v1853_v50 = vsel %vm263_vm8, %v5287_v18, %v1852_v47  ;;  %v4165_v18 = vld [vmem:[%s5537_s3 + $0x18] sm:$0xff]  ;;  %v1846_v47 = vsub.f32 0.0, %v4886_v39  ;;  %v2985_v39 = vsub.f32 0.0, %v5227_v53 }
0x3387   :  { %v1855_v62 = vsel %vm266_vm9, %v1854_v21, %v1853_v50  ;;  %v3347_v5 = vrot.slane %v4165_v18, 4  ;;  %v2225_v50 = vsub.f32 0.0, %v5040_v12 }
0x3388   :  { %v1857_v56 = vsel %vm269_vm10, %v1856_v25, %v1855_v62  ;;  %v3466_v51 = vadd.f32 -0.9189385, %v1846_v47  ;;  %v3484_v25 = vadd.f32 -0.9189385, %v2985_v39 }
0x3389   :  { %v3348_v35 = vsel %vm263_vm8, %v3347_v5, %v3346_v28  ;;  %v3472_v10 = vadd.f32 -0.9189385, %v2225_v50  ;;  %vm3421_vm8 = vcmask 162816  }
0x338a   :  { %v3350_v16 = vsel %vm266_vm9, %v3349_v37, %v3348_v35  ;;  %vm3423_vm9 = vcmask 195584  }
0x338b   :  { %v3352_v61 = vsel %vm269_vm10, %v3351_v9, %v3350_v16  ;;  %vm3425_vm10 = vcmask 228352  }
0x338c   :  { %v3354_v30 = vsel %vm272_vm11, %v3353_v2, %v3352_v61 }
0x338d   :  { %v3355_v38 = vsel %vm275_vm12, %v4169_v8, %v3354_v30 }
0x3390   :  { %1482 = vrot.lane.b32.xlu1 %v1481_v49, %s4181_s5  ;;  %v1859_v49 = vsel %vm272_vm11, %v1858_v59, %v1857_v56 }
0x3391   :  { %v1861_v14 = vsel %vm275_vm12, %v1860_v29, %v1859_v49 }
0x3394   :  { %2241 = vrot.lane.b32.xlu1 %v2240_v34, %s4181_s5  ;;  %v3379_v34 = vsel %vm272_vm11, %v3378_v1, %v3377_v17 }
0x3398   :  { %2621 = vrot.lane.b32.xlu1 %v2620_v48, %s4181_s5  ;;  %v3380_v48 = vsel %vm275_vm12, %v5319_v4, %v3379_v34 }
0x339c   :  { %3001 = vrot.lane.b32.xlu1 %v3000_v46, %s4181_s5  ;;  %v2605_v46 = vsub.f32 0.0, %v5134_v15 }
0x339e   :  { %v3478_v4 = vadd.f32 -0.9189385, %v2605_v46 }
0x33f6   :  { %v1108_v26 = vpop.permute.xlu0 %1107 }
0x33f7   :  { %v1110_v20 = vsel %vm119_vm2, %v1108_v26, 0.0 }
0x33f8   :  { %1111 = vadd.xlane.f32.xlu0 %v1110_v20 }
0x340c   :  { %v732_v52 = vpop.xlane.xlu1 %731 }
0x340e   :  { %1862 = vrot.lane.b32.xlu0 %v1861_v14, %s4181_s5  ;;  %v5557_v14 = vld [vmem:[#allocation4_spill] sm:$0xff] }
0x3410   :  { %v1483_v6 = vpop.permute.xlu1 %1482 }
0x3411   :  { %v1485_v40 = vsub.f32 %v3460_v58, %v1483_v6 }
0x3412   :  { %3381 = vrot.lane.b32.xlu0 %v3380_v48, %s4181_s5 }
0x3413   :  { %1487 = vrot.lane.b32.xlu1 %v1485_v40, %s4182_s2 }
0x3414   :  { %v2242_v26 = vpop.permute.xlu1 %2241 }
0x3415   :  { %v2244_v60 = vsub.f32 %v3472_v10, %v2242_v26  ;;  %v5558_v26 = vld [vmem:[#allocation2_spill] sm:$0xff] }
0x3416   :  { %3356 = vrot.lane.b32.xlu0 %v3355_v38, %s4181_s5 }
0x3418   :  { %v2622_v20 = vpop.permute.xlu1 %2621 }
0x3419   :  { %v2624_v24 = vsub.f32 %v3478_v4, %v2622_v20 }
0x341c   :  { %v3002_v32 = vpop.permute.xlu1 %3001 }
0x341d   :  { %v3004_v62 = vsub.f32 %v3484_v25, %v3002_v32 }
0x344d   :  { %v3334_v43 = vpop.f32.mrb[22].mxu1 }
0x344e   :  { %v3905_v22 = vpop.f32.mrb[23].mxu1  ;;  %v3335_v21 = vadd.f32 %v4170_v31, %v3334_v43 }
0x3450   :  { %v3338_v57 = vmax.f32 %v3335_v21, -20.0 }
0x3452   :  { %v3339_v23 = vmin.f32 %v3338_v57, 2.0 }
0x3454   :  { %v3365_v33 = vsub.f32 0.0, %v3339_v23  ;;  %v3340_v9 = vmul.f32 1.442695, %v3339_v23 }
0x3456   :  { %v3490_v55 = vadd.f32 -0.9189385, %v3365_v33  ;;  %4149 = vpow2.f32 %v3340_v9 }
0x3485   :  { %v1488_v0 = vpop.permute.xlu1 %1487  ;;  %v1112_v41 = vpop.xlane.xlu0 %1111 }
0x3486   :  { %v1490_v15 = vsel %vm119_vm2, %v1488_v0, 0.0  ;;  %v1113_v53 = vadd.f32 %v1112_v41, %v732_v52 }
0x3487   :  { %1491 = vadd.xlane.f32.xlu1 %v1490_v15 }
0x3489   :  { %v1863_v7 = vpop.permute.xlu0 %1862 }
0x348a   :  { %v1865_v11 = vsub.f32 %v3466_v51, %v1863_v7 }
0x348c   :  { %1867 = vrot.lane.b32.xlu0 %v1865_v11, %s4182_s2 }
0x348d   :  { %v3382_v3 = vpop.permute.xlu0 %3381 }
0x348e   :  { %v3384_v18 = vsub.f32 %v3490_v55, %v3382_v3 }
0x3491   :  { %v3357_v5 = vpop.permute.xlu0 %3356 }
0x3498   :  { %2246 = vrot.lane.b32.xlu1 %v2244_v60, %s4182_s2 }
0x349c   :  { %3006 = vrot.lane.b32.xlu1 %v3004_v62, %s4182_s2 }
0x34a0   :  { %3386 = vrot.lane.b32.xlu1 %v3384_v18, %s4182_s2 }
0x34fe   :  { %v1868_v12 = vpop.permute.xlu0 %1867 }
0x34ff   :  { %v1870_v59 = vsel %vm119_vm2, %v1868_v12, 0.0 }
0x3500   :  { %1871 = vadd.xlane.f32.xlu0 %v1870_v59 }
0x3514   :  { %v1492_v28 = vpop.xlane.xlu1 %1491 }
0x3515   :  { %v1493_v56 = vadd.f32 %v1492_v28, %v1113_v53 }
0x3516   :  { %2626 = vrot.lane.b32.xlu0 %v2624_v24, %s4182_s2 }
0x3518   :  { %v2247_v27 = vpop.permute.xlu1 %2246 }
0x3519   :  { %v2249_v42 = vsel %vm119_vm2, %v2247_v27, 0.0 }
0x351a   :  { %2250 = vadd.xlane.f32.xlu1 %v2249_v42 }
0x351c   :  { %v3007_v37 = vpop.permute.xlu1 %3006 }
0x3520   :  { %v3387_v29 = vpop.permute.xlu1 %3386 }
0x3521   :  { %v3389_v35 = vsel %vm119_vm2, %v3387_v29, 0.0 }
0x352b   :  { %3396 = vrot.lane.b32.xlu1 %v4797_v13, %s4184_s12  ;;  %v4150_v13 = vpop.eup %4149 }
0x352c   :  { %v3359_v16 = vmul.f32 %v4150_v13, %v3357_v5 }
0x352f   :  { %3399 = vrot.lane.b32.xlu1 %v4891_v19, %s4185_s7  ;;  %v3009_v19 = vsel %vm119_vm2, %v3007_v37, 0.0 }
0x3533   :  { %3405 = vrot.lane.b32.xlu1 %v5555_v54, %s4186_s25 }
0x3557   :  { %3390 = vadd.xlane.f32.xlu1 %v3389_v35 }
0x358d   :  { %v1872_v49 = vpop.xlane.xlu0 %1871 }
0x358e   :  { %v1873_v1 = vadd.f32 %v1872_v49, %v1493_v56 }
0x3591   :  { %v2627_v17 = vpop.permute.xlu0 %2626 }
0x3592   :  { %v2629_v63 = vsel %vm119_vm2, %v2627_v17, 0.0 }
0x3593   :  { %2630 = vadd.xlane.f32.xlu0 %v2629_v63 }
0x35a7   :  { %v2251_v2 = vpop.xlane.xlu1 %2250 }
0x35a8   :  { %v2252_v48 = vadd.f32 %v2251_v2, %v1873_v1 }
0x35a9   :  { %3361 = vrot.lane.b32.xlu0 %v3359_v16, %s4182_s2 }
0x35ab   :  { %v3397_v61 = vpop.permute.xlu1 %3396 }
0x35af   :  { %v3400_v58 = vpop.permute.xlu1 %3399 }
0x35b3   :  { %v3406_v6 = vpop.permute.xlu1 %3405 }
0x35c8   :  { %3010 = vadd.xlane.f32.xlu0 %v3009_v19 }
0x35de   :  { %3393 = vrot.lane.b32.xlu0 %v5556_v44, %s4181_s5 }
0x35e2   :  { %3402 = vrot.lane.b32.xlu0 %v5557_v14, %s4187_s26 }
0x35e4   :  { %v3391_v8 = vpop.xlane.xlu1 %3390 }
0x35e6   :  { %3408 = vrot.lane.b32.xlu0 %v5232_v36, %s4188_s1 }
0x3620   :  { %v2631_v52 = vpop.xlane.xlu0 %2630 }
0x3621   :  { %v2632_v30 = vadd.f32 %v2631_v52, %v2252_v48 }
0x3624   :  { %v3362_v34 = vpop.permute.xlu0 %3361 }
0x3625   :  { %v3364_v45 = vadd.f32 %v3362_v34, %v3335_v21 }
0x3627   :  { %3412 = vrot.lane.b32.xlu1 %v3364_v45, %s4189_s27 }
0x3655   :  { %v3011_v40 = vpop.xlane.xlu0 %3010 }
0x3656   :  { %v3012_v46 = vadd.f32 %v3011_v40, %v2632_v30 }
0x3658   :  { %v3392_v38 = vadd.f32 %v3391_v8, %v3012_v46 }
0x3659   :  { %v3394_v36 = vpop.permute.xlu0 %3393 }
0x365a   :  { %3429 = vst.msk [vmem:[%s5539_s14] sm:$0xff] %vm3428_vm1, %v3392_v38  ;;  %v3415_v4 = vsel %vm119_vm2, %v5558_v26, %v3394_v36 }
0x365b   :  { %v3416_v20 = vsel %vm283_vm13, %v3415_v4, %v3397_v61 }
0x365c   :  { %v3418_v43 = vsel %vm3417_vm6, %v3416_v20, %v3400_v58 }
0x365d   :  { %v3403_v24 = vpop.permute.xlu0 %3402 }
0x365e   :  { %v3420_v22 = vsel %vm3419_vm7, %v3418_v43, %v3403_v24 }
0x365f   :  { %v3422_v47 = vsel %vm3421_vm8, %v3420_v22, %v3406_v6 }
0x3661   :  { %v3409_v32 = vpop.permute.xlu0 %3408 }
0x3662   :  { %v3424_v0 = vsel %vm3423_vm9, %v3422_v47, %v3409_v32 }
0x3699   :  { %v3413_v41 = vpop.permute.xlu1 %3412 }
0x369a   :  { %v3426_v15 = vsel %vm3425_vm10, %v3424_v0, %v3413_v41 }
0x369b   :  { %3427 = vst.msk [vmem:[%s5540_s13] sm:$0xff] %vm402_vm15, %v3426_v15 }

</bundles_post_ra>
